<compile_context>
chip_gen: v7x
topology: tpu7x:2x2x1
jax: 0.10.0
libtpu: 0.0.40
codegen_flags: <defaults>
</compile_context>

<pallas_src>
import functools

import jax
import jax.numpy as jnp
from jax import lax
from jax.experimental import pallas as pl
from jax.experimental.pallas import tpu as pltpu


_ACC_W = 128                      # lane-aligned running top-k width (first k slots live)
_LOW_BITS = 12                    # key low bits carrying the candidate position
_LOW_MASK = (1 << _LOW_BITS) - 1
_I32_MIN = -(2 ** 31)


def _f32_to_monotone_i32(x):
    """Bit-trick: map f32 -> int32 so that integer order == float order."""
    b = pltpu.bitcast(x, jnp.int32)
    return jnp.where(b >= 0, b, b ^ jnp.int32(0x7FFFFFFF))


def _monotone_i32_to_f32(m):
    """Inverse of _f32_to_monotone_i32 (the mapping is an involution)."""
    b = jnp.where(m >= 0, m, m ^ jnp.int32(0x7FFFFFFF))
    return pltpu.bitcast(b, jnp.float32)


# ---------------------------------------------------------------------------
# Fused kernel: per db tile -> MXU scores -> (gated) merge into running top-k
# ---------------------------------------------------------------------------
def _mips_topk_kernel(qn_ref, db_ref, vals_ref, idxs_ref, *,
                      k, n_total, tile_n, gate_merge):
    # qn_ref:   (tile_q, D_pad) bf16 unit-norm queries (resident per q block)
    # db_ref:   (tile_n, D_pad) bf16 unit-norm db tile (streamed over axis 1)
    # vals_ref: (tile_q, _ACC_W) f32 running top-k values  (output, resident)
    # idxs_ref: (tile_q, _ACC_W) i32 running top-k indices (output, resident)
    j = pl.program_id(1)

    @pl.when(j == 0)
    def _init():
        vals_ref[...] = jnp.full(vals_ref.shape, -jnp.inf, vals_ref.dtype)
        idxs_ref[...] = jnp.zeros(idxs_ref.shape, idxs_ref.dtype)

    # MXU inner products; contract dim 1 of BOTH operands so the (tile_n, D)
    # db tile never needs a transpose / relayout in VMEM.
    scores = lax.dot_general(
        qn_ref[...], db_ref[...],
        dimension_numbers=(((1,), (1,)), ((), ())),
        preferred_element_type=jnp.float32)                     # (tile_q, tile_n)

    # Mask padded db columns (ragged N).
    col = lax.broadcasted_iota(jnp.int32, scores.shape, 1) + j * tile_n
    scores = jnp.where(col < n_total, scores, -jnp.inf)

    acc_v = vals_ref[...]                                       # (tile_q, _ACC_W)

    def _merge():
        acc_i = idxs_ref[...]
        cand = jnp.concatenate([acc_v, scores], axis=-1)        # (tile_q, W)
        w = cand.shape[-1]
        pos = lax.broadcasted_iota(jnp.int32, cand.shape, 1)
        rev = jnp.int32(w - 1) - pos                            # ties prefer low pos
        # Packed key: score (monotone in int32 order) with its low _LOW_BITS
        # bits replaced by the candidate position.  One jnp.max per selection
        # pass yields value AND position; keys are unique per row, so the
        # knockout is a single exact-equality select.  Score granularity: the
        # low 12 mantissa bits (<= 2^-12 relative) are dropped.  A NaN score
        # would win the max but still decodes to a valid in-range index.
        key = (_f32_to_monotone_i32(cand) & jnp.int32(~_LOW_MASK)) | rev

        slot = lax.broadcasted_iota(jnp.int32, acc_v.shape, 1)  # (tile_q, 128)
        new_v = jnp.full(acc_v.shape, -jnp.inf, jnp.float32)
        new_i = jnp.zeros(acc_i.shape, jnp.int32)
        for t in range(k):
            m = jnp.max(key, axis=-1, keepdims=True)            # (tile_q, 1)
            sel = jnp.int32(w - 1) - (m & jnp.int32(_LOW_MASK))  # winner position
            val = _monotone_i32_to_f32(m & jnp.int32(~_LOW_MASK))
            # Winner from the accumulator -> look up its stored global index
            # (128-wide select+reduce); winner from the tile -> pure arithmetic.
            idx_acc = jnp.max(
                jnp.where(slot == sel, acc_i, jnp.int32(_I32_MIN)),
                axis=-1, keepdims=True)
            idx_tile = sel - _ACC_W + j * tile_n
            idx = jnp.where(sel < _ACC_W, idx_acc, idx_tile)
            new_v = jnp.where(slot == t, val, new_v)
            new_i = jnp.where(slot == t, idx, new_i)
            key = jnp.where(key == m, jnp.int32(_I32_MIN), key)  # knock out winner
        # Lane-dense 128-wide stores to the resident output blocks; the HBM
        # writeback happens once, when the grid finishes this q block.
        vals_ref[...] = new_v
        idxs_ref[...] = new_i

    if gate_merge:
        # Cheap rejection test: merge only if some row's best tile score can
        # improve that row's current k-th value.  For large N most tiles skip
        # the merge and the per-tile cost is just the streamed matmul.
        gap = jnp.max(scores, axis=-1, keepdims=True) - acc_v[:, k - 1:k]
        pl.when(jnp.max(gap) > 0.0)(_merge)
    else:
        _merge()


# ---------------------------------------------------------------------------
# Wrapper reproducing inner_product(x, y, k, normalize=True) semantics
# ---------------------------------------------------------------------------
def mips_search(queries, db, k=10, tile_n=1024, q_tile=None, gate_merge=True):
    """Pallas equivalent of Mips.np_search / inner_product (normalize=True).

    queries: (Q, D) f32, db: (N, D) f32.  Returns (scores (Q, k) f32,
    indices (Q, k) i32), descending by score.  Batch queries (Q in the
    hundreds) when possible: Q is the MXU row count and sets the arithmetic
    intensity of the streamed db read.
    """
    Q, D = queries.shape
    N, D2 = db.shape
    assert D == D2
    assert tile_n % 128 == 0
    assert _ACC_W + tile_n <= (1 << _LOW_BITS), "tile_n too large for packed keys"
    assert 0 < k <= min(N, tile_n, _ACC_W)

    # --- one-time prep (single cheap XLA pass over the inputs) -------------
    q_ss = jnp.maximum(jnp.sum(queries * queries, axis=-1, keepdims=True), 1e-30)
    qn = (queries * lax.rsqrt(q_ss)).astype(jnp.bfloat16)
    db_ss = jnp.maximum(jnp.sum(db * db, axis=-1, keepdims=True), 1e-30)
    dbn = (db * lax.rsqrt(db_ss)).astype(jnp.bfloat16)   # pre-normalized bf16 stream

    # Zero-pad D to the 128-lane boundary (zero columns don't change scores).
    d_pad = 128 * pl.cdiv(D, 128)
    if d_pad != D:
        qn = jnp.pad(qn, ((0, 0), (0, d_pad - D)))
        dbn = jnp.pad(dbn, ((0, 0), (0, d_pad - D)))

    # Pad N to a multiple of tile_n; padded columns are masked in-kernel.
    n_pad = tile_n * pl.cdiv(N, tile_n)
    if n_pad != N:
        dbn = jnp.pad(dbn, ((0, n_pad - N), (0, 0)))

    # Pad Q (bf16 sublane packing = 16) and pick the query-block size: one
    # block for typical batches, multiple blocks for large batches so the
    # leading "parallel" grid axis can use both TensorCores on v7x.
    q16 = 16 * pl.cdiv(Q, 16)
    if q_tile is None:
        q_tile = q16 if q16 <= 512 else 256
    assert q_tile % 16 == 0
    q_pad = q_tile * pl.cdiv(Q, q_tile)
    if q_pad != Q:
        qn = jnp.pad(qn, ((0, q_pad - Q), (0, 0)))

    kernel = functools.partial(_mips_topk_kernel, k=k, n_total=N,
                               tile_n=tile_n, gate_merge=gate_merge)
    vals, idxs = pl.pallas_call(
        kernel,
        out_shape=(
            jax.ShapeDtypeStruct((q_pad, _ACC_W), jnp.float32),
            jax.ShapeDtypeStruct((q_pad, _ACC_W), jnp.int32),
        ),
        grid=(q_pad // q_tile, n_pad // tile_n),
        in_specs=[
            pl.BlockSpec((q_tile, d_pad), lambda i, j: (i, 0)),   # queries, resident
            pl.BlockSpec((tile_n, d_pad), lambda i, j: (j, 0)),   # db tile, streamed
            # TODO(synk): if the db DMA shows up exposed once the merge is
            # gated, add pipeline_mode=pl.Buffered(3) here and sweep 2 vs 3.
        ],
        out_specs=(
            pl.BlockSpec((q_tile, _ACC_W), lambda i, j: (i, 0)),  # top-k values
            pl.BlockSpec((q_tile, _ACC_W), lambda i, j: (i, 0)),  # top-k indices
        ),
        compiler_params=pltpu.CompilerParams(
            # q-block axis is independent (megacore on v7x); the N axis carries
            # the running top-k accumulator -> reduction axis.
            dimension_semantics=("parallel", "arbitrary"),
            vmem_limit_bytes=32 * 1024 * 1024,
        ),
    )(qn, dbn)
    return vals[:Q, :k], idxs[:Q, :k]


if __name__ == "__main__":
    key = jax.random.PRNGKey(0)
    kq, kdb = jax.random.split(key)

    Q, D, N, K = 8, 64, 320, 5          # N deliberately not a multiple of tile_n
    TILE_N = 128                        # small demo tile; default is 1024

    queries = jax.random.normal(kq, (Q, D), dtype=jnp.float32)
    # "database embeddings" stand in for the encoded memory; deterministic init
    db = jax.random.normal(kdb, (N, D), dtype=jnp.float32)

    try:
        top_scores, top_indices = mips_search(queries, db, k=K, tile_n=TILE_N)
        jax.block_until_ready((top_scores, top_indices))
    except Exception:
        # TODO(synk): the merge gate relies on vector->scalar reductions feeding
        # scf.if; fall back to the ungated merge if this Mosaic version cannot
        # lower that construct.
        top_scores, top_indices = mips_search(queries, db, k=K, tile_n=TILE_N,
                                              gate_merge=False)
        jax.block_until_ready((top_scores, top_indices))

    # The gate only skips tiles that cannot change the running top-k, so the
    # ungated path must produce the same result.
    ug_scores, ug_indices = mips_search(queries, db, k=K, tile_n=TILE_N,
                                        gate_merge=False)
    jax.block_until_ready((ug_scores, ug_indices))
    assert jnp.allclose(top_scores, ug_scores, atol=1e-6), "gated/ungated score mismatch"
    assert bool(jnp.all(top_indices == ug_indices)), "gated/ungated index mismatch"

    # ---- reference with the same normalize -> bf16 matmul pipeline --------
    qn_f = queries * lax.rsqrt(
        jnp.maximum(jnp.sum(queries * queries, axis=-1, keepdims=True), 1e-30))
    dbn_f = db * lax.rsqrt(
        jnp.maximum(jnp.sum(db * db, axis=-1, keepdims=True), 1e-30))
    full = jnp.dot(qn_f.astype(jnp.bfloat16), dbn_f.astype(jnp.bfloat16).T,
                   preferred_element_type=jnp.float32)
    ref_scores, _ = lax.top_k(full, K)

    # kernel's reported score at each returned index equals that row's score
    gathered = jnp.take_along_axis(full, top_indices, axis=1)
    assert jnp.allclose(top_scores, gathered, atol=2e-3, rtol=1e-3), \
        "index/score mismatch"
    # kernel's scores are the true top-k values, in descending order
    assert jnp.allclose(top_scores, ref_scores, atol=2e-3, rtol=1e-3), \
        "top-k scores mismatch"
    assert bool(jnp.all(top_scores[:, :-1] >= top_scores[:, 1:] - 1e-6)), \
        "not descending"
    # sanity vs the exact f32 inner_product(normalize=True) semantics
    qn32 = queries / jnp.linalg.norm(queries, axis=1, keepdims=True)
    dbn32 = db / jnp.linalg.norm(db, axis=1, keepdims=True)
    f32_scores, _ = lax.top_k(qn32 @ dbn32.T, K)
    assert jnp.allclose(top_scores, f32_scores, atol=3e-2, rtol=3e-2), \
        "f32 semantics drift"
    # indices are valid db rows
    assert bool(jnp.all((top_indices >= 0) & (top_indices < N))), "index out of range"

    print("KERNEL_OK")
</pallas_src>

<mosaic_0001>
module attributes {stable_mosaic.version = 11 : i64} {
  func.func @_mips_topk_kernel(%arg0: i32, %arg1: i32, %arg2: memref<16x128xbf16, #tpu.memory_space<vmem>>, %arg3: memref<128x128xbf16, #tpu.memory_space<vmem>>, %arg4: memref<16x128xf32, #tpu.memory_space<vmem>>, %arg5: memref<16x128xi32, #tpu.memory_space<vmem>>) attributes {dimension_semantics = [#tpu.dimension_semantics<parallel>, #tpu.dimension_semantics<arbitrary>], iteration_bounds = array<i64: 1, 3>, scalar_prefetch = 0 : i64, scratch_operands = 0 : i64, tpu.core_type = #tpu.core_type<tc>, window_params = [{transform_indices = @transform_0, window_bounds = array<i64: 16, 128>}, {transform_indices = @transform_1, window_bounds = array<i64: 128, 128>}, {transform_indices = @transform_2, window_bounds = array<i64: 16, 128>}, {transform_indices = @transform_3, window_bounds = array<i64: 16, 128>}]} {
    %c0_i32 = arith.constant 0 : i32
    %0 = arith.cmpi eq, %arg1, %c0_i32 : i32
    %1 = arith.extui %0 : i1 to i32
    %c0_i32_0 = arith.constant 0 : i32
    %2 = arith.cmpi ne, %1, %c0_i32_0 : i32
    scf.if %2 {
      %cst_11 = arith.constant 0xFF800000 : f32
      %26 = vector.broadcast %cst_11 : f32 to vector<16x128xf32>
      %c0_12 = arith.constant 0 : index
      %c0_13 = arith.constant 0 : index
      %27 = vector.load %arg4[%c0_12, %c0_13] : memref<16x128xf32, #tpu.memory_space<vmem>>, vector<16x128xf32>
      tpu.vector_store %arg4[%c0_12, %c0_13], %26 {strides = array<i32>} : memref<16x128xf32, #tpu.memory_space<vmem>>, vector<16x128xf32>,
      %c0_i32_14 = arith.constant 0 : i32
      %28 = vector.broadcast %c0_i32_14 : i32 to vector<16x128xi32>
      %c0_15 = arith.constant 0 : index
      %c0_16 = arith.constant 0 : index
      %29 = vector.load %arg5[%c0_15, %c0_16] : memref<16x128xi32, #tpu.memory_space<vmem>>, vector<16x128xi32>
      tpu.vector_store %arg5[%c0_15, %c0_16], %28 {strides = array<i32>} : memref<16x128xi32, #tpu.memory_space<vmem>>, vector<16x128xi32>,
    } else {
    }
    %c0 = arith.constant 0 : index
    %c0_1 = arith.constant 0 : index
    %3 = vector.load %arg2[%c0, %c0_1] : memref<16x128xbf16, #tpu.memory_space<vmem>>, vector<16x128xbf16>
    %c0_2 = arith.constant 0 : index
    %c0_3 = arith.constant 0 : index
    %4 = vector.load %arg3[%c0_2, %c0_3] : memref<128x128xbf16, #tpu.memory_space<vmem>>, vector<128x128xbf16>
    %cst = arith.constant dense<0.000000e+00> : vector<16x128xf32>
    %5 = tpu.matmul %3, %4, %cst {dimension_numbers = #tpu.dot_dimension_numbers<[1], [1], [0], [0], [0, 0, 1, 0], [], []>} : vector<16x128xbf16>, vector<128x128xbf16>, vector<16x128xf32> -> vector<16x128xf32>
    %6 = tpu.iota {dimensions = array<i32: 1>} : vector<16x128xi32>
    %c128_i32 = arith.constant 128 : i32
    %7 = arith.muli %arg1, %c128_i32 : i32
    %8 = vector.broadcast %7 : i32 to vector<16x128xi32>
    %9 = arith.addi %6, %8 : vector<16x128xi32>
    %c320_i32 = arith.constant 320 : i32
    %10 = vector.broadcast %c320_i32 : i32 to vector<16x128xi32>
    %11 = arith.cmpi slt, %9, %10 : vector<16x128xi32>
    %cst_4 = arith.constant 0xFF800000 : f32
    %12 = vector.broadcast %cst_4 : f32 to vector<16x128xf32>
    %13 = arith.select %11, %5, %12 : vector<16x128xi1>, vector<16x128xf32>
    %c0_5 = arith.constant 0 : index
    %c0_6 = arith.constant 0 : index
    %14 = vector.load %arg4[%c0_5, %c0_6] : memref<16x128xf32, #tpu.memory_space<vmem>>, vector<16x128xf32>
    %cst_7 = arith.constant dense<0xFF800000> : vector<16xf32>
    %15 = vector.multi_reduction <maximumf>, %13, %cst_7 [1] : vector<16x128xf32> to vector<16xf32>
    %16 = vector.shape_cast %15 : vector<16xf32> to vector<16x1xf32>
    %17 = vector.extract_strided_slice %14 {offsets = [0, 4], sizes = [16, 1], strides = [1, 1]} : vector<16x128xf32> to vector<16x1xf32>
    %18 = arith.subf %16, %17 : vector<16x1xf32>
    %19 = vector.shape_cast %18 : vector<16x1xf32> to vector<1x16x1xf32>
    %cst_8 = arith.constant dense<0xFF800000> : vector<1xf32>
    %20 = vector.multi_reduction <maximumf>, %19, %cst_8 [1, 2] : vector<1x16x1xf32> to vector<1xf32>
    %21 = vector.shape_cast %20 : vector<1xf32> to vector<1x1x1xf32>
    %22 = vector.extract %21[0, 0, 0] : f32 from vector<1x1x1xf32>
    %cst_9 = arith.constant 0.000000e+00 : f32
    %23 = arith.cmpf ogt, %22, %cst_9 : f32
    %24 = arith.extui %23 : i1 to i32
    %c0_i32_10 = arith.constant 0 : i32
    %25 = arith.cmpi ne, %24, %c0_i32_10 : i32
    scf.if %25 {
      %c0_11 = arith.constant 0 : index
      %c0_12 = arith.constant 0 : index
      %26 = vector.load %arg5[%c0_11, %c0_12] : memref<16x128xi32, #tpu.memory_space<vmem>>, vector<16x128xi32>
      %27 = tpu.concatenate %14, %13 in 1 : vector<16x128xf32>, vector<16x128xf32> -> vector<16x256xf32>
      %28 = tpu.iota {dimensions = array<i32: 1>} : vector<16x256xi32>
      %c255_i32 = arith.constant 255 : i32
      %29 = vector.broadcast %c255_i32 : i32 to vector<16x256xi32>
      %30 = arith.subi %29, %28 : vector<16x256xi32>
      %31 = tpu.bitcast %27 : vector<16x256xf32> -> vector<16x256xi32>
      %c0_i32_13 = arith.constant 0 : i32
      %32 = vector.broadcast %c0_i32_13 : i32 to vector<16x256xi32>
      %33 = arith.cmpi sge, %31, %32 : vector<16x256xi32>
      %c2147483647_i32 = arith.constant 2147483647 : i32
      %34 = vector.broadcast %c2147483647_i32 : i32 to vector<16x256xi32>
      %35 = arith.xori %31, %34 : vector<16x256xi32>
      %36 = arith.select %33, %31, %35 : vector<16x256xi1>, vector<16x256xi32>
      %c-4096_i32 = arith.constant -4096 : i32
      %37 = vector.broadcast %c-4096_i32 : i32 to vector<16x256xi32>
      %38 = arith.andi %36, %37 : vector<16x256xi32>
      %39 = arith.ori %38, %30 : vector<16x256xi32>
      %40 = tpu.iota {dimensions = array<i32: 1>} : vector<16x128xi32>
      %cst_14 = arith.constant 0xFF800000 : f32
      %41 = vector.broadcast %cst_14 : f32 to vector<16x128xf32>
      %c0_i32_15 = arith.constant 0 : i32
      %42 = vector.broadcast %c0_i32_15 : i32 to vector<16x128xi32>
      %cst_16 = arith.constant dense<-2147483648> : vector<16xi32>
      %43 = vector.multi_reduction <maxsi>, %39, %cst_16 [1] : vector<16x256xi32> to vector<16xi32>
      %44 = vector.shape_cast %43 : vector<16xi32> to vector<16x1xi32>
      %c4095_i32 = arith.constant 4095 : i32
      %45 = vector.broadcast %c4095_i32 : i32 to vector<16x1xi32>
      %46 = arith.andi %44, %45 : vector<16x1xi32>
      %c255_i32_17 = arith.constant 255 : i32
      %47 = vector.broadcast %c255_i32_17 : i32 to vector<16x1xi32>
      %48 = arith.subi %47, %46 : vector<16x1xi32>
      %c-4096_i32_18 = arith.constant -4096 : i32
      %49 = vector.broadcast %c-4096_i32_18 : i32 to vector<16x1xi32>
      %50 = arith.andi %44, %49 : vector<16x1xi32>
      %c0_i32_19 = arith.constant 0 : i32
      %51 = vector.broadcast %c0_i32_19 : i32 to vector<16x1xi32>
      %52 = arith.cmpi sge, %50, %51 : vector<16x1xi32>
      %c2147483647_i32_20 = arith.constant 2147483647 : i32
      %53 = vector.broadcast %c2147483647_i32_20 : i32 to vector<16x1xi32>
      %54 = arith.xori %50, %53 : vector<16x1xi32>
      %55 = arith.select %52, %50, %54 : vector<16x1xi1>, vector<16x1xi32>
      %56 = tpu.bitcast %55 : vector<16x1xi32> -> vector<16x1xf32>
      %57 = vector.broadcast %48 : vector<16x1xi32> to vector<16x128xi32>
      %58 = arith.cmpi eq, %40, %57 : vector<16x128xi32>
      %c-2147483648_i32 = arith.constant -2147483648 : i32
      %59 = vector.broadcast %c-2147483648_i32 : i32 to vector<16x128xi32>
      %60 = arith.select %58, %26, %59 : vector<16x128xi1>, vector<16x128xi32>
      %cst_21 = arith.constant dense<-2147483648> : vector<16xi32>
      %61 = vector.multi_reduction <maxsi>, %60, %cst_21 [1] : vector<16x128xi32> to vector<16xi32>
      %62 = vector.shape_cast %61 : vector<16xi32> to vector<16x1xi32>
      %c128_i32_22 = arith.constant 128 : i32
      %63 = vector.broadcast %c128_i32_22 : i32 to vector<16x1xi32>
      %64 = arith.subi %48, %63 : vector<16x1xi32>
      %c128_i32_23 = arith.constant 128 : i32
      %65 = arith.muli %arg1, %c128_i32_23 : i32
      %66 = vector.broadcast %65 : i32 to vector<16x1xi32>
      %67 = arith.addi %64, %66 : vector<16x1xi32>
      %c128_i32_24 = arith.constant 128 : i32
      %68 = vector.broadcast %c128_i32_24 : i32 to vector<16x1xi32>
      %69 = arith.cmpi slt, %48, %68 : vector<16x1xi32>
      %70 = arith.select %69, %62, %67 : vector<16x1xi1>, vector<16x1xi32>
      %c0_i32_25 = arith.constant 0 : i32
      %71 = vector.broadcast %c0_i32_25 : i32 to vector<16x128xi32>
      %72 = arith.cmpi eq, %40, %71 : vector<16x128xi32>
      %73 = vector.shape_cast %56 : vector<16x1xf32> to vector<16x1xf32>
      %74 = vector.broadcast %73 : vector<16x1xf32> to vector<16x128xf32>
      %75 = arith.select %72, %74, %41 : vector<16x128xi1>, vector<16x128xf32>
      %c0_i32_26 = arith.constant 0 : i32
      %76 = vector.broadcast %c0_i32_26 : i32 to vector<16x128xi32>
      %77 = arith.cmpi eq, %40, %76 : vector<16x128xi32>
      %78 = vector.shape_cast %70 : vector<16x1xi32> to vector<16x1xi32>
      %79 = vector.broadcast %78 : vector<16x1xi32> to vector<16x128xi32>
      %80 = arith.select %77, %79, %42 : vector<16x128xi1>, vector<16x128xi32>
      %81 = vector.broadcast %44 : vector<16x1xi32> to vector<16x256xi32>
      %82 = arith.cmpi eq, %39, %81 : vector<16x256xi32>
      %c-2147483648_i32_27 = arith.constant -2147483648 : i32
      %83 = vector.broadcast %c-2147483648_i32_27 : i32 to vector<16x256xi32>
      %84 = arith.select %82, %83, %39 : vector<16x256xi1>, vector<16x256xi32>
      %cst_28 = arith.constant dense<-2147483648> : vector<16xi32>
      %85 = vector.multi_reduction <maxsi>, %84, %cst_28 [1] : vector<16x256xi32> to vector<16xi32>
      %86 = vector.shape_cast %85 : vector<16xi32> to vector<16x1xi32>
      %c4095_i32_29 = arith.constant 4095 : i32
      %87 = vector.broadcast %c4095_i32_29 : i32 to vector<16x1xi32>
      %88 = arith.andi %86, %87 : vector<16x1xi32>
      %c255_i32_30 = arith.constant 255 : i32
      %89 = vector.broadcast %c255_i32_30 : i32 to vector<16x1xi32>
      %90 = arith.subi %89, %88 : vector<16x1xi32>
      %c-4096_i32_31 = arith.constant -4096 : i32
      %91 = vector.broadcast %c-4096_i32_31 : i32 to vector<16x1xi32>
      %92 = arith.andi %86, %91 : vector<16x1xi32>
      %c0_i32_32 = arith.constant 0 : i32
      %93 = vector.broadcast %c0_i32_32 : i32 to vector<16x1xi32>
      %94 = arith.cmpi sge, %92, %93 : vector<16x1xi32>
      %c2147483647_i32_33 = arith.constant 2147483647 : i32
      %95 = vector.broadcast %c2147483647_i32_33 : i32 to vector<16x1xi32>
      %96 = arith.xori %92, %95 : vector<16x1xi32>
      %97 = arith.select %94, %92, %96 : vector<16x1xi1>, vector<16x1xi32>
      %98 = tpu.bitcast %97 : vector<16x1xi32> -> vector<16x1xf32>
      %99 = vector.broadcast %90 : vector<16x1xi32> to vector<16x128xi32>
      %100 = arith.cmpi eq, %40, %99 : vector<16x128xi32>
      %c-2147483648_i32_34 = arith.constant -2147483648 : i32
      %101 = vector.broadcast %c-2147483648_i32_34 : i32 to vector<16x128xi32>
      %102 = arith.select %100, %26, %101 : vector<16x128xi1>, vector<16x128xi32>
      %cst_35 = arith.constant dense<-2147483648> : vector<16xi32>
      %103 = vector.multi_reduction <maxsi>, %102, %cst_35 [1] : vector<16x128xi32> to vector<16xi32>
      %104 = vector.shape_cast %103 : vector<16xi32> to vector<16x1xi32>
      %c128_i32_36 = arith.constant 128 : i32
      %105 = vector.broadcast %c128_i32_36 : i32 to vector<16x1xi32>
      %106 = arith.subi %90, %105 : vector<16x1xi32>
      %c128_i32_37 = arith.constant 128 : i32
      %107 = arith.muli %arg1, %c128_i32_37 : i32
      %108 = vector.broadcast %107 : i32 to vector<16x1xi32>
      %109 = arith.addi %106, %108 : vector<16x1xi32>
      %c128_i32_38 = arith.constant 128 : i32
      %110 = vector.broadcast %c128_i32_38 : i32 to vector<16x1xi32>
      %111 = arith.cmpi slt, %90, %110 : vector<16x1xi32>
      %112 = arith.select %111, %104, %109 : vector<16x1xi1>, vector<16x1xi32>
      %c1_i32 = arith.constant 1 : i32
      %113 = vector.broadcast %c1_i32 : i32 to vector<16x128xi32>
      %114 = arith.cmpi eq, %40, %113 : vector<16x128xi32>
      %115 = vector.shape_cast %98 : vector<16x1xf32> to vector<16x1xf32>
      %116 = vector.broadcast %115 : vector<16x1xf32> to vector<16x128xf32>
      %117 = arith.select %114, %116, %75 : vector<16x128xi1>, vector<16x128xf32>
      %c1_i32_39 = arith.constant 1 : i32
      %118 = vector.broadcast %c1_i32_39 : i32 to vector<16x128xi32>
      %119 = arith.cmpi eq, %40, %118 : vector<16x128xi32>
      %120 = vector.shape_cast %112 : vector<16x1xi32> to vector<16x1xi32>
      %121 = vector.broadcast %120 : vector<16x1xi32> to vector<16x128xi32>
      %122 = arith.select %119, %121, %80 : vector<16x128xi1>, vector<16x128xi32>
      %123 = vector.broadcast %86 : vector<16x1xi32> to vector<16x256xi32>
      %124 = arith.cmpi eq, %84, %123 : vector<16x256xi32>
      %c-2147483648_i32_40 = arith.constant -2147483648 : i32
      %125 = vector.broadcast %c-2147483648_i32_40 : i32 to vector<16x256xi32>
      %126 = arith.select %124, %125, %84 : vector<16x256xi1>, vector<16x256xi32>
      %cst_41 = arith.constant dense<-2147483648> : vector<16xi32>
      %127 = vector.multi_reduction <maxsi>, %126, %cst_41 [1] : vector<16x256xi32> to vector<16xi32>
      %128 = vector.shape_cast %127 : vector<16xi32> to vector<16x1xi32>
      %c4095_i32_42 = arith.constant 4095 : i32
      %129 = vector.broadcast %c4095_i32_42 : i32 to vector<16x1xi32>
      %130 = arith.andi %128, %129 : vector<16x1xi32>
      %c255_i32_43 = arith.constant 255 : i32
      %131 = vector.broadcast %c255_i32_43 : i32 to vector<16x1xi32>
      %132 = arith.subi %131, %130 : vector<16x1xi32>
      %c-4096_i32_44 = arith.constant -4096 : i32
      %133 = vector.broadcast %c-4096_i32_44 : i32 to vector<16x1xi32>
      %134 = arith.andi %128, %133 : vector<16x1xi32>
      %c0_i32_45 = arith.constant 0 : i32
      %135 = vector.broadcast %c0_i32_45 : i32 to vector<16x1xi32>
      %136 = arith.cmpi sge, %134, %135 : vector<16x1xi32>
      %c2147483647_i32_46 = arith.constant 2147483647 : i32
      %137 = vector.broadcast %c2147483647_i32_46 : i32 to vector<16x1xi32>
      %138 = arith.xori %134, %137 : vector<16x1xi32>
      %139 = arith.select %136, %134, %138 : vector<16x1xi1>, vector<16x1xi32>
      %140 = tpu.bitcast %139 : vector<16x1xi32> -> vector<16x1xf32>
      %141 = vector.broadcast %132 : vector<16x1xi32> to vector<16x128xi32>
      %142 = arith.cmpi eq, %40, %141 : vector<16x128xi32>
      %c-2147483648_i32_47 = arith.constant -2147483648 : i32
      %143 = vector.broadcast %c-2147483648_i32_47 : i32 to vector<16x128xi32>
      %144 = arith.select %142, %26, %143 : vector<16x128xi1>, vector<16x128xi32>
      %cst_48 = arith.constant dense<-2147483648> : vector<16xi32>
      %145 = vector.multi_reduction <maxsi>, %144, %cst_48 [1] : vector<16x128xi32> to vector<16xi32>
      %146 = vector.shape_cast %145 : vector<16xi32> to vector<16x1xi32>
      %c128_i32_49 = arith.constant 128 : i32
      %147 = vector.broadcast %c128_i32_49 : i32 to vector<16x1xi32>
      %148 = arith.subi %132, %147 : vector<16x1xi32>
      %c128_i32_50 = arith.constant 128 : i32
      %149 = arith.muli %arg1, %c128_i32_50 : i32
      %150 = vector.broadcast %149 : i32 to vector<16x1xi32>
      %151 = arith.addi %148, %150 : vector<16x1xi32>
      %c128_i32_51 = arith.constant 128 : i32
      %152 = vector.broadcast %c128_i32_51 : i32 to vector<16x1xi32>
      %153 = arith.cmpi slt, %132, %152 : vector<16x1xi32>
      %154 = arith.select %153, %146, %151 : vector<16x1xi1>, vector<16x1xi32>
      %c2_i32 = arith.constant 2 : i32
      %155 = vector.broadcast %c2_i32 : i32 to vector<16x128xi32>
      %156 = arith.cmpi eq, %40, %155 : vector<16x128xi32>
      %157 = vector.shape_cast %140 : vector<16x1xf32> to vector<16x1xf32>
      %158 = vector.broadcast %157 : vector<16x1xf32> to vector<16x128xf32>
      %159 = arith.select %156, %158, %117 : vector<16x128xi1>, vector<16x128xf32>
      %c2_i32_52 = arith.constant 2 : i32
      %160 = vector.broadcast %c2_i32_52 : i32 to vector<16x128xi32>
      %161 = arith.cmpi eq, %40, %160 : vector<16x128xi32>
      %162 = vector.shape_cast %154 : vector<16x1xi32> to vector<16x1xi32>
      %163 = vector.broadcast %162 : vector<16x1xi32> to vector<16x128xi32>
      %164 = arith.select %161, %163, %122 : vector<16x128xi1>, vector<16x128xi32>
      %165 = vector.broadcast %128 : vector<16x1xi32> to vector<16x256xi32>
      %166 = arith.cmpi eq, %126, %165 : vector<16x256xi32>
      %c-2147483648_i32_53 = arith.constant -2147483648 : i32
      %167 = vector.broadcast %c-2147483648_i32_53 : i32 to vector<16x256xi32>
      %168 = arith.select %166, %167, %126 : vector<16x256xi1>, vector<16x256xi32>
      %cst_54 = arith.constant dense<-2147483648> : vector<16xi32>
      %169 = vector.multi_reduction <maxsi>, %168, %cst_54 [1] : vector<16x256xi32> to vector<16xi32>
      %170 = vector.shape_cast %169 : vector<16xi32> to vector<16x1xi32>
      %c4095_i32_55 = arith.constant 4095 : i32
      %171 = vector.broadcast %c4095_i32_55 : i32 to vector<16x1xi32>
      %172 = arith.andi %170, %171 : vector<16x1xi32>
      %c255_i32_56 = arith.constant 255 : i32
      %173 = vector.broadcast %c255_i32_56 : i32 to vector<16x1xi32>
      %174 = arith.subi %173, %172 : vector<16x1xi32>
      %c-4096_i32_57 = arith.constant -4096 : i32
      %175 = vector.broadcast %c-4096_i32_57 : i32 to vector<16x1xi32>
      %176 = arith.andi %170, %175 : vector<16x1xi32>
      %c0_i32_58 = arith.constant 0 : i32
      %177 = vector.broadcast %c0_i32_58 : i32 to vector<16x1xi32>
      %178 = arith.cmpi sge, %176, %177 : vector<16x1xi32>
      %c2147483647_i32_59 = arith.constant 2147483647 : i32
      %179 = vector.broadcast %c2147483647_i32_59 : i32 to vector<16x1xi32>
      %180 = arith.xori %176, %179 : vector<16x1xi32>
      %181 = arith.select %178, %176, %180 : vector<16x1xi1>, vector<16x1xi32>
      %182 = tpu.bitcast %181 : vector<16x1xi32> -> vector<16x1xf32>
      %183 = vector.broadcast %174 : vector<16x1xi32> to vector<16x128xi32>
      %184 = arith.cmpi eq, %40, %183 : vector<16x128xi32>
      %c-2147483648_i32_60 = arith.constant -2147483648 : i32
      %185 = vector.broadcast %c-2147483648_i32_60 : i32 to vector<16x128xi32>
      %186 = arith.select %184, %26, %185 : vector<16x128xi1>, vector<16x128xi32>
      %cst_61 = arith.constant dense<-2147483648> : vector<16xi32>
      %187 = vector.multi_reduction <maxsi>, %186, %cst_61 [1] : vector<16x128xi32> to vector<16xi32>
      %188 = vector.shape_cast %187 : vector<16xi32> to vector<16x1xi32>
      %c128_i32_62 = arith.constant 128 : i32
      %189 = vector.broadcast %c128_i32_62 : i32 to vector<16x1xi32>
      %190 = arith.subi %174, %189 : vector<16x1xi32>
      %c128_i32_63 = arith.constant 128 : i32
      %191 = arith.muli %arg1, %c128_i32_63 : i32
      %192 = vector.broadcast %191 : i32 to vector<16x1xi32>
      %193 = arith.addi %190, %192 : vector<16x1xi32>
      %c128_i32_64 = arith.constant 128 : i32
      %194 = vector.broadcast %c128_i32_64 : i32 to vector<16x1xi32>
      %195 = arith.cmpi slt, %174, %194 : vector<16x1xi32>
      %196 = arith.select %195, %188, %193 : vector<16x1xi1>, vector<16x1xi32>
      %c3_i32 = arith.constant 3 : i32
      %197 = vector.broadcast %c3_i32 : i32 to vector<16x128xi32>
      %198 = arith.cmpi eq, %40, %197 : vector<16x128xi32>
      %199 = vector.shape_cast %182 : vector<16x1xf32> to vector<16x1xf32>
      %200 = vector.broadcast %199 : vector<16x1xf32> to vector<16x128xf32>
      %201 = arith.select %198, %200, %159 : vector<16x128xi1>, vector<16x128xf32>
      %c3_i32_65 = arith.constant 3 : i32
      %202 = vector.broadcast %c3_i32_65 : i32 to vector<16x128xi32>
      %203 = arith.cmpi eq, %40, %202 : vector<16x128xi32>
      %204 = vector.shape_cast %196 : vector<16x1xi32> to vector<16x1xi32>
      %205 = vector.broadcast %204 : vector<16x1xi32> to vector<16x128xi32>
      %206 = arith.select %203, %205, %164 : vector<16x128xi1>, vector<16x128xi32>
      %207 = vector.broadcast %170 : vector<16x1xi32> to vector<16x256xi32>
      %208 = arith.cmpi eq, %168, %207 : vector<16x256xi32>
      %c-2147483648_i32_66 = arith.constant -2147483648 : i32
      %209 = vector.broadcast %c-2147483648_i32_66 : i32 to vector<16x256xi32>
      %210 = arith.select %208, %209, %168 : vector<16x256xi1>, vector<16x256xi32>
      %cst_67 = arith.constant dense<-2147483648> : vector<16xi32>
      %211 = vector.multi_reduction <maxsi>, %210, %cst_67 [1] : vector<16x256xi32> to vector<16xi32>
      %212 = vector.shape_cast %211 : vector<16xi32> to vector<16x1xi32>
      %c4095_i32_68 = arith.constant 4095 : i32
      %213 = vector.broadcast %c4095_i32_68 : i32 to vector<16x1xi32>
      %214 = arith.andi %212, %213 : vector<16x1xi32>
      %c255_i32_69 = arith.constant 255 : i32
      %215 = vector.broadcast %c255_i32_69 : i32 to vector<16x1xi32>
      %216 = arith.subi %215, %214 : vector<16x1xi32>
      %c-4096_i32_70 = arith.constant -4096 : i32
      %217 = vector.broadcast %c-4096_i32_70 : i32 to vector<16x1xi32>
      %218 = arith.andi %212, %217 : vector<16x1xi32>
      %c0_i32_71 = arith.constant 0 : i32
      %219 = vector.broadcast %c0_i32_71 : i32 to vector<16x1xi32>
      %220 = arith.cmpi sge, %218, %219 : vector<16x1xi32>
      %c2147483647_i32_72 = arith.constant 2147483647 : i32
      %221 = vector.broadcast %c2147483647_i32_72 : i32 to vector<16x1xi32>
      %222 = arith.xori %218, %221 : vector<16x1xi32>
      %223 = arith.select %220, %218, %222 : vector<16x1xi1>, vector<16x1xi32>
      %224 = tpu.bitcast %223 : vector<16x1xi32> -> vector<16x1xf32>
      %225 = vector.broadcast %216 : vector<16x1xi32> to vector<16x128xi32>
      %226 = arith.cmpi eq, %40, %225 : vector<16x128xi32>
      %c-2147483648_i32_73 = arith.constant -2147483648 : i32
      %227 = vector.broadcast %c-2147483648_i32_73 : i32 to vector<16x128xi32>
      %228 = arith.select %226, %26, %227 : vector<16x128xi1>, vector<16x128xi32>
      %cst_74 = arith.constant dense<-2147483648> : vector<16xi32>
      %229 = vector.multi_reduction <maxsi>, %228, %cst_74 [1] : vector<16x128xi32> to vector<16xi32>
      %230 = vector.shape_cast %229 : vector<16xi32> to vector<16x1xi32>
      %c128_i32_75 = arith.constant 128 : i32
      %231 = vector.broadcast %c128_i32_75 : i32 to vector<16x1xi32>
      %232 = arith.subi %216, %231 : vector<16x1xi32>
      %c128_i32_76 = arith.constant 128 : i32
      %233 = arith.muli %arg1, %c128_i32_76 : i32
      %234 = vector.broadcast %233 : i32 to vector<16x1xi32>
      %235 = arith.addi %232, %234 : vector<16x1xi32>
      %c128_i32_77 = arith.constant 128 : i32
      %236 = vector.broadcast %c128_i32_77 : i32 to vector<16x1xi32>
      %237 = arith.cmpi slt, %216, %236 : vector<16x1xi32>
      %238 = arith.select %237, %230, %235 : vector<16x1xi1>, vector<16x1xi32>
      %c4_i32 = arith.constant 4 : i32
      %239 = vector.broadcast %c4_i32 : i32 to vector<16x128xi32>
      %240 = arith.cmpi eq, %40, %239 : vector<16x128xi32>
      %241 = vector.shape_cast %224 : vector<16x1xf32> to vector<16x1xf32>
      %242 = vector.broadcast %241 : vector<16x1xf32> to vector<16x128xf32>
      %243 = arith.select %240, %242, %201 : vector<16x128xi1>, vector<16x128xf32>
      %c4_i32_78 = arith.constant 4 : i32
      %244 = vector.broadcast %c4_i32_78 : i32 to vector<16x128xi32>
      %245 = arith.cmpi eq, %40, %244 : vector<16x128xi32>
      %246 = vector.shape_cast %238 : vector<16x1xi32> to vector<16x1xi32>
      %247 = vector.broadcast %246 : vector<16x1xi32> to vector<16x128xi32>
      %248 = arith.select %245, %247, %206 : vector<16x128xi1>, vector<16x128xi32>
      %c0_79 = arith.constant 0 : index
      %c0_80 = arith.constant 0 : index
      %249 = vector.load %arg4[%c0_79, %c0_80] : memref<16x128xf32, #tpu.memory_space<vmem>>, vector<16x128xf32>
      tpu.vector_store %arg4[%c0_79, %c0_80], %243 {strides = array<i32>} : memref<16x128xf32, #tpu.memory_space<vmem>>, vector<16x128xf32>,
      %c0_81 = arith.constant 0 : index
      %c0_82 = arith.constant 0 : index
      %250 = vector.load %arg5[%c0_81, %c0_82] : memref<16x128xi32, #tpu.memory_space<vmem>>, vector<16x128xi32>
      tpu.vector_store %arg5[%c0_81, %c0_82], %248 {strides = array<i32>} : memref<16x128xi32, #tpu.memory_space<vmem>>, vector<16x128xi32>,
    } else {
    }
    return
  }
  func.func @transform_0(%arg0: i32, %arg1: i32) -> (i32, i32) {
    %c0_i32 = arith.constant 0 : i32
    %c0_i32_0 = arith.constant 0 : i32
    return %arg0, %c0_i32 : i32, i32
  }
  func.func @transform_1(%arg0: i32, %arg1: i32) -> (i32, i32) {
    %c0_i32 = arith.constant 0 : i32
    %c0_i32_0 = arith.constant 0 : i32
    return %arg1, %c0_i32 : i32, i32
  }
  func.func @transform_2(%arg0: i32, %arg1: i32) -> (i32, i32) {
    %c0_i32 = arith.constant 0 : i32
    %c0_i32_0 = arith.constant 0 : i32
    return %arg0, %c0_i32 : i32, i32
  }
  func.func @transform_3(%arg0: i32, %arg1: i32) -> (i32, i32) {
    %c0_i32 = arith.constant 0 : i32
    %c0_i32_0 = arith.constant 0 : i32
    return %arg0, %c0_i32 : i32, i32
  }
}

module attributes {stable_mosaic.version = 11 : i64} {
  func.func @_mips_topk_kernel(%arg0: i32, %arg1: i32, %arg2: memref<16x128xbf16, #tpu.memory_space<vmem>>, %arg3: memref<128x128xbf16, #tpu.memory_space<vmem>>, %arg4: memref<16x128xf32, #tpu.memory_space<vmem>>, %arg5: memref<16x128xi32, #tpu.memory_space<vmem>>) attributes {dimension_semantics = [#tpu.dimension_semantics<parallel>, #tpu.dimension_semantics<arbitrary>], iteration_bounds = array<i64: 1, 3>, scalar_prefetch = 0 : i64, scratch_operands = 0 : i64, tpu.core_type = #tpu.core_type<tc>, window_params = [{transform_indices = @transform_0, window_bounds = array<i64: 16, 128>}, {transform_indices = @transform_1, window_bounds = array<i64: 128, 128>}, {transform_indices = @transform_2, window_bounds = array<i64: 16, 128>}, {transform_indices = @transform_3, window_bounds = array<i64: 16, 128>}]} {
    %c0_i32 = arith.constant 0 : i32
    %0 = arith.cmpi eq, %arg1, %c0_i32 : i32
    %1 = arith.extui %0 : i1 to i32
    %c0_i32_0 = arith.constant 0 : i32
    %2 = arith.cmpi ne, %1, %c0_i32_0 : i32
    scf.if %2 {
      %cst_79 = arith.constant 0xFF800000 : f32
      %240 = vector.broadcast %cst_79 : f32 to vector<16x128xf32>
      %c0_80 = arith.constant 0 : index
      %c0_81 = arith.constant 0 : index
      %241 = vector.load %arg4[%c0_80, %c0_81] : memref<16x128xf32, #tpu.memory_space<vmem>>, vector<16x128xf32>
      tpu.vector_store %arg4[%c0_80, %c0_81], %240 {strides = array<i32>} : memref<16x128xf32, #tpu.memory_space<vmem>>, vector<16x128xf32>,
      %c0_i32_82 = arith.constant 0 : i32
      %242 = vector.broadcast %c0_i32_82 : i32 to vector<16x128xi32>
      %c0_83 = arith.constant 0 : index
      %c0_84 = arith.constant 0 : index
      %243 = vector.load %arg5[%c0_83, %c0_84] : memref<16x128xi32, #tpu.memory_space<vmem>>, vector<16x128xi32>
      tpu.vector_store %arg5[%c0_83, %c0_84], %242 {strides = array<i32>} : memref<16x128xi32, #tpu.memory_space<vmem>>, vector<16x128xi32>,
    } else {
    }
    %c0 = arith.constant 0 : index
    %c0_1 = arith.constant 0 : index
    %3 = vector.load %arg2[%c0, %c0_1] : memref<16x128xbf16, #tpu.memory_space<vmem>>, vector<16x128xbf16>
    %c0_2 = arith.constant 0 : index
    %c0_3 = arith.constant 0 : index
    %4 = vector.load %arg3[%c0_2, %c0_3] : memref<128x128xbf16, #tpu.memory_space<vmem>>, vector<128x128xbf16>
    %cst = arith.constant dense<0.000000e+00> : vector<16x128xf32>
    %5 = tpu.matmul %3, %4, %cst {dimension_numbers = #tpu.dot_dimension_numbers<[1], [1], [0], [0], [0, 0, 1, 0], [], []>} : vector<16x128xbf16>, vector<128x128xbf16>, vector<16x128xf32> -> vector<16x128xf32>
    %6 = tpu.iota {dimensions = array<i32: 1>} : vector<16x128xi32>
    %c128_i32 = arith.constant 128 : i32
    %7 = arith.muli %arg1, %c128_i32 : i32
    %8 = vector.broadcast %7 : i32 to vector<16x128xi32>
    %9 = arith.addi %6, %8 : vector<16x128xi32>
    %c320_i32 = arith.constant 320 : i32
    %10 = vector.broadcast %c320_i32 : i32 to vector<16x128xi32>
    %11 = arith.cmpi slt, %9, %10 : vector<16x128xi32>
    %cst_4 = arith.constant 0xFF800000 : f32
    %12 = vector.broadcast %cst_4 : f32 to vector<16x128xf32>
    %13 = arith.select %11, %5, %12 : vector<16x128xi1>, vector<16x128xf32>
    %c0_5 = arith.constant 0 : index
    %c0_6 = arith.constant 0 : index
    %14 = vector.load %arg4[%c0_5, %c0_6] : memref<16x128xf32, #tpu.memory_space<vmem>>, vector<16x128xf32>
    %c0_7 = arith.constant 0 : index
    %c0_8 = arith.constant 0 : index
    %15 = vector.load %arg5[%c0_7, %c0_8] : memref<16x128xi32, #tpu.memory_space<vmem>>, vector<16x128xi32>
    %16 = tpu.concatenate %14, %13 in 1 : vector<16x128xf32>, vector<16x128xf32> -> vector<16x256xf32>
    %17 = tpu.iota {dimensions = array<i32: 1>} : vector<16x256xi32>
    %c255_i32 = arith.constant 255 : i32
    %18 = vector.broadcast %c255_i32 : i32 to vector<16x256xi32>
    %19 = arith.subi %18, %17 : vector<16x256xi32>
    %20 = tpu.bitcast %16 : vector<16x256xf32> -> vector<16x256xi32>
    %c0_i32_9 = arith.constant 0 : i32
    %21 = vector.broadcast %c0_i32_9 : i32 to vector<16x256xi32>
    %22 = arith.cmpi sge, %20, %21 : vector<16x256xi32>
    %c2147483647_i32 = arith.constant 2147483647 : i32
    %23 = vector.broadcast %c2147483647_i32 : i32 to vector<16x256xi32>
    %24 = arith.xori %20, %23 : vector<16x256xi32>
    %25 = arith.select %22, %20, %24 : vector<16x256xi1>, vector<16x256xi32>
    %c-4096_i32 = arith.constant -4096 : i32
    %26 = vector.broadcast %c-4096_i32 : i32 to vector<16x256xi32>
    %27 = arith.andi %25, %26 : vector<16x256xi32>
    %28 = arith.ori %27, %19 : vector<16x256xi32>
    %29 = tpu.iota {dimensions = array<i32: 1>} : vector<16x128xi32>
    %cst_10 = arith.constant 0xFF800000 : f32
    %30 = vector.broadcast %cst_10 : f32 to vector<16x128xf32>
    %c0_i32_11 = arith.constant 0 : i32
    %31 = vector.broadcast %c0_i32_11 : i32 to vector<16x128xi32>
    %cst_12 = arith.constant dense<-2147483648> : vector<16xi32>
    %32 = vector.multi_reduction <maxsi>, %28, %cst_12 [1] : vector<16x256xi32> to vector<16xi32>
    %33 = vector.shape_cast %32 : vector<16xi32> to vector<16x1xi32>
    %c4095_i32 = arith.constant 4095 : i32
    %34 = vector.broadcast %c4095_i32 : i32 to vector<16x1xi32>
    %35 = arith.andi %33, %34 : vector<16x1xi32>
    %c255_i32_13 = arith.constant 255 : i32
    %36 = vector.broadcast %c255_i32_13 : i32 to vector<16x1xi32>
    %37 = arith.subi %36, %35 : vector<16x1xi32>
    %c-4096_i32_14 = arith.constant -4096 : i32
    %38 = vector.broadcast %c-4096_i32_14 : i32 to vector<16x1xi32>
    %39 = arith.andi %33, %38 : vector<16x1xi32>
    %c0_i32_15 = arith.constant 0 : i32
    %40 = vector.broadcast %c0_i32_15 : i32 to vector<16x1xi32>
    %41 = arith.cmpi sge, %39, %40 : vector<16x1xi32>
    %c2147483647_i32_16 = arith.constant 2147483647 : i32
    %42 = vector.broadcast %c2147483647_i32_16 : i32 to vector<16x1xi32>
    %43 = arith.xori %39, %42 : vector<16x1xi32>
    %44 = arith.select %41, %39, %43 : vector<16x1xi1>, vector<16x1xi32>
    %45 = tpu.bitcast %44 : vector<16x1xi32> -> vector<16x1xf32>
    %46 = vector.broadcast %37 : vector<16x1xi32> to vector<16x128xi32>
    %47 = arith.cmpi eq, %29, %46 : vector<16x128xi32>
    %c-2147483648_i32 = arith.constant -2147483648 : i32
    %48 = vector.broadcast %c-2147483648_i32 : i32 to vector<16x128xi32>
    %49 = arith.select %47, %15, %48 : vector<16x128xi1>, vector<16x128xi32>
    %cst_17 = arith.constant dense<-2147483648> : vector<16xi32>
    %50 = vector.multi_reduction <maxsi>, %49, %cst_17 [1] : vector<16x128xi32> to vector<16xi32>
    %51 = vector.shape_cast %50 : vector<16xi32> to vector<16x1xi32>
    %c128_i32_18 = arith.constant 128 : i32
    %52 = vector.broadcast %c128_i32_18 : i32 to vector<16x1xi32>
    %53 = arith.subi %37, %52 : vector<16x1xi32>
    %c128_i32_19 = arith.constant 128 : i32
    %54 = arith.muli %arg1, %c128_i32_19 : i32
    %55 = vector.broadcast %54 : i32 to vector<16x1xi32>
    %56 = arith.addi %53, %55 : vector<16x1xi32>
    %c128_i32_20 = arith.constant 128 : i32
    %57 = vector.broadcast %c128_i32_20 : i32 to vector<16x1xi32>
    %58 = arith.cmpi slt, %37, %57 : vector<16x1xi32>
    %59 = arith.select %58, %51, %56 : vector<16x1xi1>, vector<16x1xi32>
    %c0_i32_21 = arith.constant 0 : i32
    %60 = vector.broadcast %c0_i32_21 : i32 to vector<16x128xi32>
    %61 = arith.cmpi eq, %29, %60 : vector<16x128xi32>
    %62 = vector.shape_cast %45 : vector<16x1xf32> to vector<16x1xf32>
    %63 = vector.broadcast %62 : vector<16x1xf32> to vector<16x128xf32>
    %64 = arith.select %61, %63, %30 : vector<16x128xi1>, vector<16x128xf32>
    %c0_i32_22 = arith.constant 0 : i32
    %65 = vector.broadcast %c0_i32_22 : i32 to vector<16x128xi32>
    %66 = arith.cmpi eq, %29, %65 : vector<16x128xi32>
    %67 = vector.shape_cast %59 : vector<16x1xi32> to vector<16x1xi32>
    %68 = vector.broadcast %67 : vector<16x1xi32> to vector<16x128xi32>
    %69 = arith.select %66, %68, %31 : vector<16x128xi1>, vector<16x128xi32>
    %70 = vector.broadcast %33 : vector<16x1xi32> to vector<16x256xi32>
    %71 = arith.cmpi eq, %28, %70 : vector<16x256xi32>
    %c-2147483648_i32_23 = arith.constant -2147483648 : i32
    %72 = vector.broadcast %c-2147483648_i32_23 : i32 to vector<16x256xi32>
    %73 = arith.select %71, %72, %28 : vector<16x256xi1>, vector<16x256xi32>
    %cst_24 = arith.constant dense<-2147483648> : vector<16xi32>
    %74 = vector.multi_reduction <maxsi>, %73, %cst_24 [1] : vector<16x256xi32> to vector<16xi32>
    %75 = vector.shape_cast %74 : vector<16xi32> to vector<16x1xi32>
    %c4095_i32_25 = arith.constant 4095 : i32
    %76 = vector.broadcast %c4095_i32_25 : i32 to vector<16x1xi32>
    %77 = arith.andi %75, %76 : vector<16x1xi32>
    %c255_i32_26 = arith.constant 255 : i32
    %78 = vector.broadcast %c255_i32_26 : i32 to vector<16x1xi32>
    %79 = arith.subi %78, %77 : vector<16x1xi32>
    %c-4096_i32_27 = arith.constant -4096 : i32
    %80 = vector.broadcast %c-4096_i32_27 : i32 to vector<16x1xi32>
    %81 = arith.andi %75, %80 : vector<16x1xi32>
    %c0_i32_28 = arith.constant 0 : i32
    %82 = vector.broadcast %c0_i32_28 : i32 to vector<16x1xi32>
    %83 = arith.cmpi sge, %81, %82 : vector<16x1xi32>
    %c2147483647_i32_29 = arith.constant 2147483647 : i32
    %84 = vector.broadcast %c2147483647_i32_29 : i32 to vector<16x1xi32>
    %85 = arith.xori %81, %84 : vector<16x1xi32>
    %86 = arith.select %83, %81, %85 : vector<16x1xi1>, vector<16x1xi32>
    %87 = tpu.bitcast %86 : vector<16x1xi32> -> vector<16x1xf32>
    %88 = vector.broadcast %79 : vector<16x1xi32> to vector<16x128xi32>
    %89 = arith.cmpi eq, %29, %88 : vector<16x128xi32>
    %c-2147483648_i32_30 = arith.constant -2147483648 : i32
    %90 = vector.broadcast %c-2147483648_i32_30 : i32 to vector<16x128xi32>
    %91 = arith.select %89, %15, %90 : vector<16x128xi1>, vector<16x128xi32>
    %cst_31 = arith.constant dense<-2147483648> : vector<16xi32>
    %92 = vector.multi_reduction <maxsi>, %91, %cst_31 [1] : vector<16x128xi32> to vector<16xi32>
    %93 = vector.shape_cast %92 : vector<16xi32> to vector<16x1xi32>
    %c128_i32_32 = arith.constant 128 : i32
    %94 = vector.broadcast %c128_i32_32 : i32 to vector<16x1xi32>
    %95 = arith.subi %79, %94 : vector<16x1xi32>
    %c128_i32_33 = arith.constant 128 : i32
    %96 = arith.muli %arg1, %c128_i32_33 : i32
    %97 = vector.broadcast %96 : i32 to vector<16x1xi32>
    %98 = arith.addi %95, %97 : vector<16x1xi32>
    %c128_i32_34 = arith.constant 128 : i32
    %99 = vector.broadcast %c128_i32_34 : i32 to vector<16x1xi32>
    %100 = arith.cmpi slt, %79, %99 : vector<16x1xi32>
    %101 = arith.select %100, %93, %98 : vector<16x1xi1>, vector<16x1xi32>
    %c1_i32 = arith.constant 1 : i32
    %102 = vector.broadcast %c1_i32 : i32 to vector<16x128xi32>
    %103 = arith.cmpi eq, %29, %102 : vector<16x128xi32>
    %104 = vector.shape_cast %87 : vector<16x1xf32> to vector<16x1xf32>
    %105 = vector.broadcast %104 : vector<16x1xf32> to vector<16x128xf32>
    %106 = arith.select %103, %105, %64 : vector<16x128xi1>, vector<16x128xf32>
    %c1_i32_35 = arith.constant 1 : i32
    %107 = vector.broadcast %c1_i32_35 : i32 to vector<16x128xi32>
    %108 = arith.cmpi eq, %29, %107 : vector<16x128xi32>
    %109 = vector.shape_cast %101 : vector<16x1xi32> to vector<16x1xi32>
    %110 = vector.broadcast %109 : vector<16x1xi32> to vector<16x128xi32>
    %111 = arith.select %108, %110, %69 : vector<16x128xi1>, vector<16x128xi32>
    %112 = vector.broadcast %75 : vector<16x1xi32> to vector<16x256xi32>
    %113 = arith.cmpi eq, %73, %112 : vector<16x256xi32>
    %c-2147483648_i32_36 = arith.constant -2147483648 : i32
    %114 = vector.broadcast %c-2147483648_i32_36 : i32 to vector<16x256xi32>
    %115 = arith.select %113, %114, %73 : vector<16x256xi1>, vector<16x256xi32>
    %cst_37 = arith.constant dense<-2147483648> : vector<16xi32>
    %116 = vector.multi_reduction <maxsi>, %115, %cst_37 [1] : vector<16x256xi32> to vector<16xi32>
    %117 = vector.shape_cast %116 : vector<16xi32> to vector<16x1xi32>
    %c4095_i32_38 = arith.constant 4095 : i32
    %118 = vector.broadcast %c4095_i32_38 : i32 to vector<16x1xi32>
    %119 = arith.andi %117, %118 : vector<16x1xi32>
    %c255_i32_39 = arith.constant 255 : i32
    %120 = vector.broadcast %c255_i32_39 : i32 to vector<16x1xi32>
    %121 = arith.subi %120, %119 : vector<16x1xi32>
    %c-4096_i32_40 = arith.constant -4096 : i32
    %122 = vector.broadcast %c-4096_i32_40 : i32 to vector<16x1xi32>
    %123 = arith.andi %117, %122 : vector<16x1xi32>
    %c0_i32_41 = arith.constant 0 : i32
    %124 = vector.broadcast %c0_i32_41 : i32 to vector<16x1xi32>
    %125 = arith.cmpi sge, %123, %124 : vector<16x1xi32>
    %c2147483647_i32_42 = arith.constant 2147483647 : i32
    %126 = vector.broadcast %c2147483647_i32_42 : i32 to vector<16x1xi32>
    %127 = arith.xori %123, %126 : vector<16x1xi32>
    %128 = arith.select %125, %123, %127 : vector<16x1xi1>, vector<16x1xi32>
    %129 = tpu.bitcast %128 : vector<16x1xi32> -> vector<16x1xf32>
    %130 = vector.broadcast %121 : vector<16x1xi32> to vector<16x128xi32>
    %131 = arith.cmpi eq, %29, %130 : vector<16x128xi32>
    %c-2147483648_i32_43 = arith.constant -2147483648 : i32
    %132 = vector.broadcast %c-2147483648_i32_43 : i32 to vector<16x128xi32>
    %133 = arith.select %131, %15, %132 : vector<16x128xi1>, vector<16x128xi32>
    %cst_44 = arith.constant dense<-2147483648> : vector<16xi32>
    %134 = vector.multi_reduction <maxsi>, %133, %cst_44 [1] : vector<16x128xi32> to vector<16xi32>
    %135 = vector.shape_cast %134 : vector<16xi32> to vector<16x1xi32>
    %c128_i32_45 = arith.constant 128 : i32
    %136 = vector.broadcast %c128_i32_45 : i32 to vector<16x1xi32>
    %137 = arith.subi %121, %136 : vector<16x1xi32>
    %c128_i32_46 = arith.constant 128 : i32
    %138 = arith.muli %arg1, %c128_i32_46 : i32
    %139 = vector.broadcast %138 : i32 to vector<16x1xi32>
    %140 = arith.addi %137, %139 : vector<16x1xi32>
    %c128_i32_47 = arith.constant 128 : i32
    %141 = vector.broadcast %c128_i32_47 : i32 to vector<16x1xi32>
    %142 = arith.cmpi slt, %121, %141 : vector<16x1xi32>
    %143 = arith.select %142, %135, %140 : vector<16x1xi1>, vector<16x1xi32>
    %c2_i32 = arith.constant 2 : i32
    %144 = vector.broadcast %c2_i32 : i32 to vector<16x128xi32>
    %145 = arith.cmpi eq, %29, %144 : vector<16x128xi32>
    %146 = vector.shape_cast %129 : vector<16x1xf32> to vector<16x1xf32>
    %147 = vector.broadcast %146 : vector<16x1xf32> to vector<16x128xf32>
    %148 = arith.select %145, %147, %106 : vector<16x128xi1>, vector<16x128xf32>
    %c2_i32_48 = arith.constant 2 : i32
    %149 = vector.broadcast %c2_i32_48 : i32 to vector<16x128xi32>
    %150 = arith.cmpi eq, %29, %149 : vector<16x128xi32>
    %151 = vector.shape_cast %143 : vector<16x1xi32> to vector<16x1xi32>
    %152 = vector.broadcast %151 : vector<16x1xi32> to vector<16x128xi32>
    %153 = arith.select %150, %152, %111 : vector<16x128xi1>, vector<16x128xi32>
    %154 = vector.broadcast %117 : vector<16x1xi32> to vector<16x256xi32>
    %155 = arith.cmpi eq, %115, %154 : vector<16x256xi32>
    %c-2147483648_i32_49 = arith.constant -2147483648 : i32
    %156 = vector.broadcast %c-2147483648_i32_49 : i32 to vector<16x256xi32>
    %157 = arith.select %155, %156, %115 : vector<16x256xi1>, vector<16x256xi32>
    %cst_50 = arith.constant dense<-2147483648> : vector<16xi32>
    %158 = vector.multi_reduction <maxsi>, %157, %cst_50 [1] : vector<16x256xi32> to vector<16xi32>
    %159 = vector.shape_cast %158 : vector<16xi32> to vector<16x1xi32>
    %c4095_i32_51 = arith.constant 4095 : i32
    %160 = vector.broadcast %c4095_i32_51 : i32 to vector<16x1xi32>
    %161 = arith.andi %159, %160 : vector<16x1xi32>
    %c255_i32_52 = arith.constant 255 : i32
    %162 = vector.broadcast %c255_i32_52 : i32 to vector<16x1xi32>
    %163 = arith.subi %162, %161 : vector<16x1xi32>
    %c-4096_i32_53 = arith.constant -4096 : i32
    %164 = vector.broadcast %c-4096_i32_53 : i32 to vector<16x1xi32>
    %165 = arith.andi %159, %164 : vector<16x1xi32>
    %c0_i32_54 = arith.constant 0 : i32
    %166 = vector.broadcast %c0_i32_54 : i32 to vector<16x1xi32>
    %167 = arith.cmpi sge, %165, %166 : vector<16x1xi32>
    %c2147483647_i32_55 = arith.constant 2147483647 : i32
    %168 = vector.broadcast %c2147483647_i32_55 : i32 to vector<16x1xi32>
    %169 = arith.xori %165, %168 : vector<16x1xi32>
    %170 = arith.select %167, %165, %169 : vector<16x1xi1>, vector<16x1xi32>
    %171 = tpu.bitcast %170 : vector<16x1xi32> -> vector<16x1xf32>
    %172 = vector.broadcast %163 : vector<16x1xi32> to vector<16x128xi32>
    %173 = arith.cmpi eq, %29, %172 : vector<16x128xi32>
    %c-2147483648_i32_56 = arith.constant -2147483648 : i32
    %174 = vector.broadcast %c-2147483648_i32_56 : i32 to vector<16x128xi32>
    %175 = arith.select %173, %15, %174 : vector<16x128xi1>, vector<16x128xi32>
    %cst_57 = arith.constant dense<-2147483648> : vector<16xi32>
    %176 = vector.multi_reduction <maxsi>, %175, %cst_57 [1] : vector<16x128xi32> to vector<16xi32>
    %177 = vector.shape_cast %176 : vector<16xi32> to vector<16x1xi32>
    %c128_i32_58 = arith.constant 128 : i32
    %178 = vector.broadcast %c128_i32_58 : i32 to vector<16x1xi32>
    %179 = arith.subi %163, %178 : vector<16x1xi32>
    %c128_i32_59 = arith.constant 128 : i32
    %180 = arith.muli %arg1, %c128_i32_59 : i32
    %181 = vector.broadcast %180 : i32 to vector<16x1xi32>
    %182 = arith.addi %179, %181 : vector<16x1xi32>
    %c128_i32_60 = arith.constant 128 : i32
    %183 = vector.broadcast %c128_i32_60 : i32 to vector<16x1xi32>
    %184 = arith.cmpi slt, %163, %183 : vector<16x1xi32>
    %185 = arith.select %184, %177, %182 : vector<16x1xi1>, vector<16x1xi32>
    %c3_i32 = arith.constant 3 : i32
    %186 = vector.broadcast %c3_i32 : i32 to vector<16x128xi32>
    %187 = arith.cmpi eq, %29, %186 : vector<16x128xi32>
    %188 = vector.shape_cast %171 : vector<16x1xf32> to vector<16x1xf32>
    %189 = vector.broadcast %188 : vector<16x1xf32> to vector<16x128xf32>
    %190 = arith.select %187, %189, %148 : vector<16x128xi1>, vector<16x128xf32>
    %c3_i32_61 = arith.constant 3 : i32
    %191 = vector.broadcast %c3_i32_61 : i32 to vector<16x128xi32>
    %192 = arith.cmpi eq, %29, %191 : vector<16x128xi32>
    %193 = vector.shape_cast %185 : vector<16x1xi32> to vector<16x1xi32>
    %194 = vector.broadcast %193 : vector<16x1xi32> to vector<16x128xi32>
    %195 = arith.select %192, %194, %153 : vector<16x128xi1>, vector<16x128xi32>
    %196 = vector.broadcast %159 : vector<16x1xi32> to vector<16x256xi32>
    %197 = arith.cmpi eq, %157, %196 : vector<16x256xi32>
    %c-2147483648_i32_62 = arith.constant -2147483648 : i32
    %198 = vector.broadcast %c-2147483648_i32_62 : i32 to vector<16x256xi32>
    %199 = arith.select %197, %198, %157 : vector<16x256xi1>, vector<16x256xi32>
    %cst_63 = arith.constant dense<-2147483648> : vector<16xi32>
    %200 = vector.multi_reduction <maxsi>, %199, %cst_63 [1] : vector<16x256xi32> to vector<16xi32>
    %201 = vector.shape_cast %200 : vector<16xi32> to vector<16x1xi32>
    %c4095_i32_64 = arith.constant 4095 : i32
    %202 = vector.broadcast %c4095_i32_64 : i32 to vector<16x1xi32>
    %203 = arith.andi %201, %202 : vector<16x1xi32>
    %c255_i32_65 = arith.constant 255 : i32
    %204 = vector.broadcast %c255_i32_65 : i32 to vector<16x1xi32>
    %205 = arith.subi %204, %203 : vector<16x1xi32>
    %c-4096_i32_66 = arith.constant -4096 : i32
    %206 = vector.broadcast %c-4096_i32_66 : i32 to vector<16x1xi32>
    %207 = arith.andi %201, %206 : vector<16x1xi32>
    %c0_i32_67 = arith.constant 0 : i32
    %208 = vector.broadcast %c0_i32_67 : i32 to vector<16x1xi32>
    %209 = arith.cmpi sge, %207, %208 : vector<16x1xi32>
    %c2147483647_i32_68 = arith.constant 2147483647 : i32
    %210 = vector.broadcast %c2147483647_i32_68 : i32 to vector<16x1xi32>
    %211 = arith.xori %207, %210 : vector<16x1xi32>
    %212 = arith.select %209, %207, %211 : vector<16x1xi1>, vector<16x1xi32>
    %213 = tpu.bitcast %212 : vector<16x1xi32> -> vector<16x1xf32>
    %214 = vector.broadcast %205 : vector<16x1xi32> to vector<16x128xi32>
    %215 = arith.cmpi eq, %29, %214 : vector<16x128xi32>
    %c-2147483648_i32_69 = arith.constant -2147483648 : i32
    %216 = vector.broadcast %c-2147483648_i32_69 : i32 to vector<16x128xi32>
    %217 = arith.select %215, %15, %216 : vector<16x128xi1>, vector<16x128xi32>
    %cst_70 = arith.constant dense<-2147483648> : vector<16xi32>
    %218 = vector.multi_reduction <maxsi>, %217, %cst_70 [1] : vector<16x128xi32> to vector<16xi32>
    %219 = vector.shape_cast %218 : vector<16xi32> to vector<16x1xi32>
    %c128_i32_71 = arith.constant 128 : i32
    %220 = vector.broadcast %c128_i32_71 : i32 to vector<16x1xi32>
    %221 = arith.subi %205, %220 : vector<16x1xi32>
    %c128_i32_72 = arith.constant 128 : i32
    %222 = arith.muli %arg1, %c128_i32_72 : i32
    %223 = vector.broadcast %222 : i32 to vector<16x1xi32>
    %224 = arith.addi %221, %223 : vector<16x1xi32>
    %c128_i32_73 = arith.constant 128 : i32
    %225 = vector.broadcast %c128_i32_73 : i32 to vector<16x1xi32>
    %226 = arith.cmpi slt, %205, %225 : vector<16x1xi32>
    %227 = arith.select %226, %219, %224 : vector<16x1xi1>, vector<16x1xi32>
    %c4_i32 = arith.constant 4 : i32
    %228 = vector.broadcast %c4_i32 : i32 to vector<16x128xi32>
    %229 = arith.cmpi eq, %29, %228 : vector<16x128xi32>
    %230 = vector.shape_cast %213 : vector<16x1xf32> to vector<16x1xf32>
    %231 = vector.broadcast %230 : vector<16x1xf32> to vector<16x128xf32>
    %232 = arith.select %229, %231, %190 : vector<16x128xi1>, vector<16x128xf32>
    %c4_i32_74 = arith.constant 4 : i32
    %233 = vector.broadcast %c4_i32_74 : i32 to vector<16x128xi32>
    %234 = arith.cmpi eq, %29, %233 : vector<16x128xi32>
    %235 = vector.shape_cast %227 : vector<16x1xi32> to vector<16x1xi32>
    %236 = vector.broadcast %235 : vector<16x1xi32> to vector<16x128xi32>
    %237 = arith.select %234, %236, %195 : vector<16x128xi1>, vector<16x128xi32>
    %c0_75 = arith.constant 0 : index
    %c0_76 = arith.constant 0 : index
    %238 = vector.load %arg4[%c0_75, %c0_76] : memref<16x128xf32, #tpu.memory_space<vmem>>, vector<16x128xf32>
    tpu.vector_store %arg4[%c0_75, %c0_76], %232 {strides = array<i32>} : memref<16x128xf32, #tpu.memory_space<vmem>>, vector<16x128xf32>,
    %c0_77 = arith.constant 0 : index
    %c0_78 = arith.constant 0 : index
    %239 = vector.load %arg5[%c0_77, %c0_78] : memref<16x128xi32, #tpu.memory_space<vmem>>, vector<16x128xi32>
    tpu.vector_store %arg5[%c0_77, %c0_78], %237 {strides = array<i32>} : memref<16x128xi32, #tpu.memory_space<vmem>>, vector<16x128xi32>,
    return
  }
  func.func @transform_0(%arg0: i32, %arg1: i32) -> (i32, i32) {
    %c0_i32 = arith.constant 0 : i32
    %c0_i32_0 = arith.constant 0 : i32
    return %arg0, %c0_i32 : i32, i32
  }
  func.func @transform_1(%arg0: i32, %arg1: i32) -> (i32, i32) {
    %c0_i32 = arith.constant 0 : i32
    %c0_i32_0 = arith.constant 0 : i32
    return %arg1, %c0_i32 : i32, i32
  }
  func.func @transform_2(%arg0: i32, %arg1: i32) -> (i32, i32) {
    %c0_i32 = arith.constant 0 : i32
    %c0_i32_0 = arith.constant 0 : i32
    return %arg0, %c0_i32 : i32, i32
  }
  func.func @transform_3(%arg0: i32, %arg1: i32) -> (i32, i32) {
    %c0_i32 = arith.constant 0 : i32
    %c0_i32_0 = arith.constant 0 : i32
    return %arg0, %c0_i32 : i32, i32
  }
}

</mosaic_0001>

<bundles_post_ra>
// kernel: tpu_custom_call.1
= control target key start
LH: loop header
LB: loop body
LE: loop exit
PB: predicated region body
PF: predicated region fallthrough
CT: control target
= control target key end

     0   :  { %9 = vsyncpa [#allocation3], 0  ;;  %s1915_s0 = inlined_call_operand.hbm [shape: bf16[16,128], index: 0, kind: input, shape index: {}]   ;;  %s1916_s1 = inlined_call_operand.hbm [shape: bf16[384,128], index: 1, kind: input, shape index: {}]   ;;  %s1917_s2 = inlined_call_operand.hbm [shape: f32[16,128], index: 2, kind: output, shape index: {0}]   ;;  %s1918_s3 = inlined_call_operand.hbm [shape: s32[16,128], index: 3, kind: output, shape index: {1}]  }
   0x1   :  { %10 = vsyncpa [#allocation6], 0 }
   0x2   :  { %12 = vsyncpa [#allocation6 + $0x1], 0 }
   0x3   :  { %13 = vsyncpa [#allocation4], 0 }
   0x4   :  { %14 = vsyncpa [#allocation9], 0  ;;  %s1388_s12 = smov 0   ;;  %s1390_s13 = smov 0  }
   0x5   :  { %s1392_s14 = smov 0   ;;  %s1394_s15 = smov 0  }
   0x6   :  { %s1396_s16 = smov 0   ;;  %s1398_s17 = smov 0  }
   0x7 LB: > { %s1016_s18 = sadd.s32 4294967295, %s1354_s17   ;;  %p78_p0 = scmp.ne.s32.totalorder %s1338_s13, %s1334_s12  ;;  %s1354_s17 = sphi %s1398_s17, %s20_s17   ;;  %s1350_s16 = sphi %s1396_s16, %s1936_s16   ;;  %s1346_s15 = sphi %s1394_s15, %s1935_s15   ;;  %s1342_s14 = sphi %s1392_s14, %s1934_s14   ;;  %s1338_s13 = sphi %s1390_s13, %s1933_s13   ;;  %s1334_s12 = sphi %s1388_s12, %s1932_s12  }
   0x8   : > { %p1420_p1 = scmp.eq.s32.totalorder %s1016_s18, 0  ;;  %p1017_p2 = scmp.ge.s32.totalorder %s1354_s17, 1 }
   0x9   : > { %p141_p3 = scmp.lt.s32.totalorder %s1354_s17, 4  ;;  %s1356_s22 = smov [#allocation2]  }
   0xa   : > { %s1923_s19 = scalar_select %p1420_p1, 1, 0 }
   0xb   : > { %p1428_p4 = por %p1420_p1, %p78_p0  ;;  %p1432_p5 = pnand %p1017_p2, %p141_p3 }
   0xc   : > { %s156_s23 = sshll.u32 %s1356_s22, 4  ;;  %s29_s25 = sadd.s32 1, %s1350_s16  ;;  %s157_s23 = int_to_ptr.vmem [resolvable:$true] %s156_s23 }
   0xd   : > { %s1924_s20 = scalar_select %p1428_p4, 1, 0 }
   0xe   : > { %s1925_s21 = scalar_select %p1432_p5, 1, 0 }
   0xf   : > { %p1099_p6 = pneg %p1432_p5  ;;  %s1182_s28 = scalar_lea.hbm %s1915_s0, 128 }
  0x10   : > { %p1183_p8 = scmp.ne.s32.totalorder %s1915_s0, %s1182_s28  ;;  %p1189_p12 = scmp.lt.u32.totalorder %s1182_s28, %s1915_s0 }
  0x11   : > { %p1440_p7 = pnand %p1099_p6, %p1420_p1 }
  0x13   : > { %p1184_p9 = pneg %p1440_p7 }
  0x15   : > { %p1185_p10 = pnand %p1184_p9, %p1183_p8 }
  0x17   : > { %p1186_p11 = pneg %p1185_p10 }
  0x19   : > { %p1191_p13 = pnand %p1189_p12, %p1186_p11 }
  0x1b   : > { %1194 = shalt.err (!%p1191_p13)
}
  0x1c   : > { %s1195_s6 = scalar_lea.vmem %s157_s23, 128  ;;  %p1203_p6 = scmp.lt.s32.totalorder %s157_s23, %s157_s23 }
  0x1d   : > { %p1196_p0 = scmp.ne.s32.totalorder %s157_s23, %s1195_s6  ;;  %p1204_p4 = scmp.lt.s32.totalorder %s1195_s6, %s1195_s6 }
  0x1f   : > { %p1198_p2 = pnand %p1196_p0, %p1184_p9  ;;  %p1205_p1 = por %p1204_p4, %p1203_p6 }
  0x21   : > { %p1199_p3 = pneg %p1198_p2 }
  0x23   : > { %p1206_p5 = pnand %p1205_p1, %p1199_p3 }
  0x25   : > { %1209 = shalt.err (!%p1206_p5)
}
  0x26   : > { %s1357_s7 = smov 64   ;;  %s1358_s8 = smov 4  }
  0x27   : > { %1102 = dma.hbm_to_vmem [thread:$0]  (!%p1440_p7), %s1915_s0, 128, %s157_s23, [#allocation3], %s1357_s7, %s1357_s7, %s1358_s8  }
  0x28   : > { %p30_p1 = scmp.ge.s32.totalorder %s29_s25, 3  ;;  %s65_s11 = sadd.s32 1, %s1342_s14 }
  0x29   : > { %p72_p4 = scmp.ne.s32.totalorder %s1342_s14, %s1338_s13  ;;  %p73_p5 = scmp.eq.s32.totalorder %s1354_s17, 0 }
  0x2a   : > { %s1938_s25 = smov (%p30_p1, %s29_s25), 0  ;;  %p1108_p9 = scmp.lt.s32.totalorder %s1354_s17, 3 }
  0x2b   : > { %p74_p8 = por %p73_p5, %p72_p4  ;;  %s62_s12 = ssub.s32 %s1350_s16, %s1938_s25 }
  0x2c   : > { %s170_s22 = sand.u32 1, %s1342_s14   ;;  %p63_p10 = scmp.eq.s32.totalorder %s62_s12, 0 }
  0x2d   : > { %s1020_s24 = sshll.u32 %s170_s22, 6  ;;  %s1053_s26 = sshll.u32 %s1350_s16, 10 }
  0x2e   : > { %s1476_s27 = scalar_select %p63_p10, %s1342_s14, %s65_s11  }
  0x2f   : > { %s1481_s23 = scalar_lea.hbm %s1916_s1, %s1053_s26  ;;  %s174_s30 = scalar_lea.vmem [#allocation5], %s1020_s24 }
  0x30   : > { %s181_s4 = sshll.u32 %s174_s30, 4  ;;  %p1483_p7 = pnand %p1108_p9, %p74_p8  ;;  %s1487_s4 = int_to_ptr.vmem [resolvable:$true] %s181_s4 }
  0x31   : > { %s1489_s6 = scalar_lea.sflag [#allocation6], %s170_s22  ;;  %s1210_s9 = scalar_lea.hbm %s1481_s23, 1024 }
  0x32   : > { %p1211_p11 = scmp.ne.s32.totalorder %s1481_s23, %s1210_s9  ;;  %p1212_p12 = pneg %p1483_p7 }
  0x33   : > { %s1215_s12 = scalar_lea.hbm %s1916_s1, 3072  ;;  %p1216_p2 = scmp.lt.u32.totalorder %s1481_s23, %s1916_s1 }
  0x34   : > { %p1213_p13 = pnand %p1212_p12, %p1211_p11  ;;  %p1217_p3 = scmp.lt.u32.totalorder %s1215_s12, %s1210_s9 }
  0x35   : > { %p1219_p1 = scmp.lt.u32.totalorder %s1210_s9, %s1481_s23 }
  0x36   : > { %p1214_p0 = pneg %p1213_p13  ;;  %p1218_p6 = por %p1217_p3, %p1216_p2 }
  0x38   : > { %p1220_p4 = por %p1219_p1, %p1218_p6 }
  0x3a   : > { %p1221_p5 = pnand %p1220_p4, %p1214_p0 }
  0x3c   : > { %1224 = shalt.err (!%p1221_p5)
}
  0x3d   : > { %s1225_s22 = scalar_lea.vmem %s1487_s4, 1024  ;;  %s1359_s28 = smov [#allocation5]  }
  0x3e   : > { %p1226_p8 = scmp.ne.s32.totalorder %s1487_s4, %s1225_s22  ;;  %s1230_s29 = sshll.u32 %s1359_s28, 4  ;;  %s1231_s29 = int_to_ptr.vmem [resolvable:$false] %s1230_s29 }
  0x3f   : > { %s1232_s30 = scalar_lea.vmem %s1231_s29, 2048  ;;  %p1233_p11 = scmp.lt.s32.totalorder %s1487_s4, %s1231_s29 }
  0x40   : > { %p1228_p9 = pnand %p1226_p8, %p1212_p12  ;;  %p1234_p13 = scmp.lt.s32.totalorder %s1232_s30, %s1225_s22 }
  0x42   : > { %p1229_p10 = pneg %p1228_p9  ;;  %p1235_p2 = por %p1234_p13, %p1233_p11 }
  0x44   : > { %p1236_p3 = pnand %p1235_p2, %p1229_p10 }
  0x46   : > { %1239 = shalt.err (!%p1236_p3)
}
  0x47   : > { %1106 = dma.hbm_to_vmem [thread:$0]  (!%p1483_p7), %s1481_s23, 1024, %s1487_s4, %s1489_s6, %s1357_s7, %s1357_s7, %s1358_s8  }
  0x48   : > { %p1928_p12 = scmp.ne.s32.totalorder %s1925_s21, 0 }
  0x49   : > { %p1929_p0 = scmp.ne.s32.totalorder (!%p1928_p12), %s1923_s19, 0 }
  0x4a   : > { %193 = sbr.rel (%p1928_p12) target bundleno = 2584 (0xa18), region = 28 }
  0x51   : > { %1317 = dma.done.wait (%p1929_p0), [#allocation3], 128  }
  0x52   : > { %1319 = vsyncadd (%p1929_p0), [#allocation3], 4294967168  ;;  %s199_s9 = sand.u32 1, %s1338_s13   ;;  %p1930_p6 = scmp.ne.s32.totalorder %s1924_s20, 0 }
  0x53   : > { %s1025_s5 = sshll.u32 %s199_s9, 6  ;;  %s200_s10 = scalar_lea.sflag [#allocation6], %s199_s9 }
  0x54   : > { %s1527_s11 = scalar_lea.vmem [#allocation5], %s1025_s5 }
  0x55   : > { %1321 = dma.done.wait (%p1930_p6), %s200_s10, 1024  }
  0x56   : > { %1323 = vsyncadd (%p1930_p6), %s200_s10, 4294966272  ;;  %p1026_p7 = scmp.ne.s32.totalorder %s1346_s15, 0 }
  0x57   : > { %v1360_v0 = vmov (!%p1026_p7), -inf   ;;  %v1361_v1 = vmov (!%p1026_p7), 0  }
  0x58   : > { %229 = sbr.rel (%p1026_p7) target bundleno = 95 (0x5f), region = 40  ;;  %230 = vst [vmem:[#allocation7] sm:$0xff] (!%p1026_p7), %v1360_v0  ;;  %231 = vst [vmem:[#allocation7 + $0x8] sm:$0xff] (!%p1026_p7), %v1360_v0 }
  0x59   : > { %232 = vst [vmem:[#allocation8] sm:$0xff] (!%p1026_p7), %v1361_v1  ;;  %233 = vst [vmem:[#allocation8 + $0x8] sm:$0xff] (!%p1026_p7), %v1361_v1 }
  0x5f PF: > { %v1173_v2 = vld [vmem:[%s1527_s11] sm:$0xff]   ;;  %v1362_v3 = vmov 0.0   ;;  %vm1363_vm0 = vmmov 0   ;;  %v1174_v4 = vld [vmem:[%s1527_s11 + $0x8] sm:$0xff]   ;;  %v1175_v5 = vld [vmem:[%s1527_s11 + $0x10] sm:$0xff]   ;;  %v347_v12 = vlaneseq  ;;  %s1036_s19 = sshll.u32 %s1346_s15, 7 }
  0x60   : > { %1063 = vmatprep.subr.bf16.mxu0 %v1362_v3  ;;  %1079 = vmatprep.mubr.msk.bf16.mxu0 %vm1363_vm0, %v1362_v3  ;;  %v1176_v6 = vld [vmem:[%s1527_s11 + $0x18] sm:$0xff]   ;;  %v1177_v7 = vld [vmem:[%s1527_s11 + $0x20] sm:$0xff]   ;;  %v1178_v8 = vld [vmem:[%s1527_s11 + $0x28] sm:$0xff]   ;;  %v1545_v14 = vstv %s1036_s19  ;;  %vm363_vm2 = vcmask 39968  }
  0x61   : > { %1064 = vmatpush3.bf16.xpose.msra.mxu0 %v1173_v2  ;;  %v1179_v9 = vld [vmem:[%s1527_s11 + $0x30] sm:$0xff]   ;;  %v1180_v10 = vld [vmem:[%s1527_s11 + $0x38] sm:$0xff]   ;;  %v1543_v13 = vand.u32 127, %v347_v12  ;;  %v355_v22 = vld [vmem:[#allocation7] sm:$0xff] }
  0x62   : > { %1065 = vmatprep.subr.bf16.mxu0 %v1362_v3  ;;  %v1181_v11 = vld [vmem:[#allocation2] sm:$0xff]   ;;  %v356_v24 = vld [vmem:[#allocation7 + $0x8] sm:$0xff] }
  0x63   : > { %v351_v15 = vadd.s32 %v1545_v14, %v1543_v13 }
  0x65   : > { %vm352_vm1 = vcmp.lt.s32.totalorder %v351_v15, 320 }
  0x69   : > { %1066 = vmatpush3.bf16.xpose.msra.mxu0 %v1174_v4 }
  0x6a   : > { %1067 = vmatprep.subr.bf16.mxu0 %v1362_v3 }
  0x71   : > { %1068 = vmatpush3.bf16.xpose.msra.mxu0 %v1175_v5 }
  0x72   : > { %1069 = vmatprep.subr.bf16.mxu0 %v1362_v3 }
  0x79   : > { %1070 = vmatpush3.bf16.xpose.msra.mxu0 %v1176_v6 }
  0x7a   : > { %1071 = vmatprep.subr.bf16.mxu0 %v1362_v3 }
  0x81   : > { %1072 = vmatpush3.bf16.xpose.msra.mxu0 %v1177_v7 }
  0x82   : > { %1073 = vmatprep.subr.bf16.mxu0 %v1362_v3 }
  0x89   : > { %1074 = vmatpush3.bf16.xpose.msra.mxu0 %v1178_v8 }
  0x8a   : > { %1075 = vmatprep.subr.bf16.mxu0 %v1362_v3 }
  0x91   : > { %1076 = vmatpush3.bf16.xpose.msra.mxu0 %v1179_v9 }
  0x92   : > { %1077 = vmatprep.subr.bf16.mxu0 %v1362_v3 }
  0x99   : > { %1078 = vmatpush3.bf16.xpose.msra.mxu0 %v1180_v10 }
  0xa0   : > { %1080 = vmatmul.mubr.bf16.vlgmr.msra.gmra.mrb[0].mxu0 %v1181_v11 }
 0x173   : > { %v340_v16 = vpop.f32.mrb[0].mxu0 }
 0x174   : > { %v1081_v17 = vpop.f32.mrb[1].mxu0  ;;  %v353_v18 = vsel %vm352_vm1, %v340_v16, -inf }
 0x175   : > { %357 = vmax.xlane.f32.xlu0 %v353_v18  ;;  %v343_v19 = vpop.f32.mrb[2].mxu0 }
 0x176   : > { %v1082_v20 = vpop.f32.mrb[3].mxu0  ;;  %v354_v21 = vsel %vm352_vm1, %v343_v19, -inf }
 0x179   : > { %359 = vmax.xlane.f32.xlu0 %v354_v21 }
 0x202   : > { %v358_v23 = vpop.xlane.xlu0 %357 }
 0x203   : > { %v361_v25 = vsub.f32 %v358_v23, %v355_v22 }
 0x205   : > { %v364_v28 = vsel %vm363_vm2, %v361_v25, -inf }
 0x206   : > { %v360_v26 = vpop.xlane.xlu0 %359 }
 0x207   : > { %v362_v27 = vsub.f32 %v360_v26, %v356_v24 }
 0x209   : > { %v365_v29 = vsel %vm363_vm2, %v362_v27, -inf }
 0x20a   : > { %v366_v30 = vmax.f32 %v364_v28, %v365_v29 }
 0x20c   : > { %367 = vmax.xlane.f32.xlu1 %v366_v30 }
 0x299   : > { %v368_v31 = vpop.xlane.xlu1 %367 }
 0x29a   : > { %v369_v32 = vrot.slane %v368_v31, 4 }
 0x29c   : > { %v370_v33 = vmax.f32 %v368_v31, %v369_v32 }
 0x29e   : > { %v371_v34 = vrot.slane %v370_v33, 2 }
 0x2a0   : > { %v372_v35 = vmax.f32 %v370_v33, %v371_v34 }
 0x2a2   : > { %v373_v36 = vrot.slane %v372_v35, 1 }
 0x2a4   : > { %v374_v37 = vmax.f32 %v372_v35, %v373_v36 }
 0x2a6   : > { %1083 = vpush %v374_v37 }
 0x2d7   : > { %s1084_s15 = spop %1083 }
 0x2d8   : > { %p376_p1 = scmp.gt.f32.partialorder %s1084_s15, 0.0 }
 0x2d9   : > { %v382_v38 = vadd.s32 (%p376_p1), 128, %v1543_v13  ;;  %vm389_vm3 = vcmp.ge.s32.totalorder (%p376_p1), %v355_v22, 0  ;;  %vm390_vm4 = vcmp.ge.s32.totalorder (%p376_p1), %v353_v18, 0  ;;  %v393_v39 = vxor.u32 (%p376_p1), 2147483647, %v355_v22 }
 0x2da   : > { %379 = sbr.rel (!%p376_p1) target bundleno = 2533 (0x9e5), region = 44  ;;  %v394_v40 = vxor.u32 (%p376_p1), 2147483647, %v353_v18  ;;  %vm391_vm5 = vcmp.ge.s32.totalorder (%p376_p1), %v356_v24, 0  ;;  %vm392_vm6 = vcmp.ge.s32.totalorder (%p376_p1), %v354_v21, 0  ;;  %v383_v41 = vsub.s32 (%p376_p1), 255, %v1543_v13 }
 0x2db   : > { %v384_v42 = vsub.s32 (%p376_p1), 255, %v382_v38  ;;  %v395_v43 = vxor.u32 (%p376_p1), 2147483647, %v356_v24  ;;  %v396_v44 = vxor.u32 (%p376_p1), 2147483647, %v354_v21  ;;  %v397_v45 = vsel (%p376_p1), %vm389_vm3, %v355_v22, %v393_v39 }
 0x2dc   : > { %v398_v46 = vsel (%p376_p1), %vm390_vm4, %v353_v18, %v394_v40  ;;  %v401_v47 = vand.u32 (%p376_p1), 4294963200, %v397_v45 }
 0x2dd   : > { %v402_v48 = vand.u32 (%p376_p1), 4294963200, %v398_v46  ;;  %v399_v49 = vsel (%p376_p1), %vm391_vm5, %v356_v24, %v395_v43  ;;  %v400_v50 = vsel (%p376_p1), %vm392_vm6, %v354_v21, %v396_v44 }
 0x2de   : > { %v403_v51 = vand.u32 (%p376_p1), 4294963200, %v399_v49  ;;  %v404_v52 = vand.u32 (%p376_p1), 4294963200, %v400_v50  ;;  %v405_v53 = vor.u32 (%p376_p1), %v401_v47, %v383_v41 }
 0x2df   : > { %v406_v54 = vor.u32 (%p376_p1), %v402_v48, %v384_v42 }
 0x2e0   : > { %v407_v55 = vor.u32 (%p376_p1), %v403_v51, %v383_v41  ;;  %v408_v56 = vor.u32 (%p376_p1), %v404_v52, %v384_v42 }
 0x2e1   : > { %vm409_vm7 = vcmp.gt.s32.totalorder %v405_v53, %v406_v54 }
 0x2e2   : > { %v410_v57 = vsel %vm409_vm7, %v405_v53, %v406_v54  ;;  %vm425_vm8 = vcmp.gt.s32.totalorder %v407_v55, %v408_v56 }
 0x2e3   : > { %v412_v58 = vshra.s32 %v410_v57, 16  ;;  %v426_v59 = vsel %vm425_vm8, %v407_v55, %v408_v56  ;;  %v411_v63 = vand.u32 65535, %v410_v57 }
 0x2e4   : > { %v428_v60 = vshra.s32 %v426_v59, 16  ;;  %v427_v1 = vand.u32 65535, %v426_v59 }
 0x2e5   : > { %v414_v61 = vcvt.s32.f32 %v412_v58  ;;  %v413_v0 = vcvt.s32.f32 %v411_v63 }
 0x2e6   : > { %v430_v62 = vcvt.s32.f32 %v428_v60  ;;  %v429_v4 = vcvt.s32.f32 %v427_v1 }
 0x2e7   : > { %415 = vmax.xlane.f32.xlu0 %v414_v61 }
 0x2eb   : > { %431 = vmax.xlane.f32.xlu0 %v430_v62 }
 0x374   : > { %v416_v2 = vpop.xlane.xlu0 %415 }
 0x375   : > { %vm417_vm9 = vcmp.eq.f32.partialorder %v414_v61, %v416_v2  ;;  %v422_v7 = vcvt.f32.s32 %v416_v2 }
 0x376   : > { %v418_v3 = vsel %vm417_vm9, %v413_v0, -inf  ;;  %vm495_vm9 = vcmp.eq.s32.totalorder %v1543_v13, 0 }
 0x377   : > { %419 = vmax.xlane.f32.xlu1 %v418_v3  ;;  %v423_v9 = vshll.u32 %v422_v7, 16 }
 0x378   : > { %v432_v5 = vpop.xlane.xlu0 %431 }
 0x379   : > { %vm433_vm10 = vcmp.eq.f32.partialorder %v430_v62, %v432_v5  ;;  %v438_v10 = vcvt.f32.s32 %v432_v5 }
 0x37a   : > { %v434_v6 = vsel %vm433_vm10, %v429_v4, -inf  ;;  %vm594_vm10 = vcmp.eq.s32.totalorder %v1543_v13, 1 }
 0x37b   : > { %435 = vmax.xlane.f32.xlu1 %v434_v6  ;;  %v439_v16 = vshll.u32 %v438_v10, 16 }
 0x404   : > { %v420_v8 = vpop.xlane.xlu1 %419 }
 0x405   : > { %v421_v11 = vcvt.f32.s32 %v420_v8 }
 0x407   : > { %v1551_v12 = vadd.s32 %v423_v9, %v421_v11 }
 0x408   : > { %v436_v15 = vpop.xlane.xlu1 %435 }
 0x409   : > { %v437_v17 = vcvt.f32.s32 %v436_v15  ;;  %vm500_vm11 = vcmp.eq.s32.totalorder %v405_v53, %v1551_v12  ;;  %vm501_vm12 = vcmp.eq.s32.totalorder %v406_v54, %v1551_v12  ;;  %v445_v38 = vand.u32 4294963200, %v1551_v12 }
 0x40a   : > { %v504_v18 = vsel %vm500_vm11, 2147483648, %v405_v53  ;;  %v505_v19 = vsel %vm501_vm12, 2147483648, %v406_v54 }
 0x40b   : > { %v1555_v20 = vadd.s32 %v439_v16, %v437_v17  ;;  %vm508_vm13 = vcmp.gt.s32.totalorder %v504_v18, %v505_v19  ;;  %vm447_vm3 = vcmp.ge.s32.totalorder %v445_v38, 0  ;;  %v449_v45 = vxor.u32 2147483647, %v445_v38 }
 0x40c   : > { %v509_v21 = vsel %vm508_vm13, %v504_v18, %v505_v19 }
 0x40d   : > { %v511_v22 = vshra.s32 %v509_v21, 16  ;;  %vm502_vm14 = vcmp.eq.s32.totalorder %v407_v55, %v1555_v20  ;;  %vm503_vm15 = vcmp.eq.s32.totalorder %v408_v56, %v1555_v20  ;;  %v510_v29 = vand.u32 65535, %v509_v21 }
 0x40e   : > { %v506_v23 = vsel %vm502_vm14, 2147483648, %v407_v55  ;;  %v507_v25 = vsel %vm503_vm15, 2147483648, %v408_v56  ;;  %v446_v43 = vand.u32 4294963200, %v1555_v20  ;;  %v451_v56 = vsel %vm447_vm3, %v445_v38, %v449_v45 }
 0x40f   : > { %v513_v24 = vcvt.s32.f32 %v511_v22  ;;  %vm524_vm0 = vcmp.gt.s32.totalorder %v506_v23, %v507_v25  ;;  %v512_v31 = vcvt.s32.f32 %v510_v29  ;;  %v496_v1 = vsel %vm495_vm9, %v451_v56, -inf }
 0x410   : > { %v525_v26 = vsel %vm524_vm0, %v506_v23, %v507_v25  ;;  %v450_v52 = vxor.u32 2147483647, %v446_v43  ;;  %vm448_vm8 = vcmp.ge.s32.totalorder %v446_v43, 0 }
 0x411   : > { %514 = vmax.xlane.f32.xlu0 %v513_v24  ;;  %v527_v27 = vshra.s32 %v525_v26, 16  ;;  %v526_v32 = vand.u32 65535, %v525_v26 }
 0x412   : > { %v452_v60 = vsel %vm448_vm8, %v446_v43, %v450_v52 }
 0x413   : > { %v529_v28 = vcvt.s32.f32 %v527_v27  ;;  %v528_v35 = vcvt.s32.f32 %v526_v32  ;;  %v497_v6 = vsel %vm495_vm9, %v452_v60, -inf }
 0x415   : > { %530 = vmax.xlane.f32.xlu1 %v529_v28 }
 0x49e   : > { %v515_v30 = vpop.xlane.xlu0 %514 }
 0x49f   : > { %vm516_vm1 = vcmp.eq.f32.partialorder %v513_v24, %v515_v30  ;;  %v521_v37 = vcvt.f32.s32 %v515_v30 }
 0x4a0   : > { %v517_v33 = vsel %vm516_vm1, %v512_v31, -inf }
 0x4a1   : > { %518 = vmax.xlane.f32.xlu0 %v517_v33  ;;  %v522_v40 = vshll.u32 %v521_v37, 16 }
 0x4a2   : > { %v531_v34 = vpop.xlane.xlu1 %530 }
 0x4a3   : > { %vm532_vm2 = vcmp.eq.f32.partialorder %v529_v28, %v531_v34  ;;  %v537_v42 = vcvt.f32.s32 %v531_v34 }
 0x4a4   : > { %v533_v36 = vsel %vm532_vm2, %v528_v35, -inf }
 0x4a5   : > { %534 = vmax.xlane.f32.xlu1 %v533_v36  ;;  %v538_v48 = vshll.u32 %v537_v42, 16 }
 0x52e   : > { %v519_v39 = vpop.xlane.xlu0 %518 }
 0x52f   : > { %v520_v41 = vcvt.f32.s32 %v519_v39 }
 0x531   : > { %v1561_v44 = vadd.s32 %v522_v40, %v520_v41 }
 0x532   : > { %v535_v47 = vpop.xlane.xlu1 %534 }
 0x533   : > { %v544_v46 = vand.u32 4294963200, %v1561_v44  ;;  %vm599_vm4 = vcmp.eq.s32.totalorder %v504_v18, %v1561_v44  ;;  %vm600_vm5 = vcmp.eq.s32.totalorder %v505_v19, %v1561_v44  ;;  %v536_v49 = vcvt.f32.s32 %v535_v47 }
 0x534   : > { %v603_v50 = vsel %vm599_vm4, 2147483648, %v504_v18  ;;  %v604_v51 = vsel %vm600_vm5, 2147483648, %v505_v19  ;;  %vm693_vm5 = vcmp.eq.s32.totalorder %v1543_v13, 2 }
 0x535   : > { %vm546_vm6 = vcmp.ge.s32.totalorder %v544_v46, 0  ;;  %v548_v53 = vxor.u32 2147483647, %v544_v46  ;;  %vm607_vm7 = vcmp.gt.s32.totalorder %v603_v50, %v604_v51  ;;  %v1566_v54 = vadd.s32 %v538_v48, %v536_v49 }
 0x536   : > { %v608_v55 = vsel %vm607_vm7, %v603_v50, %v604_v51 }
 0x537   : > { %v610_v57 = vshra.s32 %v608_v55, 16  ;;  %v550_v58 = vsel %vm546_vm6, %v544_v46, %v548_v53  ;;  %v545_v59 = vand.u32 4294963200, %v1566_v54  ;;  %vm601_vm11 = vcmp.eq.s32.totalorder %v506_v23, %v1566_v54 }
 0x538   : > { %vm602_vm12 = vcmp.eq.s32.totalorder %v507_v25, %v1566_v54  ;;  %v605_v62 = vsel %vm601_vm11, 2147483648, %v506_v23  ;;  %v595_v3 = vsel %vm594_vm10, %v550_v58, %v496_v1  ;;  %v609_v9 = vand.u32 65535, %v608_v55 }
 0x539   : > { %v612_v61 = vcvt.s32.f32 %v610_v57  ;;  %v606_v63 = vsel %vm602_vm12, 2147483648, %v507_v25  ;;  %vm547_vm13 = vcmp.ge.s32.totalorder %v545_v59, 0  ;;  %v549_v0 = vxor.u32 2147483647, %v545_v59 }
 0x53a   : > { %vm623_vm14 = vcmp.gt.s32.totalorder %v605_v62, %v606_v63  ;;  %v611_v11 = vcvt.s32.f32 %v609_v9 }
 0x53b   : > { %613 = vmax.xlane.f32.xlu0 %v612_v61  ;;  %v624_v2 = vsel %vm623_vm14, %v605_v62, %v606_v63  ;;  %v551_v4 = vsel %vm547_vm13, %v545_v59, %v549_v0 }
 0x53c   : > { %v626_v5 = vshra.s32 %v624_v2, 16  ;;  %v596_v7 = vsel %vm594_vm10, %v551_v4, %v497_v6  ;;  %v625_v15 = vand.u32 65535, %v624_v2 }
 0x53e   : > { %v628_v8 = vcvt.s32.f32 %v626_v5  ;;  %v627_v18 = vcvt.s32.f32 %v625_v15 }
 0x540   : > { %629 = vmax.xlane.f32.xlu1 %v628_v8 }
 0x5c8   : > { %v614_v10 = vpop.xlane.xlu0 %613 }
 0x5c9   : > { %vm615_vm15 = vcmp.eq.f32.partialorder %v612_v61, %v614_v10  ;;  %v620_v21 = vcvt.f32.s32 %v614_v10 }
 0x5ca   : > { %v616_v16 = vsel %vm615_vm15, %v611_v11, -inf }
 0x5cb   : > { %617 = vmax.xlane.f32.xlu0 %v616_v16  ;;  %v621_v23 = vshll.u32 %v620_v21, 16 }
 0x5cd   : > { %v630_v17 = vpop.xlane.xlu1 %629 }
 0x5ce   : > { %vm631_vm0 = vcmp.eq.f32.partialorder %v628_v8, %v630_v17  ;;  %v636_v25 = vcvt.f32.s32 %v630_v17 }
 0x5cf   : > { %v632_v19 = vsel %vm631_vm0, %v627_v18, -inf }
 0x5d0   : > { %633 = vmax.xlane.f32.xlu1 %v632_v19  ;;  %v637_v29 = vshll.u32 %v636_v25, 16 }
 0x658   : > { %v618_v22 = vpop.xlane.xlu0 %617 }
 0x659   : > { %v619_v24 = vcvt.f32.s32 %v618_v22 }
 0x65b   : > { %v1582_v26 = vadd.s32 %v621_v23, %v619_v24 }
 0x65d   : > { %v643_v27 = vand.u32 4294963200, %v1582_v26  ;;  %v634_v28 = vpop.xlane.xlu1 %633  ;;  %vm698_vm1 = vcmp.eq.s32.totalorder %v603_v50, %v1582_v26  ;;  %vm699_vm2 = vcmp.eq.s32.totalorder %v604_v51, %v1582_v26 }
 0x65e   : > { %v635_v30 = vcvt.f32.s32 %v634_v28  ;;  %v702_v31 = vsel %vm698_vm1, 2147483648, %v603_v50  ;;  %v703_v32 = vsel %vm699_vm2, 2147483648, %v604_v51  ;;  %vm792_vm2 = vcmp.eq.s32.totalorder %v1543_v13, 3 }
 0x65f   : > { %vm645_vm3 = vcmp.ge.s32.totalorder %v643_v27, 0  ;;  %v647_v33 = vxor.u32 2147483647, %v643_v27  ;;  %vm706_vm4 = vcmp.gt.s32.totalorder %v702_v31, %v703_v32  ;;  %v441_v28 = vand.u32 4095, %v1551_v12 }
 0x660   : > { %v1587_v34 = vadd.s32 %v637_v29, %v635_v30  ;;  %v707_v35 = vsel %vm706_vm4, %v702_v31, %v703_v32  ;;  %v540_v30 = vand.u32 4095, %v1561_v44  ;;  %v541_v12 = vand.u32 4095, %v1566_v54 }
 0x661   : > { %v709_v36 = vshra.s32 %v707_v35, 16  ;;  %v649_v37 = vsel %vm645_vm3, %v643_v27, %v647_v33  ;;  %v708_v50 = vand.u32 65535, %v707_v35  ;;  %v1617_v29 = vsub.s32 255, %v441_v28 }
 0x662   : > { %v644_v38 = vand.u32 4294963200, %v1587_v34  ;;  %vm700_vm6 = vcmp.eq.s32.totalorder %v605_v62, %v1587_v34  ;;  %vm701_vm7 = vcmp.eq.s32.totalorder %v606_v63, %v1587_v34  ;;  %v694_v45 = vsel %vm693_vm5, %v649_v37, %v595_v3 }
 0x663   : > { %v711_v39 = vcvt.s32.f32 %v709_v36  ;;  %v704_v40 = vsel %vm700_vm6, 2147483648, %v605_v62  ;;  %v705_v41 = vsel %vm701_vm7, 2147483648, %v606_v63  ;;  %v710_v52 = vcvt.s32.f32 %v708_v50 }
 0x664   : > { %vm646_vm8 = vcmp.ge.s32.totalorder %v644_v38, 0  ;;  %v648_v42 = vxor.u32 2147483647, %v644_v38  ;;  %vm722_vm11 = vcmp.gt.s32.totalorder %v704_v40, %v705_v41  ;;  %v1625_v33 = vsub.s32 255, %v540_v30 }
 0x665   : > { %712 = vmax.xlane.f32.xlu0 %v711_v39  ;;  %v723_v43 = vsel %vm722_vm11, %v704_v40, %v705_v41  ;;  %v639_v35 = vand.u32 4095, %v1582_v26  ;;  %v1643_v26 = vsub.s32 255, %v541_v12  ;;  %v640_v54 = vand.u32 4095, %v1587_v34 }
 0x666   : > { %v650_v46 = vsel %vm646_vm8, %v644_v38, %v648_v42  ;;  %v725_v47 = vshra.s32 %v723_v43, 16  ;;  %v724_v53 = vand.u32 65535, %v723_v43  ;;  %vm455_vm8 = vcmp.eq.s32.totalorder %v1543_v13, %v1617_v29 }
 0x667   : > { %v695_v48 = vsel %vm693_vm5, %v650_v46, %v596_v7  ;;  %vm554_vm11 = vcmp.eq.s32.totalorder %v1543_v13, %v1625_v33  ;;  %v1659_v34 = vsub.s32 255, %v640_v54 }
 0x668   : > { %v727_v49 = vcvt.s32.f32 %v725_v47  ;;  %v726_v57 = vcvt.s32.f32 %v724_v53 }
 0x66a   : > { %728 = vmax.xlane.f32.xlu1 %v727_v49 }
 0x6f2   : > { %v713_v51 = vpop.xlane.xlu0 %712 }
 0x6f3   : > { %vm714_vm12 = vcmp.eq.f32.partialorder %v711_v39, %v713_v51  ;;  %v719_v59 = vcvt.f32.s32 %v713_v51 }
 0x6f4   : > { %v715_v55 = vsel %vm714_vm12, %v710_v52, -inf }
 0x6f5   : > { %716 = vmax.xlane.f32.xlu0 %v715_v55  ;;  %v720_v61 = vshll.u32 %v719_v59, 16 }
 0x6f7   : > { %v729_v56 = vpop.xlane.xlu1 %728 }
 0x6f8   : > { %vm730_vm13 = vcmp.eq.f32.partialorder %v727_v49, %v729_v56  ;;  %v735_v63 = vcvt.f32.s32 %v729_v56 }
 0x6f9   : > { %v731_v58 = vsel %vm730_vm13, %v726_v57, -inf }
 0x6fa   : > { %732 = vmax.xlane.f32.xlu1 %v731_v58  ;;  %v736_v3 = vshll.u32 %v735_v63, 16 }
 0x782   : > { %v717_v60 = vpop.xlane.xlu0 %716 }
 0x783   : > { %v718_v62 = vcvt.f32.s32 %v717_v60 }
 0x785   : > { %v1597_v0 = vadd.s32 %v720_v61, %v718_v62 }
 0x787   : > { %v742_v1 = vand.u32 4294963200, %v1597_v0  ;;  %v733_v2 = vpop.xlane.xlu1 %732  ;;  %vm797_vm14 = vcmp.eq.s32.totalorder %v702_v31, %v1597_v0  ;;  %vm798_vm15 = vcmp.eq.s32.totalorder %v703_v32, %v1597_v0  ;;  %v738_v44 = vand.u32 4095, %v1597_v0 }
 0x788   : > { %v734_v4 = vcvt.f32.s32 %v733_v2  ;;  %v801_v5 = vsel %vm797_vm14, 2147483648, %v702_v31  ;;  %v802_v6 = vsel %vm798_vm15, 2147483648, %v703_v32  ;;  %v442_v31 = vand.u32 4095, %v1555_v20  ;;  %v1621_v32 = vld [vmem:[#allocation8] sm:$0xff] }
 0x789   : > { %vm744_vm0 = vcmp.ge.s32.totalorder %v742_v1, 0  ;;  %v746_v7 = vxor.u32 2147483647, %v742_v1  ;;  %vm805_vm1 = vcmp.gt.s32.totalorder %v801_v5, %v802_v6  ;;  %v1632_v38 = vsel %vm455_vm8, %v1621_v32, 2147483648 }
 0x78a   : > { %v1602_v8 = vadd.s32 %v736_v3, %v734_v4  ;;  %v806_v9 = vsel %vm805_vm1, %v801_v5, %v802_v6  ;;  %v1628_v37 = vsub.s32 255, %v442_v31  ;;  %v1636_v20 = vsub.s32 255, %v639_v35 }
 0x78b   : > { %v808_v10 = vshra.s32 %v806_v9, 16  ;;  %v748_v11 = vsel %vm744_vm0, %v742_v1, %v746_v7  ;;  %v807_v36 = vand.u32 65535, %v806_v9  ;;  %v460_v43 = vshra.s32 %v1632_v38, 16 }
 0x78c   : > { %v743_v15 = vand.u32 4294963200, %v1602_v8  ;;  %vm799_vm3 = vcmp.eq.s32.totalorder %v704_v40, %v1602_v8  ;;  %vm800_vm4 = vcmp.eq.s32.totalorder %v705_v41, %v1602_v8  ;;  %v1610_v22 = vsel %vm792_vm2, %v748_v11, %v694_v45 }
 0x78d   : > { %v810_v16 = vcvt.s32.f32 %v808_v10  ;;  %v803_v17 = vsel %vm799_vm3, 2147483648, %v704_v40  ;;  %v804_v18 = vsel %vm800_vm4, 2147483648, %v705_v41  ;;  %v809_v40 = vcvt.s32.f32 %v807_v36  ;;  %v1639_v41 = vld [vmem:[#allocation8 + $0x8] sm:$0xff] }
 0x78e   : > { %vm745_vm6 = vcmp.ge.s32.totalorder %v743_v15, 0  ;;  %v747_v19 = vxor.u32 2147483647, %v743_v15  ;;  %vm821_vm7 = vcmp.gt.s32.totalorder %v803_v17, %v804_v18  ;;  %vm456_vm12 = vcmp.eq.s32.totalorder %v1543_v13, %v1628_v37 }
 0x78f   : > { %811 = vmax.xlane.f32.xlu0 %v810_v16  ;;  %v822_v21 = vsel %vm821_vm7, %v803_v17, %v804_v18  ;;  %v1648_v46 = vsel %vm554_vm11, %v1621_v32, 2147483648  ;;  %v1651_v47 = vsel %vm456_vm12, %v1639_v41, 2147483648  ;;  %vm653_vm14 = vcmp.eq.s32.totalorder %v1543_v13, %v1636_v20 }
 0x790   : > { %v749_v23 = vsel %vm745_vm6, %v743_v15, %v747_v19  ;;  %v824_v24 = vshra.s32 %v822_v21, 16  ;;  %v823_v42 = vand.u32 65535, %v822_v21  ;;  %vm555_vm15 = vcmp.eq.s32.totalorder %v1543_v13, %v1643_v26 }
 0x791   : > { %v1614_v25 = vsel %vm792_vm2, %v749_v23, %v695_v48  ;;  %v1655_v48 = vsub.s32 255, %v738_v44  ;;  %v739_v49 = vand.u32 4095, %v1602_v8  ;;  %v1662_v52 = vcvt.s32.f32 %v460_v43 }
 0x792   : > { %v826_v27 = vcvt.s32.f32 %v824_v24  ;;  %v825_v51 = vcvt.s32.f32 %v823_v42  ;;  %v559_v53 = vshra.s32 %v1648_v46, 16  ;;  %v474_v55 = vshra.s32 %v1651_v47, 16 }
 0x793   : > { %v1667_v56 = vsel %vm653_vm14, %v1621_v32, 2147483648  ;;  %v1671_v58 = vsel %vm555_vm15, %v1639_v41, 2147483648  ;;  %vm752_vm1 = vcmp.eq.s32.totalorder %v1543_v13, %v1655_v48  ;;  %vm654_vm3 = vcmp.eq.s32.totalorder %v1543_v13, %v1659_v34 }
 0x794   : > { %827 = vmax.xlane.f32.xlu1 %v826_v27  ;;  %v1677_v59 = vsub.s32 255, %v739_v49  ;;  %v1679_v60 = vcvt.s32.f32 %v559_v53  ;;  %v658_v61 = vshra.s32 %v1667_v56, 16  ;;  %v1682_v62 = vcvt.s32.f32 %v474_v55 }
 0x795   : > { %v573_v63 = vshra.s32 %v1671_v58, 16  ;;  %v1686_v0 = vsel %vm752_vm1, %v1621_v32, 2147483648  ;;  %v1690_v1 = vsel %vm654_vm3, %v1639_v41, 2147483648  ;;  %vm891_vm6 = vcmp.eq.s32.totalorder %v1543_v13, 4 }
 0x796   : > { %vm753_vm4 = vcmp.eq.s32.totalorder %v1543_v13, %v1677_v59  ;;  %v1695_v2 = vcvt.s32.f32 %v658_v61  ;;  %v757_v3 = vshra.s32 %v1686_v0, 16  ;;  %v672_v5 = vshra.s32 %v1690_v1, 16 }
 0x797   : > { %v1698_v4 = vcvt.s32.f32 %v573_v63  ;;  %v1703_v6 = vsel %vm753_vm4, %v1639_v41, 2147483648  ;;  %v473_v63 = vand.u32 65535, %v1651_v47  ;;  %v657_v47 = vand.u32 65535, %v1667_v56 }
 0x798   : > { %v1706_v7 = vcvt.s32.f32 %v757_v3  ;;  %v1708_v8 = vcvt.s32.f32 %v672_v5  ;;  %v771_v9 = vshra.s32 %v1703_v6, 16  ;;  %v756_v56 = vand.u32 65535, %v1686_v0 }
 0x79a   : > { %v1713_v10 = vcvt.s32.f32 %v771_v9 }
 0x81c   : > { %v812_v39 = vpop.xlane.xlu0 %811 }
 0x81d   : > { %vm813_vm13 = vcmp.eq.f32.partialorder %v810_v16, %v812_v39  ;;  %v818_v11 = vcvt.f32.s32 %v812_v39 }
 0x81e   : > { %v814_v45 = vsel %vm813_vm13, %v809_v40, -inf }
 0x81f   : > { %815 = vmax.xlane.f32.xlu0 %v814_v45  ;;  %v819_v16 = vshll.u32 %v818_v11, 16 }
 0x821   : > { %v828_v50 = vpop.xlane.xlu1 %827 }
 0x822   : > { %vm829_vm0 = vcmp.eq.f32.partialorder %v826_v27, %v828_v50  ;;  %v834_v18 = vcvt.f32.s32 %v828_v50 }
 0x823   : > { %v830_v57 = vsel %vm829_vm0, %v825_v51, -inf  ;;  %463 = vmax.xlane.f32.xlu0 %v1662_v52 }
 0x824   : > { %831 = vmax.xlane.f32.xlu1 %v830_v57  ;;  %v835_v27 = vshll.u32 %v834_v18, 16 }
 0x827   : > { %562 = vmax.xlane.f32.xlu0 %v1679_v60 }
 0x828   : > { %477 = vmax.xlane.f32.xlu1 %v1682_v62 }
 0x82b   : > { %661 = vmax.xlane.f32.xlu0 %v1695_v2 }
 0x82c   : > { %576 = vmax.xlane.f32.xlu1 %v1698_v4 }
 0x82f   : > { %760 = vmax.xlane.f32.xlu0 %v1706_v7 }
 0x830   : > { %675 = vmax.xlane.f32.xlu1 %v1708_v8 }
 0x834   : > { %774 = vmax.xlane.f32.xlu1 %v1713_v10 }
 0x8ac   : > { %v816_v15 = vpop.xlane.xlu0 %815 }
 0x8ad   : > { %v817_v17 = vcvt.f32.s32 %v816_v15 }
 0x8af   : > { %v820_v19 = vadd.s32 %v819_v16, %v817_v17 }
 0x8b0   : > { %v1719_v36 = vpop.xlane.xlu0 %463 }
 0x8b1   : > { %v837_v21 = vand.u32 4095, %v820_v19  ;;  %v841_v23 = vand.u32 4294963200, %v820_v19  ;;  %v832_v24 = vpop.xlane.xlu1 %831  ;;  %vm465_vm13 = vcmp.eq.f32.partialorder %v1662_v52, %v1719_v36  ;;  %v572_v52 = vand.u32 65535, %v1671_v58 }
 0x8b2   : > { %v833_v28 = vcvt.f32.s32 %v832_v24  ;;  %v659_v58 = vcvt.s32.f32 %v657_v47 }
 0x8b3   : > { %v1717_v30 = vsub.s32 255, %v837_v21  ;;  %vm843_vm7 = vcmp.ge.s32.totalorder %v841_v23, 0  ;;  %v845_v31 = vxor.u32 2147483647, %v841_v23 }
 0x8b4   : > { %v836_v35 = vadd.s32 %v835_v27, %v833_v28  ;;  %v1734_v51 = vpop.xlane.xlu0 %562 }
 0x8b5   : > { %v847_v12 = vsel %vm843_vm7, %v841_v23, %v845_v31  ;;  %vm851_vm8 = vcmp.eq.s32.totalorder %v1543_v13, %v1717_v30  ;;  %v1726_v54 = vpop.xlane.xlu1 %477  ;;  %vm564_vm15 = vcmp.eq.f32.partialorder %v1679_v60, %v1734_v51  ;;  %v671_v60 = vand.u32 65535, %v1690_v1 }
 0x8b6   : > { %v892_v44 = vsel %vm891_vm6, %v847_v12, %v1610_v22  ;;  %v838_v39 = vand.u32 4095, %v836_v35  ;;  %v842_v40 = vand.u32 4294963200, %v836_v35  ;;  %v1729_v42 = vsel %vm851_vm8, %v1621_v32, 2147483648 }
 0x8b7   : > { %896 = vst [vmem:[#allocation7] sm:$0xff] %v892_v44  ;;  %v856_v49 = vshra.s32 %v1729_v42, 16  ;;  %v459_v22 = vand.u32 65535, %v1632_v38  ;;  %v558_v38 = vand.u32 65535, %v1648_v46  ;;  %vm479_vm14 = vcmp.eq.f32.partialorder %v1682_v62, %v1726_v54 }
 0x8b8   : > { %v1731_v43 = vsub.s32 255, %v838_v39  ;;  %vm844_vm11 = vcmp.ge.s32.totalorder %v842_v40, 0  ;;  %v846_v45 = vxor.u32 2147483647, %v842_v40  ;;  %v1749_v9 = vpop.xlane.xlu0 %661  ;;  %v574_v62 = vcvt.s32.f32 %v572_v52 }
 0x8b9   : > { %v858_v32 = vcvt.s32.f32 %v856_v49  ;;  %v1743_v61 = vpop.xlane.xlu1 %576  ;;  %v461_v5 = vcvt.s32.f32 %v459_v22  ;;  %v560_v11 = vcvt.s32.f32 %v558_v38  ;;  %vm663_vm1 = vcmp.eq.f32.partialorder %v1695_v2, %v1749_v9 }
 0x8ba   : > { %v848_v50 = vsel %vm844_vm11, %v842_v40, %v846_v45  ;;  %vm852_vm12 = vcmp.eq.s32.totalorder %v1543_v13, %v1731_v43  ;;  %vm578_vm0 = vcmp.eq.f32.partialorder %v1698_v4, %v1743_v61  ;;  %v664_v19 = vsel %vm663_vm1, %v659_v58, -inf }
 0x8bb   : > { %v893_v53 = vsel %vm891_vm6, %v848_v50, %v1614_v25  ;;  %v854_v55 = vsel %vm852_vm12, %v1639_v41, 2147483648  ;;  %859 = vmax.xlane.f32.xlu0 %v858_v32  ;;  %v466_v25 = vsel %vm465_vm13, %v461_v5, -inf  ;;  %v475_v41 = vcvt.s32.f32 %v473_v63 }
 0x8bc   : > { %897 = vst [vmem:[#allocation7 + $0x8] sm:$0xff] %v893_v53  ;;  %v870_v57 = vshra.s32 %v854_v55, 16  ;;  %v565_v16 = vsel %vm564_vm15, %v560_v11, -inf  ;;  %v1764_v17 = vpop.xlane.xlu0 %760  ;;  %v579_v18 = vsel %vm578_vm0, %v574_v62, -inf  ;;  %v673_v4 = vcvt.s32.f32 %v671_v60 }
 0x8bd   : > { %v1757_v15 = vpop.xlane.xlu1 %675  ;;  %v480_v46 = vsel %vm479_vm14, %v475_v41, -inf  ;;  %vm762_vm4 = vcmp.eq.f32.partialorder %v1706_v7, %v1764_v17  ;;  %v770_v1 = vand.u32 65535, %v1703_v6  ;;  %v758_v2 = vcvt.s32.f32 %v756_v56 }
 0x8be   : > { %v872_v3 = vcvt.s32.f32 %v870_v57  ;;  %vm677_vm3 = vcmp.eq.f32.partialorder %v1708_v8, %v1757_v15  ;;  %v855_v8 = vand.u32 65535, %v1729_v42  ;;  %v869_v28 = vand.u32 65535, %v854_v55 }
 0x8bf   : > { %467 = vmax.xlane.f32.xlu0 %v466_v25  ;;  %v678_v23 = vsel %vm677_vm3, %v673_v4, -inf  ;;  %v763_v24 = vsel %vm762_vm4, %v758_v2, -inf  ;;  %v772_v0 = vcvt.s32.f32 %v770_v1  ;;  %v470_v7 = vcvt.f32.s32 %v1719_v36 }
 0x8c0   : > { %873 = vmax.xlane.f32.xlu1 %v872_v3  ;;  %v857_v35 = vcvt.s32.f32 %v855_v8  ;;  %v871_v44 = vcvt.s32.f32 %v869_v28  ;;  %v484_v39 = vcvt.f32.s32 %v1726_v54  ;;  %v1038_v42 = vadd.s32 4294967168, %v1628_v37 }
 0x8c1   : > { %v1769_v21 = vpop.xlane.xlu1 %774  ;;  %v471_v45 = vshll.u32 %v470_v7, 16  ;;  %v569_v49 = vcvt.f32.s32 %v1734_v51  ;;  %vm491_vm12 = vcmp.lt.s32.totalorder %v1617_v29, 128  ;;  %v1039_v22 = vadd.s32 4294967168, %v1625_v33 }
 0x8c2   : > { %vm776_vm7 = vcmp.eq.f32.partialorder %v1713_v10, %v1769_v21  ;;  %v1037_v10 = vadd.s32 4294967168, %v1617_v29  ;;  %vm492_vm13 = vcmp.lt.s32.totalorder %v1628_v37, 128  ;;  %v1040_v55 = vadd.s32 4294967168, %v1643_v26 }
 0x8c3   : > { %566 = vmax.xlane.f32.xlu0 %v565_v16  ;;  %v777_v27 = vsel %vm776_vm7, %v772_v0, -inf  ;;  %v485_v57 = vshll.u32 %v484_v39, 16  ;;  %v583_v63 = vcvt.f32.s32 %v1743_v61  ;;  %v668_v51 = vcvt.f32.s32 %v1749_v9 }
 0x8c4   : > { %481 = vmax.xlane.f32.xlu1 %v480_v46  ;;  %v489_v53 = vadd.s32 %v1037_v10, %v1545_v14  ;;  %v570_v38 = vshll.u32 %v569_v49, 16  ;;  %v490_v25 = vadd.s32 %v1038_v42, %v1545_v14  ;;  %v588_v11 = vadd.s32 %v1039_v22, %v1545_v14 }
 0x8c5   : > { %vm590_vm14 = vcmp.lt.s32.totalorder %v1625_v33, 128  ;;  %vm591_vm15 = vcmp.lt.s32.totalorder %v1643_v26, 128  ;;  %v682_v47 = vcvt.f32.s32 %v1757_v15  ;;  %v589_v61 = vadd.s32 %v1040_v55, %v1545_v14 }
 0x8c6   : > { %v1041_v16 = vadd.s32 4294967168, %v1636_v20  ;;  %v584_v62 = vshll.u32 %v583_v63, 16  ;;  %v669_v60 = vshll.u32 %v668_v51, 16  ;;  %vm689_vm0 = vcmp.lt.s32.totalorder %v1636_v20, 128 }
 0x8c7   : > { %665 = vmax.xlane.f32.xlu0 %v664_v19  ;;  %v767_v19 = vcvt.f32.s32 %v1764_v17  ;;  %v1043_v17 = vadd.s32 4294967168, %v1655_v48  ;;  %v781_v8 = vcvt.f32.s32 %v1769_v21  ;;  %vm789_vm1 = vcmp.lt.s32.totalorder %v1677_v59, 128 }
 0x8c8   : > { %580 = vmax.xlane.f32.xlu1 %v579_v18  ;;  %v687_v37 = vadd.s32 %v1041_v16, %v1545_v14 }
 0x8c9   : > { %v768_v20 = vshll.u32 %v767_v19, 16  ;;  %v786_v26 = vadd.s32 %v1043_v17, %v1545_v14 }
 0x8cb   : > { %764 = vmax.xlane.f32.xlu0 %v763_v24  ;;  %v683_v24 = vshll.u32 %v682_v47, 16 }
 0x8cc   : > { %679 = vmax.xlane.f32.xlu1 %v678_v23  ;;  %v1042_v23 = vadd.s32 4294967168, %v1659_v34 }
 0x8ce   : > { %v688_v42 = vadd.s32 %v1042_v23, %v1545_v14 }
 0x8d0   : > { %778 = vmax.xlane.f32.xlu1 %v777_v27 }
 0x948   : > { %v1777_v31 = vpop.xlane.xlu0 %859 }
 0x949   : > { %vm861_vm8 = vcmp.eq.f32.partialorder %v858_v32, %v1777_v31 }
 0x94a   : > { %v862_v6 = vsel %vm861_vm8, %v857_v35, -inf }
 0x94b   : > { %863 = vmax.xlane.f32.xlu0 %v862_v6 }
 0x94c   : > { %v468_v40 = vpop.xlane.xlu0 %467 }
 0x94d   : > { %v1781_v12 = vpop.xlane.xlu1 %873  ;;  %v469_v36 = vcvt.f32.s32 %v468_v40 }
 0x94e   : > { %vm875_vm11 = vcmp.eq.f32.partialorder %v872_v3, %v1781_v12 }
 0x94f   : > { %v876_v50 = vsel %vm875_vm11, %v871_v44, -inf  ;;  %v472_v32 = vadd.s32 %v471_v45, %v469_v36  ;;  %v1044_v45 = vadd.s32 4294967168, %v1677_v59 }
 0x950   : > { %877 = vmax.xlane.f32.xlu1 %v876_v50  ;;  %v567_v5 = vpop.xlane.xlu0 %566  ;;  %v782_v50 = vshll.u32 %v781_v8, 16 }
 0x951   : > { %v482_v54 = vpop.xlane.xlu1 %481  ;;  %v493_v29 = vsel %vm491_vm12, %v472_v32, %v489_v53  ;;  %v568_v41 = vcvt.f32.s32 %v567_v5  ;;  %v880_v5 = vcvt.f32.s32 %v1781_v12 }
 0x952   : > { %v483_v3 = vcvt.f32.s32 %v482_v54  ;;  %v498_v33 = vsel %vm495_vm9, %v493_v29, 0 }
 0x953   : > { %v571_v46 = vadd.s32 %v570_v38, %v568_v41  ;;  %v1046_v41 = vadd.s32 4294967168, %v1731_v43  ;;  %v881_v59 = vshll.u32 %v880_v5, 16 }
 0x954   : > { %v486_v52 = vadd.s32 %v485_v57, %v483_v3  ;;  %v666_v18 = vpop.xlane.xlu0 %665  ;;  %v787_v57 = vadd.s32 %v1044_v45, %v1545_v14  ;;  %v866_v3 = vcvt.f32.s32 %v1777_v31 }
 0x955   : > { %v581_v9 = vpop.xlane.xlu1 %580  ;;  %v592_v4 = vsel %vm590_vm14, %v571_v46, %v588_v11  ;;  %v667_v15 = vcvt.f32.s32 %v666_v18  ;;  %v886_v31 = vadd.s32 %v1046_v41, %v1545_v14 }
 0x956   : > { %v494_v58 = vsel %vm492_vm13, %v486_v52, %v490_v25  ;;  %v582_v56 = vcvt.f32.s32 %v581_v9  ;;  %v597_v1 = vsel %vm594_vm10, %v592_v4, %v498_v33  ;;  %v867_v29 = vshll.u32 %v866_v3, 16 }
 0x957   : > { %v670_v0 = vadd.s32 %v669_v60, %v667_v15  ;;  %v499_v28 = vsel %vm495_vm9, %v494_v58, 0  ;;  %vm690_vm9 = vcmp.lt.s32.totalorder %v1659_v34, 128 }
 0x958   : > { %v585_v2 = vadd.s32 %v584_v62, %v582_v56  ;;  %v765_v6 = vpop.xlane.xlu0 %764 }
 0x959   : > { %v680_v27 = vpop.xlane.xlu1 %679  ;;  %v691_v44 = vsel %vm689_vm0, %v670_v0, %v687_v37  ;;  %v766_v39 = vcvt.f32.s32 %v765_v6 }
 0x95a   : > { %v593_v35 = vsel %vm591_vm15, %v585_v2, %v589_v61  ;;  %v681_v7 = vcvt.f32.s32 %v680_v27  ;;  %v696_v40 = vsel %vm693_vm5, %v691_v44, %v597_v1 }
 0x95b   : > { %v598_v10 = vsel %vm594_vm10, %v593_v35, %v499_v28  ;;  %v769_v49 = vadd.s32 %v768_v20, %v766_v39  ;;  %vm788_vm10 = vcmp.lt.s32.totalorder %v1655_v48, 128  ;;  %v1045_v48 = vadd.s32 4294967168, %v1717_v30 }
 0x95c   : > { %v684_v21 = vadd.s32 %v683_v24, %v681_v7 }
 0x95d   : > { %v779_v36 = vpop.xlane.xlu1 %778  ;;  %v790_v54 = vsel %vm788_vm10, %v769_v49, %v786_v26  ;;  %v885_v52 = vadd.s32 %v1045_v48, %v1545_v14 }
 0x95e   : > { %v692_v22 = vsel %vm690_vm9, %v684_v21, %v688_v42  ;;  %v780_v53 = vcvt.f32.s32 %v779_v36  ;;  %v795_v55 = vsel %vm792_vm2, %v790_v54, %v696_v40 }
 0x95f   : > { %v697_v32 = vsel %vm693_vm5, %v692_v22, %v598_v10  ;;  %vm887_vm5 = vcmp.lt.s32.totalorder %v1717_v30, 128 }
 0x960   : > { %v783_v63 = vadd.s32 %v782_v50, %v780_v53 }
 0x962   : > { %v791_v34 = vsel %vm789_vm1, %v783_v63, %v787_v57 }
 0x963   : > { %v796_v51 = vsel %vm792_vm2, %v791_v34, %v697_v32  ;;  %vm888_vm2 = vcmp.lt.s32.totalorder %v1731_v43, 128 }
 0x9d8   : > { %v864_v38 = vpop.xlane.xlu0 %863 }
 0x9d9   : > { %v865_v25 = vcvt.f32.s32 %v864_v38 }
 0x9db   : > { %v868_v11 = vadd.s32 %v867_v29, %v865_v25 }
 0x9dd   : > { %v878_v47 = vpop.xlane.xlu1 %877  ;;  %v889_v61 = vsel %vm887_vm5, %v868_v11, %v885_v52 }
 0x9de   : > { %v879_v46 = vcvt.f32.s32 %v878_v47  ;;  %v894_v9 = vsel %vm891_vm6, %v889_v61, %v795_v55 }
 0x9df   : > { %898 = vst [vmem:[#allocation8] sm:$0xff] %v894_v9 }
 0x9e0   : > { %v882_v12 = vadd.s32 %v881_v59, %v879_v46 }
 0x9e2   : > { %v890_v16 = vsel %vm888_vm2, %v882_v12, %v886_v31 }
 0x9e3   : > { %v895_v62 = vsel %vm891_vm6, %v890_v16, %v796_v51 }
 0x9e4   : > { %899 = vst [vmem:[#allocation8 + $0x8] sm:$0xff] %v895_v62 }
 0x9e5 PF: > { %p1849_p4 = scmp.eq.s32.totalorder %s1016_s18, 2  ;;  %s1364_s21 = smov [#allocation7]  }
 0x9e6   : > { %s909_s7 = sshll.u32 %s1364_s21, 4  ;;  %s910_s7 = int_to_ptr.vmem [resolvable:$true] %s909_s7 }
 0x9e7   : > { %s1240_s8 = scalar_lea.vmem %s910_s7, 256  ;;  %p1247_p10 = scmp.lt.s32.totalorder %s910_s7, %s910_s7 }
 0x9e8   : > { %p1241_p5 = scmp.ne.s32.totalorder %s910_s7, %s1240_s8  ;;  %p1248_p11 = scmp.lt.s32.totalorder %s1240_s8, %s1240_s8 }
 0x9ea   : > { %p1242_p8 = pnand %p1241_p5, %p1849_p4  ;;  %p1249_p13 = por %p1248_p11, %p1247_p10 }
 0x9ec   : > { %p1243_p9 = pneg %p1242_p8 }
 0x9ee   : > { %p1250_p2 = pnand %p1249_p13, %p1243_p9 }
 0x9f0   : > { %1253 = shalt.err (!%p1250_p2)
}
 0x9f1   : > { %s1254_s18 = scalar_lea.hbm %s1917_s2, 256 }
 0x9f2   : > { %p1255_p3 = scmp.ne.s32.totalorder %s1917_s2, %s1254_s18  ;;  %p1260_p6 = scmp.lt.u32.totalorder %s1254_s18, %s1917_s2 }
 0x9f4   : > { %p1256_p12 = pnand %p1255_p3, %p1849_p4 }
 0x9f6   : > { %p1257_p0 = pneg %p1256_p12 }
 0x9f8   : > { %p1262_p7 = pnand %p1260_p6, %p1257_p0 }
 0x9fa   : > { %1265 = shalt.err (!%p1262_p7)
}
 0x9fb   : > { %s1365_s22 = smov 128   ;;  %s1366_s28 = smov 8  }
 0x9fc   : > { %1092 = dma.vmem_to_hbm [thread:$0]  (%p1849_p4), %s910_s7, 256, %s1917_s2, [#allocation4], %s1365_s22, %s1365_s22, %s1366_s28  }
 0x9fd   : > { %s1367_s9 = smov [#allocation8]  }
 0x9fe   : > { %s925_s5 = sshll.u32 %s1367_s9, 4  ;;  %s926_s5 = int_to_ptr.vmem [resolvable:$true] %s925_s5 }
 0x9ff   : > { %s1266_s10 = scalar_lea.vmem %s926_s5, 256  ;;  %p1273_p9 = scmp.lt.s32.totalorder %s926_s5, %s926_s5 }
 0xa00   : > { %p1267_p1 = scmp.ne.s32.totalorder %s926_s5, %s1266_s10  ;;  %p1274_p10 = scmp.lt.s32.totalorder %s1266_s10, %s1266_s10 }
 0xa02   : > { %p1268_p5 = pnand %p1267_p1, %p1849_p4  ;;  %p1275_p11 = por %p1274_p10, %p1273_p9 }
 0xa04   : > { %p1269_p8 = pneg %p1268_p5 }
 0xa06   : > { %p1276_p13 = pnand %p1275_p11, %p1269_p8 }
 0xa08   : > { %1279 = shalt.err (!%p1276_p13)
}
 0xa09   : > { %s1280_s15 = scalar_lea.hbm %s1918_s3, 256 }
 0xa0a   : > { %p1281_p2 = scmp.ne.s32.totalorder %s1918_s3, %s1280_s15  ;;  %p1286_p0 = scmp.lt.u32.totalorder %s1280_s15, %s1918_s3 }
 0xa0c   : > { %p1282_p3 = pnand %p1281_p2, %p1849_p4 }
 0xa0e   : > { %p1283_p12 = pneg %p1282_p3 }
 0xa10   : > { %p1288_p6 = pnand %p1286_p0, %p1283_p12 }
 0xa12   : > { %1291 = shalt.err (!%p1288_p6)
}
 0xa13   : > { %1094 = dma.vmem_to_hbm [thread:$0]  (%p1849_p4), %s926_s5, 256, %s1918_s3, [#allocation9], %s1365_s22, %s1365_s22, %s1366_s28  }
 0xa14   : > { %1325 = dma.done.wait (%p1849_p4), [#allocation4], 256  }
 0xa15   : > { %1327 = vsyncadd (%p1849_p4), [#allocation4], 4294967040 }
 0xa16   : > { %1329 = dma.done.wait (%p1849_p4), [#allocation9], 256  }
 0xa17   : > { %1331 = vsyncadd (%p1849_p4), [#allocation9], 4294967040 }
 0xa18 PF: > { %s20_s17 = sadd.s32 1, %s1354_s17   ;;  %s1932_s12 = smov %s1338_s13 }
 0xa19   : > { %p17_p7 = scmp.ge.s32.totalorder %s20_s17, 5   ;;  %s1933_s13 = smov %s1342_s14 }
 0xa1a   : > { %s1934_s14 = smov %s1476_s27  ;;  %s1935_s15 = smov %s1350_s16 }
 0xa1b   : > { %s1936_s16 = smov %s1938_s25  ;;  %19 = sbr.rel (!%p17_p7) target bundleno = 7 (0x7), region = 89 }
 0xa22   :  { %945 = vsyncpa [#allocation3], 1 }
 0xa23   :  { %947 = vsyncpa [#allocation3 + $0x1], 1 }
 0xa24   :  { %948 = vsyncpa [#allocation6], 1 }
 0xa25   :  { %950 = vsyncpa [#allocation6 + $0x1], 1 }
 0xa26   :  { %951 = vsyncpa [#allocation4], 1 }
 0xa27   :  { %953 = vsyncpa [#allocation4 + $0x1], 1 }
 0xa28   :  { %954 = vsyncpa [#allocation9], 1 }

// kernel: tpu_custom_call.1
= control target key start
LH: loop header
LB: loop body
LE: loop exit
PB: predicated region body
PF: predicated region fallthrough
CT: control target
= control target key end

     0   :  { %9 = vsyncpa [#allocation3], 0  ;;  %s1907_s0 = inlined_call_operand.hbm [shape: bf16[16,128], index: 0, kind: input, shape index: {}]   ;;  %s1908_s1 = inlined_call_operand.hbm [shape: bf16[384,128], index: 1, kind: input, shape index: {}]   ;;  %s1909_s2 = inlined_call_operand.hbm [shape: f32[16,128], index: 2, kind: output, shape index: {0}]   ;;  %s1910_s3 = inlined_call_operand.hbm [shape: s32[16,128], index: 3, kind: output, shape index: {1}]  }
   0x1   :  { %10 = vsyncpa [#allocation6], 0 }
   0x2   :  { %12 = vsyncpa [#allocation6 + $0x1], 0 }
   0x3   :  { %13 = vsyncpa [#allocation4], 0 }
   0x4   :  { %14 = vsyncpa [#allocation9], 0  ;;  %s1363_s12 = smov 0   ;;  %s1365_s13 = smov 0  }
   0x5   :  { %s1367_s14 = smov 0   ;;  %s1369_s15 = smov 0  }
   0x6   :  { %s1371_s16 = smov 0   ;;  %s1373_s17 = smov 0  }
   0x7 LB: > { %s993_s18 = sadd.s32 4294967295, %s1329_s17   ;;  %p78_p0 = scmp.ne.s32.totalorder %s1313_s13, %s1309_s12  ;;  %s1329_s17 = sphi %s1373_s17, %s20_s17   ;;  %s1325_s16 = sphi %s1371_s16, %s1928_s16   ;;  %s1321_s15 = sphi %s1369_s15, %s1927_s15   ;;  %s1317_s14 = sphi %s1367_s14, %s1926_s14   ;;  %s1313_s13 = sphi %s1365_s13, %s1925_s13   ;;  %s1309_s12 = sphi %s1363_s12, %s1924_s12  }
   0x8   : > { %p1395_p1 = scmp.eq.s32.totalorder %s993_s18, 0  ;;  %p994_p2 = scmp.ge.s32.totalorder %s1329_s17, 1 }
   0x9   : > { %p141_p3 = scmp.lt.s32.totalorder %s1329_s17, 4  ;;  %s1331_s22 = smov [#allocation2]  }
   0xa   : > { %s1915_s19 = scalar_select %p1395_p1, 1, 0 }
   0xb   : > { %p1403_p4 = por %p1395_p1, %p78_p0  ;;  %p1407_p5 = pnand %p994_p2, %p141_p3 }
   0xc   : > { %s156_s23 = sshll.u32 %s1331_s22, 4  ;;  %s29_s25 = sadd.s32 1, %s1325_s16  ;;  %s157_s23 = int_to_ptr.vmem [resolvable:$true] %s156_s23 }
   0xd   : > { %s1916_s20 = scalar_select %p1403_p4, 1, 0 }
   0xe   : > { %s1917_s21 = scalar_select %p1407_p5, 1, 0 }
   0xf   : > { %p1074_p6 = pneg %p1407_p5  ;;  %s1157_s28 = scalar_lea.hbm %s1907_s0, 128 }
  0x10   : > { %p1158_p8 = scmp.ne.s32.totalorder %s1907_s0, %s1157_s28  ;;  %p1164_p12 = scmp.lt.u32.totalorder %s1157_s28, %s1907_s0 }
  0x11   : > { %p1415_p7 = pnand %p1074_p6, %p1395_p1 }
  0x13   : > { %p1159_p9 = pneg %p1415_p7 }
  0x15   : > { %p1160_p10 = pnand %p1159_p9, %p1158_p8 }
  0x17   : > { %p1161_p11 = pneg %p1160_p10 }
  0x19   : > { %p1166_p13 = pnand %p1164_p12, %p1161_p11 }
  0x1b   : > { %1169 = shalt.err (!%p1166_p13)
}
  0x1c   : > { %s1170_s6 = scalar_lea.vmem %s157_s23, 128  ;;  %p1178_p6 = scmp.lt.s32.totalorder %s157_s23, %s157_s23 }
  0x1d   : > { %p1171_p0 = scmp.ne.s32.totalorder %s157_s23, %s1170_s6  ;;  %p1179_p4 = scmp.lt.s32.totalorder %s1170_s6, %s1170_s6 }
  0x1f   : > { %p1173_p2 = pnand %p1171_p0, %p1159_p9  ;;  %p1180_p1 = por %p1179_p4, %p1178_p6 }
  0x21   : > { %p1174_p3 = pneg %p1173_p2 }
  0x23   : > { %p1181_p5 = pnand %p1180_p1, %p1174_p3 }
  0x25   : > { %1184 = shalt.err (!%p1181_p5)
}
  0x26   : > { %s1332_s7 = smov 64   ;;  %s1333_s8 = smov 4  }
  0x27   : > { %1077 = dma.hbm_to_vmem [thread:$0]  (!%p1415_p7), %s1907_s0, 128, %s157_s23, [#allocation3], %s1332_s7, %s1332_s7, %s1333_s8  }
  0x28   : > { %p30_p1 = scmp.ge.s32.totalorder %s29_s25, 3  ;;  %s65_s11 = sadd.s32 1, %s1317_s14 }
  0x29   : > { %p72_p4 = scmp.ne.s32.totalorder %s1317_s14, %s1313_s13  ;;  %p73_p5 = scmp.eq.s32.totalorder %s1329_s17, 0 }
  0x2a   : > { %s1930_s25 = smov (%p30_p1, %s29_s25), 0  ;;  %p1083_p9 = scmp.lt.s32.totalorder %s1329_s17, 3 }
  0x2b   : > { %p74_p8 = por %p73_p5, %p72_p4  ;;  %s62_s12 = ssub.s32 %s1325_s16, %s1930_s25 }
  0x2c   : > { %s170_s22 = sand.u32 1, %s1317_s14   ;;  %p63_p10 = scmp.eq.s32.totalorder %s62_s12, 0 }
  0x2d   : > { %s997_s24 = sshll.u32 %s170_s22, 6  ;;  %s1030_s26 = sshll.u32 %s1325_s16, 10 }
  0x2e   : > { %s1451_s27 = scalar_select %p63_p10, %s1317_s14, %s65_s11  }
  0x2f   : > { %s1456_s23 = scalar_lea.hbm %s1908_s1, %s1030_s26  ;;  %s174_s30 = scalar_lea.vmem [#allocation5], %s997_s24 }
  0x30   : > { %s181_s4 = sshll.u32 %s174_s30, 4  ;;  %p1458_p7 = pnand %p1083_p9, %p74_p8  ;;  %s1462_s4 = int_to_ptr.vmem [resolvable:$true] %s181_s4 }
  0x31   : > { %s1464_s6 = scalar_lea.sflag [#allocation6], %s170_s22  ;;  %s1185_s9 = scalar_lea.hbm %s1456_s23, 1024 }
  0x32   : > { %p1186_p11 = scmp.ne.s32.totalorder %s1456_s23, %s1185_s9  ;;  %p1187_p12 = pneg %p1458_p7 }
  0x33   : > { %s1190_s12 = scalar_lea.hbm %s1908_s1, 3072  ;;  %p1191_p2 = scmp.lt.u32.totalorder %s1456_s23, %s1908_s1 }
  0x34   : > { %p1188_p13 = pnand %p1187_p12, %p1186_p11  ;;  %p1192_p3 = scmp.lt.u32.totalorder %s1190_s12, %s1185_s9 }
  0x35   : > { %p1194_p1 = scmp.lt.u32.totalorder %s1185_s9, %s1456_s23 }
  0x36   : > { %p1189_p0 = pneg %p1188_p13  ;;  %p1193_p6 = por %p1192_p3, %p1191_p2 }
  0x38   : > { %p1195_p4 = por %p1194_p1, %p1193_p6 }
  0x3a   : > { %p1196_p5 = pnand %p1195_p4, %p1189_p0 }
  0x3c   : > { %1199 = shalt.err (!%p1196_p5)
}
  0x3d   : > { %s1200_s22 = scalar_lea.vmem %s1462_s4, 1024  ;;  %s1334_s28 = smov [#allocation5]  }
  0x3e   : > { %p1201_p8 = scmp.ne.s32.totalorder %s1462_s4, %s1200_s22  ;;  %s1205_s29 = sshll.u32 %s1334_s28, 4  ;;  %s1206_s29 = int_to_ptr.vmem [resolvable:$false] %s1205_s29 }
  0x3f   : > { %s1207_s30 = scalar_lea.vmem %s1206_s29, 2048  ;;  %p1208_p11 = scmp.lt.s32.totalorder %s1462_s4, %s1206_s29 }
  0x40   : > { %p1203_p9 = pnand %p1201_p8, %p1187_p12  ;;  %p1209_p13 = scmp.lt.s32.totalorder %s1207_s30, %s1200_s22 }
  0x42   : > { %p1204_p10 = pneg %p1203_p9  ;;  %p1210_p2 = por %p1209_p13, %p1208_p11 }
  0x44   : > { %p1211_p3 = pnand %p1210_p2, %p1204_p10 }
  0x46   : > { %1214 = shalt.err (!%p1211_p3)
}
  0x47   : > { %1081 = dma.hbm_to_vmem [thread:$0]  (!%p1458_p7), %s1456_s23, 1024, %s1462_s4, %s1464_s6, %s1332_s7, %s1332_s7, %s1333_s8  }
  0x48   : > { %p1920_p12 = scmp.ne.s32.totalorder %s1917_s21, 0 }
  0x49   : > { %p1921_p0 = scmp.ne.s32.totalorder (!%p1920_p12), %s1915_s19, 0 }
  0x4a   : > { %193 = sbr.rel (%p1920_p12) target bundleno = 2191 (0x88f), region = 28 }
  0x51   : > { %1292 = dma.done.wait (%p1921_p0), [#allocation3], 128  }
  0x52   : > { %1294 = vsyncadd (%p1921_p0), [#allocation3], 4294967168  ;;  %s199_s9 = sand.u32 1, %s1313_s13   ;;  %p1922_p6 = scmp.ne.s32.totalorder %s1916_s20, 0 }
  0x53   : > { %s1002_s5 = sshll.u32 %s199_s9, 6  ;;  %s200_s10 = scalar_lea.sflag [#allocation6], %s199_s9 }
  0x54   : > { %s1502_s11 = scalar_lea.vmem [#allocation5], %s1002_s5 }
  0x55   : > { %1296 = dma.done.wait (%p1922_p6), %s200_s10, 1024  }
  0x56   : > { %1298 = vsyncadd (%p1922_p6), %s200_s10, 4294966272  ;;  %p1003_p7 = scmp.ne.s32.totalorder %s1321_s15, 0 }
  0x57   : > { %v1335_v0 = vmov (!%p1003_p7), -inf   ;;  %v1336_v1 = vmov (!%p1003_p7), 0  }
  0x58   : > { %229 = sbr.rel (%p1003_p7) target bundleno = 95 (0x5f), region = 40  ;;  %230 = vst [vmem:[#allocation7] sm:$0xff] (!%p1003_p7), %v1335_v0  ;;  %231 = vst [vmem:[#allocation7 + $0x8] sm:$0xff] (!%p1003_p7), %v1335_v0 }
  0x59   : > { %232 = vst [vmem:[#allocation8] sm:$0xff] (!%p1003_p7), %v1336_v1  ;;  %233 = vst [vmem:[#allocation8 + $0x8] sm:$0xff] (!%p1003_p7), %v1336_v1 }
  0x5f PF: > { %v1148_v2 = vld [vmem:[%s1502_s11] sm:$0xff]   ;;  %v1337_v3 = vmov 0.0   ;;  %vm1338_vm0 = vmmov 0   ;;  %v1149_v4 = vld [vmem:[%s1502_s11 + $0x8] sm:$0xff]   ;;  %v1150_v5 = vld [vmem:[%s1502_s11 + $0x10] sm:$0xff]   ;;  %v347_v12 = vlaneseq  ;;  %s1013_s19 = sshll.u32 %s1321_s15, 7 }
  0x60   : > { %1040 = vmatprep.subr.bf16.mxu0 %v1337_v3  ;;  %1056 = vmatprep.mubr.msk.bf16.mxu0 %vm1338_vm0, %v1337_v3  ;;  %v1151_v6 = vld [vmem:[%s1502_s11 + $0x18] sm:$0xff]   ;;  %v1152_v7 = vld [vmem:[%s1502_s11 + $0x20] sm:$0xff]   ;;  %v1153_v8 = vld [vmem:[%s1502_s11 + $0x28] sm:$0xff]   ;;  %v1520_v14 = vstv %s1013_s19  ;;  %p1823_p1 = scmp.eq.s32.totalorder %s993_s18, 2  ;;  %s1339_s20 = smov [#allocation7]  }
  0x61   : > { %1041 = vmatpush3.bf16.xpose.msra.mxu0 %v1148_v2  ;;  %v1154_v9 = vld [vmem:[%s1502_s11 + $0x30] sm:$0xff]   ;;  %v1155_v10 = vld [vmem:[%s1502_s11 + $0x38] sm:$0xff]   ;;  %v1518_v13 = vand.u32 127, %v347_v12  ;;  %v355_v15 = vld [vmem:[#allocation7] sm:$0xff]  ;;  %s886_s21 = sshll.u32 %s1339_s20, 4  ;;  %s887_s21 = int_to_ptr.vmem [resolvable:$true] %s886_s21 }
  0x62   : > { %1042 = vmatprep.subr.bf16.mxu0 %v1337_v3  ;;  %v1156_v11 = vld [vmem:[#allocation2] sm:$0xff]   ;;  %v356_v16 = vld [vmem:[#allocation7 + $0x8] sm:$0xff]  ;;  %v370_v18 = vxor.u32 2147483647, %v355_v15  ;;  %vm366_vm1 = vcmp.ge.s32.totalorder %v355_v15, 0  ;;  %s1215_s7 = scalar_lea.vmem %s887_s21, 256  ;;  %p1222_p9 = scmp.lt.s32.totalorder %s887_s21, %s887_s21 }
  0x63   : > { %v351_v17 = vadd.s32 %v1520_v14, %v1518_v13  ;;  %v372_v19 = vxor.u32 2147483647, %v356_v16  ;;  %vm368_vm2 = vcmp.ge.s32.totalorder %v356_v16, 0  ;;  %v359_v21 = vadd.s32 128, %v1518_v13  ;;  %p1216_p4 = scmp.ne.s32.totalorder %s887_s21, %s1215_s7  ;;  %p1223_p10 = scmp.lt.s32.totalorder %s1215_s7, %s1215_s7 }
  0x64   : > { %v374_v20 = vsel %vm366_vm1, %v355_v15, %v370_v18  ;;  %v360_v26 = vsub.s32 255, %v1518_v13 }
  0x65   : > { %vm352_vm3 = vcmp.lt.s32.totalorder %v351_v17, 320  ;;  %v376_v23 = vsel %vm368_vm2, %v356_v16, %v372_v19  ;;  %v378_v27 = vand.u32 4294963200, %v374_v20  ;;  %v361_v30 = vsub.s32 255, %v359_v21  ;;  %p1217_p5 = pnand %p1216_p4, %p1823_p1  ;;  %p1224_p11 = por %p1223_p10, %p1222_p9 }
  0x66   : > { %v380_v33 = vand.u32 4294963200, %v376_v23 }
  0x67   : > { %v382_v37 = vor.u32 %v378_v27, %v360_v26  ;;  %p1218_p8 = pneg %p1217_p5 }
  0x68   : > { %v384_v41 = vor.u32 %v380_v33, %v360_v26 }
  0x69   : > { %1043 = vmatpush3.bf16.xpose.msra.mxu0 %v1149_v4  ;;  %p1225_p13 = pnand %p1224_p11, %p1218_p8 }
  0x6a   : > { %1044 = vmatprep.subr.bf16.mxu0 %v1337_v3 }
  0x71   : > { %1045 = vmatpush3.bf16.xpose.msra.mxu0 %v1150_v5 }
  0x72   : > { %1046 = vmatprep.subr.bf16.mxu0 %v1337_v3 }
  0x79   : > { %1047 = vmatpush3.bf16.xpose.msra.mxu0 %v1151_v6 }
  0x7a   : > { %1048 = vmatprep.subr.bf16.mxu0 %v1337_v3 }
  0x81   : > { %1049 = vmatpush3.bf16.xpose.msra.mxu0 %v1152_v7 }
  0x82   : > { %1050 = vmatprep.subr.bf16.mxu0 %v1337_v3 }
  0x89   : > { %1051 = vmatpush3.bf16.xpose.msra.mxu0 %v1153_v8 }
  0x8a   : > { %1052 = vmatprep.subr.bf16.mxu0 %v1337_v3 }
  0x91   : > { %1053 = vmatpush3.bf16.xpose.msra.mxu0 %v1154_v9 }
  0x92   : > { %1054 = vmatprep.subr.bf16.mxu0 %v1337_v3 }
  0x99   : > { %1055 = vmatpush3.bf16.xpose.msra.mxu0 %v1155_v10 }
  0xa0   : > { %1057 = vmatmul.mubr.bf16.vlgmr.msra.gmra.mrb[0].mxu0 %v1156_v11 }
 0x173   : > { %v340_v22 = vpop.f32.mrb[0].mxu0 }
 0x174   : > { %v353_v24 = vsel %vm352_vm3, %v340_v22, -inf  ;;  %v1058_v25 = vpop.f32.mrb[1].mxu0 }
 0x175   : > { %vm367_vm4 = vcmp.ge.s32.totalorder %v353_v24, 0  ;;  %v371_v28 = vxor.u32 2147483647, %v353_v24  ;;  %v343_v29 = vpop.f32.mrb[2].mxu0 }
 0x176   : > { %v354_v31 = vsel %vm352_vm3, %v343_v29, -inf  ;;  %v1059_v32 = vpop.f32.mrb[3].mxu0 }
 0x177   : > { %v375_v34 = vsel %vm367_vm4, %v353_v24, %v371_v28  ;;  %vm369_vm5 = vcmp.ge.s32.totalorder %v354_v31, 0  ;;  %v373_v35 = vxor.u32 2147483647, %v354_v31 }
 0x178   : > { %v379_v36 = vand.u32 4294963200, %v375_v34 }
 0x179   : > { %v377_v38 = vsel %vm369_vm5, %v354_v31, %v373_v35 }
 0x17a   : > { %v383_v39 = vor.u32 %v379_v36, %v361_v30  ;;  %v381_v40 = vand.u32 4294963200, %v377_v38 }
 0x17c   : > { %v385_v42 = vor.u32 %v381_v40, %v361_v30  ;;  %vm386_vm6 = vcmp.gt.s32.totalorder %v382_v37, %v383_v39 }
 0x17d   : > { %v387_v43 = vsel %vm386_vm6, %v382_v37, %v383_v39 }
 0x17e   : > { %v389_v44 = vshra.s32 %v387_v43, 16  ;;  %vm402_vm7 = vcmp.gt.s32.totalorder %v384_v41, %v385_v42  ;;  %v388_v49 = vand.u32 65535, %v387_v43 }
 0x17f   : > { %v403_v45 = vsel %vm402_vm7, %v384_v41, %v385_v42  ;;  %vm472_vm7 = vcmp.eq.s32.totalorder %v1518_v13, 0 }
 0x180   : > { %v391_v46 = vcvt.s32.f32 %v389_v44  ;;  %v405_v47 = vshra.s32 %v403_v45, 16  ;;  %v390_v51 = vcvt.s32.f32 %v388_v49  ;;  %v404_v52 = vand.u32 65535, %v403_v45 }
 0x182   : > { %392 = vmax.xlane.f32.xlu0 %v391_v46  ;;  %v407_v48 = vcvt.s32.f32 %v405_v47  ;;  %v406_v55 = vcvt.s32.f32 %v404_v52 }
 0x186   : > { %408 = vmax.xlane.f32.xlu0 %v407_v48 }
 0x20f   : > { %v393_v50 = vpop.xlane.xlu0 %392 }
 0x210   : > { %vm394_vm8 = vcmp.eq.f32.partialorder %v391_v46, %v393_v50  ;;  %v399_v57 = vcvt.f32.s32 %v393_v50 }
 0x211   : > { %v395_v53 = vsel %vm394_vm8, %v390_v51, -inf }
 0x212   : > { %396 = vmax.xlane.f32.xlu1 %v395_v53  ;;  %v400_v59 = vshll.u32 %v399_v57, 16 }
 0x213   : > { %v409_v54 = vpop.xlane.xlu0 %408 }
 0x214   : > { %vm410_vm9 = vcmp.eq.f32.partialorder %v407_v48, %v409_v54  ;;  %v415_v60 = vcvt.f32.s32 %v409_v54 }
 0x215   : > { %v411_v56 = vsel %vm410_vm9, %v406_v55, -inf }
 0x216   : > { %412 = vmax.xlane.f32.xlu1 %v411_v56  ;;  %v416_v0 = vshll.u32 %v415_v60, 16 }
 0x29f   : > { %v397_v58 = vpop.xlane.xlu1 %396 }
 0x2a0   : > { %v398_v61 = vcvt.f32.s32 %v397_v58 }
 0x2a2   : > { %v1526_v62 = vadd.s32 %v400_v59, %v398_v61 }
 0x2a3   : > { %v413_v63 = vpop.xlane.xlu1 %412 }
 0x2a4   : > { %v414_v1 = vcvt.f32.s32 %v413_v63  ;;  %vm477_vm10 = vcmp.eq.s32.totalorder %v382_v37, %v1526_v62  ;;  %vm478_vm11 = vcmp.eq.s32.totalorder %v383_v39, %v1526_v62  ;;  %v422_v28 = vand.u32 4294963200, %v1526_v62 }
 0x2a5   : > { %v481_v2 = vsel %vm477_vm10, 2147483648, %v382_v37  ;;  %v482_v3 = vsel %vm478_vm11, 2147483648, %v383_v39 }
 0x2a6   : > { %v1530_v4 = vadd.s32 %v416_v0, %v414_v1  ;;  %vm485_vm12 = vcmp.gt.s32.totalorder %v481_v2, %v482_v3  ;;  %v426_v37 = vxor.u32 2147483647, %v422_v28  ;;  %vm424_vm5 = vcmp.ge.s32.totalorder %v422_v28, 0 }
 0x2a7   : > { %v486_v5 = vsel %vm485_vm12, %v481_v2, %v482_v3 }
 0x2a8   : > { %v488_v6 = vshra.s32 %v486_v5, 16  ;;  %vm479_vm13 = vcmp.eq.s32.totalorder %v384_v41, %v1530_v4  ;;  %vm480_vm14 = vcmp.eq.s32.totalorder %v385_v42, %v1530_v4  ;;  %v487_v15 = vand.u32 65535, %v486_v5 }
 0x2a9   : > { %v483_v7 = vsel %vm479_vm13, 2147483648, %v384_v41  ;;  %v484_v9 = vsel %vm480_vm14, 2147483648, %v385_v42  ;;  %v423_v30 = vand.u32 4294963200, %v1530_v4  ;;  %v428_v44 = vsel %vm424_vm5, %v422_v28, %v426_v37 }
 0x2aa   : > { %v490_v8 = vcvt.s32.f32 %v488_v6  ;;  %vm501_vm15 = vcmp.gt.s32.totalorder %v483_v7, %v484_v9  ;;  %v489_v17 = vcvt.s32.f32 %v487_v15  ;;  %vm571_vm13 = vcmp.eq.s32.totalorder %v1518_v13, 1 }
 0x2ab   : > { %v502_v10 = vsel %vm501_vm15, %v483_v7, %v484_v9  ;;  %v427_v38 = vxor.u32 2147483647, %v423_v30  ;;  %vm425_vm6 = vcmp.ge.s32.totalorder %v423_v30, 0  ;;  %v473_v54 = vsel %vm472_vm7, %v428_v44, -inf }
 0x2ac   : > { %491 = vmax.xlane.f32.xlu0 %v490_v8  ;;  %v504_v11 = vshra.s32 %v502_v10, 16  ;;  %v503_v18 = vand.u32 65535, %v502_v10 }
 0x2ad   : > { %v429_v48 = vsel %vm425_vm6, %v423_v30, %v427_v38 }
 0x2ae   : > { %v506_v12 = vcvt.s32.f32 %v504_v11  ;;  %v505_v21 = vcvt.s32.f32 %v503_v18  ;;  %v474_v55 = vsel %vm472_vm7, %v429_v48, -inf }
 0x2b0   : > { %507 = vmax.xlane.f32.xlu1 %v506_v12 }
 0x339   : > { %v492_v16 = vpop.xlane.xlu0 %491 }
 0x33a   : > { %vm493_vm0 = vcmp.eq.f32.partialorder %v490_v8, %v492_v16  ;;  %v498_v23 = vcvt.f32.s32 %v492_v16 }
 0x33b   : > { %v494_v19 = vsel %vm493_vm0, %v489_v17, -inf }
 0x33c   : > { %495 = vmax.xlane.f32.xlu0 %v494_v19  ;;  %v499_v25 = vshll.u32 %v498_v23, 16 }
 0x33d   : > { %v508_v20 = vpop.xlane.xlu1 %507 }
 0x33e   : > { %vm509_vm1 = vcmp.eq.f32.partialorder %v506_v12, %v508_v20  ;;  %v514_v27 = vcvt.f32.s32 %v508_v20 }
 0x33f   : > { %v510_v22 = vsel %vm509_vm1, %v505_v21, -inf }
 0x340   : > { %511 = vmax.xlane.f32.xlu1 %v510_v22  ;;  %v515_v33 = vshll.u32 %v514_v27, 16 }
 0x3c9   : > { %v496_v24 = vpop.xlane.xlu0 %495 }
 0x3ca   : > { %v497_v26 = vcvt.f32.s32 %v496_v24 }
 0x3cc   : > { %v1535_v29 = vadd.s32 %v499_v25, %v497_v26 }
 0x3cd   : > { %v512_v32 = vpop.xlane.xlu1 %511 }
 0x3ce   : > { %v521_v31 = vand.u32 4294963200, %v1535_v29  ;;  %vm576_vm2 = vcmp.eq.s32.totalorder %v481_v2, %v1535_v29  ;;  %vm577_vm3 = vcmp.eq.s32.totalorder %v482_v3, %v1535_v29  ;;  %v513_v34 = vcvt.f32.s32 %v512_v32 }
 0x3cf   : > { %v580_v35 = vsel %vm576_vm2, 2147483648, %v481_v2  ;;  %v581_v36 = vsel %vm577_vm3, 2147483648, %v482_v3 }
 0x3d0   : > { %vm584_vm4 = vcmp.gt.s32.totalorder %v580_v35, %v581_v36  ;;  %v1541_v39 = vadd.s32 %v515_v33, %v513_v34  ;;  %v525_v41 = vxor.u32 2147483647, %v521_v31  ;;  %vm523_vm8 = vcmp.ge.s32.totalorder %v521_v31, 0 }
 0x3d1   : > { %v585_v40 = vsel %vm584_vm4, %v580_v35, %v581_v36 }
 0x3d2   : > { %v587_v42 = vshra.s32 %v585_v40, 16  ;;  %v522_v43 = vand.u32 4294963200, %v1541_v39  ;;  %vm578_vm9 = vcmp.eq.s32.totalorder %v483_v7, %v1541_v39  ;;  %vm579_vm10 = vcmp.eq.s32.totalorder %v484_v9, %v1541_v39 }
 0x3d3   : > { %v582_v46 = vsel %vm578_vm9, 2147483648, %v483_v7  ;;  %v583_v47 = vsel %vm579_vm10, 2147483648, %v484_v9  ;;  %v527_v50 = vsel %vm523_vm8, %v521_v31, %v525_v41  ;;  %v586_v59 = vand.u32 65535, %v585_v40 }
 0x3d4   : > { %v589_v45 = vcvt.s32.f32 %v587_v42  ;;  %vm524_vm11 = vcmp.ge.s32.totalorder %v522_v43, 0  ;;  %v526_v49 = vxor.u32 2147483647, %v522_v43  ;;  %vm600_vm12 = vcmp.gt.s32.totalorder %v582_v46, %v583_v47 }
 0x3d5   : > { %v601_v51 = vsel %vm600_vm12, %v582_v46, %v583_v47  ;;  %v572_v57 = vsel %vm571_vm13, %v527_v50, %v473_v54  ;;  %v588_v61 = vcvt.s32.f32 %v586_v59  ;;  %vm670_vm9 = vcmp.eq.s32.totalorder %v1518_v13, 2 }
 0x3d6   : > { %590 = vmax.xlane.f32.xlu0 %v589_v45  ;;  %v528_v52 = vsel %vm524_vm11, %v522_v43, %v526_v49  ;;  %v603_v53 = vshra.s32 %v601_v51, 16  ;;  %v602_v63 = vand.u32 65535, %v601_v51 }
 0x3d7   : > { %v573_v58 = vsel %vm571_vm13, %v528_v52, %v474_v55 }
 0x3d8   : > { %v605_v56 = vcvt.s32.f32 %v603_v53  ;;  %v604_v2 = vcvt.s32.f32 %v602_v63 }
 0x3da   : > { %606 = vmax.xlane.f32.xlu1 %v605_v56 }
 0x463   : > { %v591_v60 = vpop.xlane.xlu0 %590 }
 0x464   : > { %vm592_vm14 = vcmp.eq.f32.partialorder %v589_v45, %v591_v60  ;;  %v597_v5 = vcvt.f32.s32 %v591_v60 }
 0x465   : > { %v593_v0 = vsel %vm592_vm14, %v588_v61, -inf }
 0x466   : > { %594 = vmax.xlane.f32.xlu0 %v593_v0  ;;  %v598_v7 = vshll.u32 %v597_v5, 16 }
 0x467   : > { %v607_v1 = vpop.xlane.xlu1 %606 }
 0x468   : > { %vm608_vm15 = vcmp.eq.f32.partialorder %v605_v56, %v607_v1  ;;  %v613_v9 = vcvt.f32.s32 %v607_v1 }
 0x469   : > { %v609_v3 = vsel %vm608_vm15, %v604_v2, -inf }
 0x46a   : > { %610 = vmax.xlane.f32.xlu1 %v609_v3  ;;  %v614_v15 = vshll.u32 %v613_v9, 16 }
 0x4f3   : > { %v595_v6 = vpop.xlane.xlu0 %594 }
 0x4f4   : > { %v596_v8 = vcvt.f32.s32 %v595_v6 }
 0x4f6   : > { %v1556_v10 = vadd.s32 %v598_v7, %v596_v8 }
 0x4f7   : > { %v611_v12 = vpop.xlane.xlu1 %610 }
 0x4f8   : > { %v620_v11 = vand.u32 4294963200, %v1556_v10  ;;  %vm675_vm0 = vcmp.eq.s32.totalorder %v580_v35, %v1556_v10  ;;  %vm676_vm1 = vcmp.eq.s32.totalorder %v581_v36, %v1556_v10  ;;  %v612_v16 = vcvt.f32.s32 %v611_v12 }
 0x4f9   : > { %v679_v17 = vsel %vm675_vm0, 2147483648, %v580_v35  ;;  %v680_v18 = vsel %vm676_vm1, 2147483648, %v581_v36  ;;  %v418_v12 = vand.u32 4095, %v1526_v62  ;;  %v518_v62 = vand.u32 4095, %v1541_v39 }
 0x4fa   : > { %vm683_vm2 = vcmp.gt.s32.totalorder %v679_v17, %v680_v18  ;;  %v1561_v19 = vadd.s32 %v614_v15, %v612_v16  ;;  %v624_v21 = vxor.u32 2147483647, %v620_v11  ;;  %vm622_vm3 = vcmp.ge.s32.totalorder %v620_v11, 0 }
 0x4fb   : > { %v684_v20 = vsel %vm683_vm2, %v679_v17, %v680_v18  ;;  %v1591_v15 = vsub.s32 255, %v418_v12  ;;  %v517_v16 = vand.u32 4095, %v1535_v29 }
 0x4fc   : > { %v686_v22 = vshra.s32 %v684_v20, 16  ;;  %v621_v23 = vand.u32 4294963200, %v1561_v19  ;;  %vm677_vm4 = vcmp.eq.s32.totalorder %v582_v46, %v1561_v19  ;;  %vm678_vm5 = vcmp.eq.s32.totalorder %v583_v47, %v1561_v19 }
 0x4fd   : > { %v681_v25 = vsel %vm677_vm4, 2147483648, %v582_v46  ;;  %v682_v26 = vsel %vm678_vm5, 2147483648, %v583_v47  ;;  %v626_v28 = vsel %vm622_vm3, %v620_v11, %v624_v21  ;;  %v685_v36 = vand.u32 65535, %v684_v20 }
 0x4fe   : > { %v688_v24 = vcvt.s32.f32 %v686_v22  ;;  %vm623_vm6 = vcmp.ge.s32.totalorder %v621_v23, 0  ;;  %v625_v27 = vxor.u32 2147483647, %v621_v23  ;;  %vm699_vm8 = vcmp.gt.s32.totalorder %v681_v25, %v682_v26 }
 0x4ff   : > { %v700_v30 = vsel %vm699_vm8, %v681_v25, %v682_v26  ;;  %v671_v34 = vsel %vm670_vm9, %v626_v28, %v572_v57  ;;  %v687_v38 = vcvt.s32.f32 %v685_v36  ;;  %vm769_vm5 = vcmp.eq.s32.totalorder %v1518_v13, 3 }
 0x500   : > { %689 = vmax.xlane.f32.xlu0 %v688_v24  ;;  %v627_v31 = vsel %vm623_vm6, %v621_v23, %v625_v27  ;;  %v702_v32 = vshra.s32 %v700_v30, 16  ;;  %v701_v40 = vand.u32 65535, %v700_v30  ;;  %vm432_vm6 = vcmp.eq.s32.totalorder %v1518_v13, %v1591_v15  ;;  %v1613_v27 = vld [vmem:[#allocation8 + $0x8] sm:$0xff] }
 0x501   : > { %v672_v35 = vsel %vm670_vm9, %v627_v31, %v573_v58  ;;  %v1599_v20 = vsub.s32 255, %v517_v16  ;;  %v616_v21 = vand.u32 4095, %v1556_v10  ;;  %v1617_v10 = vsub.s32 255, %v518_v62 }
 0x502   : > { %v704_v33 = vcvt.s32.f32 %v702_v32  ;;  %v703_v43 = vcvt.s32.f32 %v701_v40  ;;  %v617_v39 = vand.u32 4095, %v1561_v19 }
 0x503   : > { %vm531_vm8 = vcmp.eq.s32.totalorder %v1518_v13, %v1599_v20 }
 0x504   : > { %705 = vmax.xlane.f32.xlu1 %v704_v33  ;;  %v1633_v19 = vsub.s32 255, %v617_v39 }
 0x58d   : > { %v690_v37 = vpop.xlane.xlu0 %689 }
 0x58e   : > { %vm691_vm10 = vcmp.eq.f32.partialorder %v688_v24, %v690_v37  ;;  %v696_v45 = vcvt.f32.s32 %v690_v37 }
 0x58f   : > { %v692_v41 = vsel %vm691_vm10, %v687_v38, -inf }
 0x590   : > { %693 = vmax.xlane.f32.xlu0 %v692_v41  ;;  %v697_v47 = vshll.u32 %v696_v45, 16 }
 0x591   : > { %v706_v42 = vpop.xlane.xlu1 %705 }
 0x592   : > { %vm707_vm11 = vcmp.eq.f32.partialorder %v704_v33, %v706_v42  ;;  %v712_v49 = vcvt.f32.s32 %v706_v42 }
 0x593   : > { %v708_v44 = vsel %vm707_vm11, %v703_v43, -inf }
 0x594   : > { %709 = vmax.xlane.f32.xlu1 %v708_v44  ;;  %v713_v52 = vshll.u32 %v712_v49, 16 }
 0x61d   : > { %v694_v46 = vpop.xlane.xlu0 %693 }
 0x61e   : > { %v695_v48 = vcvt.f32.s32 %v694_v46 }
 0x620   : > { %v1571_v50 = vadd.s32 %v697_v47, %v695_v48 }
 0x621   : > { %v710_v51 = vpop.xlane.xlu1 %709 }
 0x622   : > { %vm774_vm12 = vcmp.eq.s32.totalorder %v679_v17, %v1571_v50  ;;  %vm775_vm14 = vcmp.eq.s32.totalorder %v680_v18, %v1571_v50  ;;  %v711_v53 = vcvt.f32.s32 %v710_v51  ;;  %v719_v56 = vand.u32 4294963200, %v1571_v50 }
 0x623   : > { %v778_v54 = vsel %vm774_vm12, 2147483648, %v679_v17  ;;  %v779_v55 = vsel %vm775_vm14, 2147483648, %v680_v18  ;;  %v419_v17 = vand.u32 4095, %v1530_v4  ;;  %v1595_v18 = vld [vmem:[#allocation8] sm:$0xff]  ;;  %v1610_v4 = vsub.s32 255, %v616_v21 }
 0x624   : > { %vm782_vm15 = vcmp.gt.s32.totalorder %v778_v54, %v779_v55  ;;  %v1576_v57 = vadd.s32 %v713_v52, %v711_v53  ;;  %v723_v61 = vxor.u32 2147483647, %v719_v56  ;;  %vm721_vm2 = vcmp.ge.s32.totalorder %v719_v56, 0 }
 0x625   : > { %v783_v58 = vsel %vm782_vm15, %v778_v54, %v779_v55  ;;  %v1602_v23 = vsub.s32 255, %v419_v17  ;;  %v1606_v24 = vsel %vm432_vm6, %v1595_v18, 2147483648  ;;  %v715_v29 = vand.u32 4095, %v1571_v50 }
 0x626   : > { %v785_v59 = vshra.s32 %v783_v58, 16  ;;  %v720_v60 = vand.u32 4294963200, %v1576_v57  ;;  %vm776_vm0 = vcmp.eq.s32.totalorder %v681_v25, %v1576_v57  ;;  %vm777_vm1 = vcmp.eq.s32.totalorder %v682_v26, %v1576_v57 }
 0x627   : > { %v780_v0 = vsel %vm776_vm0, 2147483648, %v681_v25  ;;  %v781_v1 = vsel %vm777_vm1, 2147483648, %v682_v26  ;;  %v725_v6 = vsel %vm721_vm2, %v719_v56, %v723_v61  ;;  %v784_v22 = vand.u32 65535, %v783_v58 }
 0x628   : > { %v787_v63 = vcvt.s32.f32 %v785_v59  ;;  %vm722_vm3 = vcmp.ge.s32.totalorder %v720_v60, 0  ;;  %v724_v2 = vxor.u32 2147483647, %v720_v60  ;;  %vm798_vm4 = vcmp.gt.s32.totalorder %v780_v0, %v781_v1 }
 0x629   : > { %v799_v3 = vsel %vm798_vm4, %v780_v0, %v781_v1  ;;  %v1584_v9 = vsel %vm769_vm5, %v725_v6, %v671_v34  ;;  %v786_v26 = vcvt.s32.f32 %v784_v22  ;;  %vm433_vm10 = vcmp.eq.s32.totalorder %v1518_v13, %v1602_v23 }
 0x62a   : > { %788 = vmax.xlane.f32.xlu0 %v787_v63  ;;  %v801_v5 = vshra.s32 %v799_v3, 16  ;;  %v726_v7 = vsel %vm722_vm3, %v720_v60, %v724_v2  ;;  %v437_v28 = vshra.s32 %v1606_v24, 16  ;;  %v800_v30 = vand.u32 65535, %v799_v3 }
 0x62b   : > { %v1588_v11 = vsel %vm769_vm5, %v726_v7, %v672_v35  ;;  %v1622_v32 = vsel %vm531_vm8, %v1595_v18, 2147483648  ;;  %v1625_v33 = vsel %vm433_vm10, %v1613_v27, 2147483648  ;;  %vm630_vm12 = vcmp.eq.s32.totalorder %v1518_v13, %v1610_v4 }
 0x62c   : > { %v803_v8 = vcvt.s32.f32 %v801_v5  ;;  %v1629_v34 = vsub.s32 255, %v715_v29  ;;  %vm532_vm14 = vcmp.eq.s32.totalorder %v1518_v13, %v1617_v10  ;;  %v716_v35 = vand.u32 4095, %v1576_v57 }
 0x62d   : > { %v1636_v37 = vcvt.s32.f32 %v437_v28  ;;  %v802_v38 = vcvt.s32.f32 %v800_v30  ;;  %v536_v40 = vshra.s32 %v1622_v32, 16  ;;  %v451_v41 = vshra.s32 %v1625_v33, 16 }
 0x62e   : > { %804 = vmax.xlane.f32.xlu1 %v803_v8  ;;  %v1641_v42 = vsel %vm630_vm12, %v1595_v18, 2147483648  ;;  %v1645_v44 = vsel %vm532_vm14, %v1613_v27, 2147483648  ;;  %vm729_vm0 = vcmp.eq.s32.totalorder %v1518_v13, %v1629_v34  ;;  %vm631_vm1 = vcmp.eq.s32.totalorder %v1518_v13, %v1633_v19 }
 0x62f   : > { %v1651_v45 = vsub.s32 255, %v716_v35  ;;  %v1653_v46 = vcvt.s32.f32 %v536_v40  ;;  %v635_v47 = vshra.s32 %v1641_v42, 16  ;;  %v1656_v48 = vcvt.s32.f32 %v451_v41 }
 0x630   : > { %v550_v49 = vshra.s32 %v1645_v44, 16  ;;  %v1660_v50 = vsel %vm729_vm0, %v1595_v18, 2147483648  ;;  %v1664_v51 = vsel %vm631_vm1, %v1613_v27, 2147483648  ;;  %v436_v30 = vand.u32 65535, %v1606_v24 }
 0x631   : > { %vm730_vm2 = vcmp.eq.s32.totalorder %v1518_v13, %v1651_v45  ;;  %v1669_v52 = vcvt.s32.f32 %v635_v47  ;;  %v734_v53 = vshra.s32 %v1660_v50, 16  ;;  %v649_v55 = vshra.s32 %v1664_v51, 16 }
 0x632   : > { %v1672_v54 = vcvt.s32.f32 %v550_v49  ;;  %v1677_v56 = vsel %vm730_vm2, %v1613_v27, 2147483648  ;;  %v535_v40 = vand.u32 65535, %v1622_v32  ;;  %v634_v32 = vand.u32 65535, %v1641_v42 }
 0x633   : > { %v1680_v57 = vcvt.s32.f32 %v734_v53  ;;  %v1682_v58 = vcvt.s32.f32 %v649_v55  ;;  %v748_v59 = vshra.s32 %v1677_v56, 16 }
 0x635   : > { %v1687_v60 = vcvt.s32.f32 %v748_v59  ;;  %v549_v59 = vand.u32 65535, %v1645_v44  ;;  %v636_v44 = vcvt.s32.f32 %v634_v32 }
 0x6b7   : > { %v789_v25 = vpop.xlane.xlu0 %788 }
 0x6b8   : > { %vm790_vm11 = vcmp.eq.f32.partialorder %v787_v63, %v789_v25  ;;  %v795_v61 = vcvt.f32.s32 %v789_v25 }
 0x6b9   : > { %v791_v31 = vsel %vm790_vm11, %v786_v26, -inf  ;;  %vm868_vm11 = vcmp.eq.s32.totalorder %v1518_v13, 4 }
 0x6ba   : > { %792 = vmax.xlane.f32.xlu0 %v791_v31  ;;  %v796_v0 = vshll.u32 %v795_v61, 16 }
 0x6bb   : > { %v805_v36 = vpop.xlane.xlu1 %804 }
 0x6bc   : > { %vm806_vm15 = vcmp.eq.f32.partialorder %v803_v8, %v805_v36  ;;  %v811_v2 = vcvt.f32.s32 %v805_v36 }
 0x6bd   : > { %v807_v43 = vsel %vm806_vm15, %v802_v38, -inf  ;;  %v438_v38 = vcvt.s32.f32 %v436_v30 }
 0x6be   : > { %440 = vmax.xlane.f32.xlu0 %v1636_v37  ;;  %808 = vmax.xlane.f32.xlu1 %v807_v43  ;;  %v812_v7 = vshll.u32 %v811_v2, 16  ;;  %v450_v43 = vand.u32 65535, %v1625_v33 }
 0x6c0   : > { %v452_v33 = vcvt.s32.f32 %v450_v43 }
 0x6c2   : > { %539 = vmax.xlane.f32.xlu0 %v1653_v46  ;;  %454 = vmax.xlane.f32.xlu1 %v1656_v48 }
 0x6c6   : > { %638 = vmax.xlane.f32.xlu0 %v1669_v52  ;;  %553 = vmax.xlane.f32.xlu1 %v1672_v54 }
 0x6ca   : > { %737 = vmax.xlane.f32.xlu0 %v1680_v57  ;;  %652 = vmax.xlane.f32.xlu1 %v1682_v58 }
 0x6ce   : > { %751 = vmax.xlane.f32.xlu1 %v1687_v60 }
 0x747   : > { %v793_v63 = vpop.xlane.xlu0 %792 }
 0x748   : > { %v794_v1 = vcvt.f32.s32 %v793_v63 }
 0x74a   : > { %v797_v3 = vadd.s32 %v796_v0, %v794_v1  ;;  %v648_v1 = vand.u32 65535, %v1664_v51 }
 0x74b   : > { %v809_v6 = vpop.xlane.xlu1 %808  ;;  %v1690_v8 = vpop.xlane.xlu0 %440 }
 0x74c   : > { %v814_v5 = vand.u32 4095, %v797_v3  ;;  %v810_v12 = vcvt.f32.s32 %v809_v6  ;;  %v818_v21 = vand.u32 4294963200, %v797_v3  ;;  %vm442_vm10 = vcmp.eq.f32.partialorder %v1636_v37, %v1690_v8 }
 0x74d   : > { %v443_v55 = vsel %vm442_vm10, %v438_v38, -inf  ;;  %v650_v6 = vcvt.s32.f32 %v648_v1  ;;  %vm469_vm10 = vcmp.lt.s32.totalorder %v1602_v23, 128 }
 0x74e   : > { %v1692_v16 = vsub.s32 255, %v814_v5  ;;  %v813_v17 = vadd.s32 %v812_v7, %v810_v12  ;;  %v822_v35 = vxor.u32 2147483647, %v818_v21  ;;  %vm820_vm6 = vcmp.ge.s32.totalorder %v818_v21, 0 }
 0x74f   : > { %v1699_v25 = vpop.xlane.xlu1 %454  ;;  %v1704_v28 = vpop.xlane.xlu0 %539 }
 0x750   : > { %vm828_vm3 = vcmp.eq.s32.totalorder %v1518_v13, %v1692_v16  ;;  %v815_v22 = vand.u32 4095, %v813_v17  ;;  %v819_v62 = vand.u32 4294963200, %v813_v17  ;;  %v824_v47 = vsel %vm820_vm6, %v818_v21, %v822_v35 }
 0x751   : > { %v1697_v29 = vsel %vm828_vm3, %v1595_v18, 2147483648  ;;  %vm541_vm12 = vcmp.eq.f32.partialorder %v1653_v46, %v1704_v28  ;;  %vm456_vm14 = vcmp.eq.f32.partialorder %v1656_v48, %v1699_v25  ;;  %v869_v61 = vsel %vm868_vm11, %v824_v47, %v1584_v9 }
 0x752   : > { %v833_v26 = vshra.s32 %v1697_v29, 16  ;;  %v1702_v39 = vsub.s32 255, %v815_v22  ;;  %v823_v36 = vxor.u32 2147483647, %v819_v62  ;;  %vm821_vm8 = vcmp.ge.s32.totalorder %v819_v62, 0  ;;  %873 = vst [vmem:[#allocation7] sm:$0xff] %v869_v61 }
 0x753   : > { %v1719_v41 = vpop.xlane.xlu1 %553  ;;  %v1723_v53 = vpop.xlane.xlu0 %638  ;;  %v457_v48 = vsel %vm456_vm14, %v452_v33, -inf  ;;  %v733_v9 = vand.u32 65535, %v1660_v50  ;;  %v447_v21 = vcvt.f32.s32 %v1690_v8  ;;  %v1016_v8 = vadd.s32 4294967168, %v1599_v20 }
 0x754   : > { %v1707_v31 = vcvt.s32.f32 %v833_v26  ;;  %vm829_vm4 = vcmp.eq.s32.totalorder %v1518_v13, %v1702_v39  ;;  %v825_v49 = vsel %vm821_vm8, %v819_v62, %v823_v36  ;;  %vm640_vm15 = vcmp.eq.f32.partialorder %v1669_v52, %v1723_v53 }
 0x755   : > { %v1715_v18 = vsel %vm829_vm4, %v1613_v27, 2147483648  ;;  %v537_v27 = vcvt.s32.f32 %v535_v40  ;;  %v870_v63 = vsel %vm868_vm11, %v825_v49, %v1588_v11  ;;  %vm555_vm0 = vcmp.eq.f32.partialorder %v1672_v54, %v1719_v41 }
 0x756   : > { %836 = vmax.xlane.f32.xlu0 %v1707_v31  ;;  %v847_v24 = vshra.s32 %v1715_v18, 16  ;;  %874 = vst [vmem:[#allocation7 + $0x8] sm:$0xff] %v870_v63  ;;  %v551_v11 = vcvt.s32.f32 %v549_v59  ;;  %v641_v2 = vsel %vm640_vm15, %v636_v44, -inf  ;;  %v735_v52 = vcvt.s32.f32 %v733_v9 }
 0x757   : > { %v542_v46 = vsel %vm541_vm12, %v537_v27, -inf  ;;  %v1740_v0 = vpop.xlane.xlu1 %652  ;;  %v1744_v42 = vpop.xlane.xlu0 %737  ;;  %v747_v54 = vand.u32 65535, %v1677_v56  ;;  %v846_v56 = vand.u32 65535, %v1715_v18  ;;  %v1014_v62 = vadd.s32 4294967168, %v1591_v15 }
 0x758   : > { %v1725_v37 = vcvt.s32.f32 %v847_v24  ;;  %v556_v3 = vsel %vm555_vm0, %v551_v11, -inf  ;;  %vm739_vm1 = vcmp.eq.f32.partialorder %v1680_v57, %v1744_v42  ;;  %vm654_vm2 = vcmp.eq.f32.partialorder %v1682_v58, %v1740_v0 }
 0x759   : > { %v740_v50 = vsel %vm739_vm1, %v735_v52, -inf  ;;  %v655_v7 = vsel %vm654_vm2, %v650_v6, -inf  ;;  %v749_v51 = vcvt.s32.f32 %v747_v54  ;;  %v832_v57 = vand.u32 65535, %v1697_v29 }
 0x75a   : > { %444 = vmax.xlane.f32.xlu0 %v443_v55  ;;  %850 = vmax.xlane.f32.xlu1 %v1725_v37  ;;  %v448_v30 = vshll.u32 %v447_v21, 16  ;;  %v546_v29 = vcvt.f32.s32 %v1704_v28  ;;  %v848_v38 = vcvt.s32.f32 %v846_v56  ;;  %v466_v18 = vadd.s32 %v1014_v62, %v1520_v14 }
 0x75b   : > { %v1754_v5 = vpop.xlane.xlu1 %751  ;;  %v834_v58 = vcvt.s32.f32 %v832_v57  ;;  %v645_v43 = vcvt.f32.s32 %v1723_v53  ;;  %vm468_vm8 = vcmp.lt.s32.totalorder %v1591_v15, 128  ;;  %v565_v33 = vadd.s32 %v1016_v8, %v1520_v14 }
 0x75c   : > { %vm753_vm3 = vcmp.eq.f32.partialorder %v1687_v60, %v1754_v5  ;;  %v1015_v60 = vadd.s32 4294967168, %v1602_v23  ;;  %v547_v47 = vshll.u32 %v546_v29, 16  ;;  %v1018_v53 = vadd.s32 4294967168, %v1610_v4 }
 0x75d   : > { %v754_v12 = vsel %vm753_vm3, %v749_v51, -inf  ;;  %v1017_v15 = vadd.s32 4294967168, %v1617_v10  ;;  %vm567_vm12 = vcmp.lt.s32.totalorder %v1599_v20, 128  ;;  %v646_v63 = vshll.u32 %v645_v43, 16 }
 0x75e   : > { %543 = vmax.xlane.f32.xlu0 %v542_v46  ;;  %458 = vmax.xlane.f32.xlu1 %v457_v48  ;;  %v744_v46 = vcvt.f32.s32 %v1744_v42  ;;  %vm568_vm14 = vcmp.lt.s32.totalorder %v1617_v10, 128  ;;  %v659_v9 = vcvt.f32.s32 %v1740_v0  ;;  %v1020_v6 = vadd.s32 4294967168, %v1629_v34 }
 0x75f   : > { %v664_v54 = vadd.s32 %v1018_v53, %v1520_v14  ;;  %v566_v0 = vadd.s32 %v1017_v15, %v1520_v14  ;;  %vm666_vm15 = vcmp.lt.s32.totalorder %v1610_v4, 128  ;;  %v758_v21 = vcvt.f32.s32 %v1754_v5 }
 0x760   : > { %v745_v51 = vshll.u32 %v744_v46, 16  ;;  %v763_v29 = vadd.s32 %v1020_v6, %v1520_v14  ;;  %v1021_v5 = vadd.s32 4294967168, %v1651_v45  ;;  %vm765_vm0 = vcmp.lt.s32.totalorder %v1629_v34, 128 }
 0x762   : > { %642 = vmax.xlane.f32.xlu0 %v641_v2  ;;  %557 = vmax.xlane.f32.xlu1 %v556_v3 }
 0x766   : > { %741 = vmax.xlane.f32.xlu0 %v740_v50  ;;  %656 = vmax.xlane.f32.xlu1 %v655_v7  ;;  %v1019_v7 = vadd.s32 4294967168, %v1633_v19 }
 0x76a   : > { %755 = vmax.xlane.f32.xlu1 %v754_v12 }
 0x7e3   : > { %v1760_v17 = vpop.xlane.xlu0 %836 }
 0x7e4   : > { %vm838_vm4 = vcmp.eq.f32.partialorder %v1707_v31, %v1760_v17  ;;  %v461_v31 = vcvt.f32.s32 %v1699_v25  ;;  %v467_v25 = vadd.s32 %v1015_v60, %v1520_v14 }
 0x7e5   : > { %v839_v22 = vsel %vm838_vm4, %v834_v58, -inf  ;;  %v660_v58 = vshll.u32 %v659_v9, 16 }
 0x7e6   : > { %840 = vmax.xlane.f32.xlu0 %v839_v22  ;;  %v462_v32 = vshll.u32 %v461_v31, 16 }
 0x7e7   : > { %v445_v26 = vpop.xlane.xlu0 %444  ;;  %v1769_v36 = vpop.xlane.xlu1 %850 }
 0x7e8   : > { %v446_v35 = vcvt.f32.s32 %v445_v26  ;;  %vm852_vm6 = vcmp.eq.f32.partialorder %v1725_v37, %v1769_v36  ;;  %v560_v37 = vcvt.f32.s32 %v1719_v41 }
 0x7e9   : > { %v853_v40 = vsel %vm852_vm6, %v848_v38, -inf  ;;  %v665_v38 = vadd.s32 %v1019_v7, %v1520_v14 }
 0x7ea   : > { %v449_v24 = vadd.s32 %v448_v30, %v446_v35  ;;  %854 = vmax.xlane.f32.xlu1 %v853_v40  ;;  %v561_v3 = vshll.u32 %v560_v37, 16 }
 0x7eb   : > { %v544_v28 = vpop.xlane.xlu0 %543  ;;  %v459_v27 = vpop.xlane.xlu1 %458 }
 0x7ec   : > { %v470_v49 = vsel %vm468_vm8, %v449_v24, %v466_v18  ;;  %v545_v55 = vcvt.f32.s32 %v544_v28  ;;  %v460_v59 = vcvt.f32.s32 %v459_v27  ;;  %v759_v18 = vshll.u32 %v758_v21, 16 }
 0x7ed   : > { %v475_v41 = vsel %vm472_vm7, %v470_v49, 0 }
 0x7ee   : > { %v548_v61 = vadd.s32 %v547_v47, %v545_v55  ;;  %v463_v48 = vadd.s32 %v462_v32, %v460_v59  ;;  %v764_v47 = vadd.s32 %v1021_v5, %v1520_v14 }
 0x7ef   : > { %v643_v44 = vpop.xlane.xlu0 %642  ;;  %v558_v2 = vpop.xlane.xlu1 %557 }
 0x7f0   : > { %v569_v11 = vsel %vm567_vm12, %v548_v61, %v565_v33  ;;  %v644_v1 = vcvt.f32.s32 %v643_v44  ;;  %v471_v52 = vsel %vm469_vm10, %v463_v48, %v467_v25  ;;  %v559_v42 = vcvt.f32.s32 %v558_v2 }
 0x7f1   : > { %v574_v20 = vsel %vm571_vm13, %v569_v11, %v475_v41  ;;  %v476_v62 = vsel %vm472_vm7, %v471_v52, 0  ;;  %vm667_vm7 = vcmp.lt.s32.totalorder %v1633_v19, 128 }
 0x7f2   : > { %v647_v50 = vadd.s32 %v646_v63, %v644_v1  ;;  %v562_v12 = vadd.s32 %v561_v3, %v559_v42 }
 0x7f3   : > { %v742_v57 = vpop.xlane.xlu0 %741  ;;  %v657_v22 = vpop.xlane.xlu1 %656 }
 0x7f4   : > { %v668_v23 = vsel %vm666_vm15, %v647_v50, %v664_v54  ;;  %v743_v56 = vcvt.f32.s32 %v742_v57  ;;  %v570_v26 = vsel %vm568_vm14, %v562_v12, %v566_v0  ;;  %v658_v30 = vcvt.f32.s32 %v657_v22 }
 0x7f5   : > { %v673_v60 = vsel %vm670_vm9, %v668_v23, %v574_v20  ;;  %v575_v4 = vsel %vm571_vm13, %v570_v26, %v476_v62  ;;  %vm766_vm13 = vcmp.lt.s32.totalorder %v1651_v45, 128 }
 0x7f6   : > { %v746_v35 = vadd.s32 %v745_v51, %v743_v56  ;;  %v661_v8 = vadd.s32 %v660_v58, %v658_v30 }
 0x7f7   : > { %v756_v10 = vpop.xlane.xlu1 %755 }
 0x7f8   : > { %v767_v31 = vsel %vm765_vm0, %v746_v35, %v763_v29  ;;  %v669_v40 = vsel %vm667_vm7, %v661_v8, %v665_v38  ;;  %v757_v43 = vcvt.f32.s32 %v756_v10 }
 0x7f9   : > { %v772_v24 = vsel %vm769_vm5, %v767_v31, %v673_v60  ;;  %v674_v28 = vsel %vm670_vm9, %v669_v40, %v575_v4 }
 0x7fa   : > { %v760_v34 = vadd.s32 %v759_v18, %v757_v43 }
 0x7fc   : > { %v768_v49 = vsel %vm766_vm13, %v760_v34, %v764_v47 }
 0x7fd   : > { %v773_v55 = vsel %vm769_vm5, %v768_v49, %v674_v28 }
 0x7fe   : > { %1228 = shalt.err (!%p1225_p13)
}
 0x7ff   : > { %s1229_s18 = scalar_lea.hbm %s1909_s2, 256 }
 0x800   : > { %p1230_p2 = scmp.ne.s32.totalorder %s1909_s2, %s1229_s18  ;;  %p1235_p0 = scmp.lt.u32.totalorder %s1229_s18, %s1909_s2 }
 0x802   : > { %p1231_p3 = pnand %p1230_p2, %p1823_p1 }
 0x804   : > { %p1232_p12 = pneg %p1231_p3 }
 0x806   : > { %p1237_p6 = pnand %p1235_p0, %p1232_p12 }
 0x808   : > { %1240 = shalt.err (!%p1237_p6)
}
 0x809   : > { %s1340_s26 = smov 128   ;;  %s1341_s22 = smov 8   ;;  %v843_v19 = vcvt.f32.s32 %v1760_v17  ;;  %v1022_v45 = vadd.s32 4294967168, %v1692_v16  ;;  %v857_v37 = vcvt.f32.s32 %v1769_v36  ;;  %v1023_v53 = vadd.s32 4294967168, %v1702_v39 }
 0x80a   : > { %1067 = dma.vmem_to_hbm [thread:$0]  (%p1823_p1), %s887_s21, 256, %s1909_s2, [#allocation4], %s1340_s26, %s1340_s26, %s1341_s22   ;;  %vm864_vm9 = vcmp.lt.s32.totalorder %v1692_v16, 128  ;;  %vm865_vm5 = vcmp.lt.s32.totalorder %v1702_v39, 128 }
 0x80b   : > { %v844_v27 = vshll.u32 %v843_v19, 16  ;;  %v862_v33 = vadd.s32 %v1022_v45, %v1520_v14  ;;  %v858_v63 = vshll.u32 %v857_v37, 16  ;;  %s1342_s30 = smov [#allocation8]   ;;  %v863_v36 = vadd.s32 %v1023_v53, %v1520_v14 }
 0x80c   : > { %s902_s9 = sshll.u32 %s1342_s30, 4  ;;  %s903_s9 = int_to_ptr.vmem [resolvable:$true] %s902_s9 }
 0x80d   : > { %s1241_s5 = scalar_lea.vmem %s903_s9, 256  ;;  %p1248_p8 = scmp.lt.s32.totalorder %s903_s9, %s903_s9 }
 0x80e   : > { %p1242_p7 = scmp.ne.s32.totalorder %s903_s9, %s1241_s5  ;;  %p1249_p9 = scmp.lt.s32.totalorder %s1241_s5, %s1241_s5 }
 0x810   : > { %p1243_p4 = pnand %p1242_p7, %p1823_p1  ;;  %p1250_p10 = por %p1249_p9, %p1248_p8 }
 0x812   : > { %p1244_p5 = pneg %p1243_p4 }
 0x814   : > { %p1251_p11 = pnand %p1250_p10, %p1244_p5 }
 0x873   : > { %v841_v25 = vpop.xlane.xlu0 %840 }
 0x874   : > { %v842_v32 = vcvt.f32.s32 %v841_v25 }
 0x876   : > { %v845_v59 = vadd.s32 %v844_v27, %v842_v32 }
 0x877   : > { %v855_v61 = vpop.xlane.xlu1 %854 }
 0x878   : > { %v866_v15 = vsel %vm864_vm9, %v845_v59, %v862_v33  ;;  %v856_v46 = vcvt.f32.s32 %v855_v61 }
 0x879   : > { %v871_v17 = vsel %vm868_vm11, %v866_v15, %v772_v24 }
 0x87a   : > { %875 = vst [vmem:[#allocation8] sm:$0xff] %v871_v17  ;;  %v859_v48 = vadd.s32 %v858_v63, %v856_v46 }
 0x87c   : > { %v867_v44 = vsel %vm865_vm5, %v859_v48, %v863_v36 }
 0x87d   : > { %v872_v16 = vsel %vm868_vm11, %v867_v44, %v773_v55 }
 0x87e   : > { %876 = vst [vmem:[#allocation8 + $0x8] sm:$0xff] %v872_v16 }
 0x87f   : > { %1254 = shalt.err (!%p1251_p11)
}
 0x880   : > { %s1255_s19 = scalar_lea.hbm %s1910_s3, 256 }
 0x881   : > { %p1256_p13 = scmp.ne.s32.totalorder %s1910_s3, %s1255_s19  ;;  %p1261_p12 = scmp.lt.u32.totalorder %s1255_s19, %s1910_s3 }
 0x883   : > { %p1257_p2 = pnand %p1256_p13, %p1823_p1 }
 0x885   : > { %p1258_p3 = pneg %p1257_p2 }
 0x887   : > { %p1263_p0 = pnand %p1261_p12, %p1258_p3 }
 0x889   : > { %1266 = shalt.err (!%p1263_p0)
}
 0x88a   : > { %1069 = dma.vmem_to_hbm [thread:$0]  (%p1823_p1), %s903_s9, 256, %s1910_s3, [#allocation9], %s1340_s26, %s1340_s26, %s1341_s22  }
 0x88b   : > { %1300 = dma.done.wait (%p1823_p1), [#allocation4], 256  }
 0x88c   : > { %1302 = vsyncadd (%p1823_p1), [#allocation4], 4294967040 }
 0x88d   : > { %1304 = dma.done.wait (%p1823_p1), [#allocation9], 256  }
 0x88e   : > { %1306 = vsyncadd (%p1823_p1), [#allocation9], 4294967040 }
 0x88f PF: > { %s20_s17 = sadd.s32 1, %s1329_s17   ;;  %s1924_s12 = smov %s1313_s13 }
 0x890   : > { %p17_p6 = scmp.ge.s32.totalorder %s20_s17, 5   ;;  %s1925_s13 = smov %s1317_s14 }
 0x891   : > { %s1926_s14 = smov %s1451_s27  ;;  %s1927_s15 = smov %s1325_s16 }
 0x892   : > { %s1928_s16 = smov %s1930_s25  ;;  %19 = sbr.rel (!%p17_p6) target bundleno = 7 (0x7), region = 85 }
 0x899   :  { %922 = vsyncpa [#allocation3], 1 }
 0x89a   :  { %924 = vsyncpa [#allocation3 + $0x1], 1 }
 0x89b   :  { %925 = vsyncpa [#allocation6], 1 }
 0x89c   :  { %927 = vsyncpa [#allocation6 + $0x1], 1 }
 0x89d   :  { %928 = vsyncpa [#allocation4], 1 }
 0x89e   :  { %930 = vsyncpa [#allocation4 + $0x1], 1 }
 0x89f   :  { %931 = vsyncpa [#allocation9], 1 }

</bundles_post_ra>
